<compile_context>
chip_gen: v5e
topology: v5e:2x2
jax: 0.10.0
libtpu: 0.0.40
codegen_flags: <defaults>
</compile_context>

<pallas_src>
import numpy as np
import jax
import jax.numpy as jnp
from jax.experimental import pallas as pl
from jax.experimental.pallas import tpu as pltpu


# ------------------------------- static sizes -------------------------------
N = 2                      # batch
H = W = 16                 # input spatial
CIN = 3
C1, C2, C3 = 12, 12, 24
NUM_CLASSES = 3
H1, W1 = H // 2, W // 2    # 8, 8 : spatial after pool1 (= conv2 input/output spatial)
H2, W2 = H // 4, W // 4    # 4, 4 : spatial after pool2 (= conv3 input/output spatial)


# --------------------- host-precomputed selection matrices ------------------
def _build_selectors():
    """0/1 shift/pool matrices so conv2/conv3 become plain GEMMs in-kernel.

    S2[tap] : (4*N*H2*W2, N*H1*W1).  Row o = parity*(N*16) + n*16 + h2*4 + w2 selects the
              conv2 input pixel for tap (dy,dx) at output position (2*h2+ph, 2*w2+pw),
              zero row when the tap falls in the padding.  Ordering rows by parity lets
              the kernel realize the 2x2 max-pool as a max over 4 aligned row-chunks.
    S3[tap] : (N*H2*W2, N*H2*W2), same idea for conv3 (no pool, padding=1).
    RED     : (N, N*H2*W2) block-ones matrix for the per-image fc reduction.
    """
    S2 = np.zeros((9, 4 * N * H2 * W2, N * H1 * W1), np.float32)
    for tap in range(9):
        dy, dx = divmod(tap, 3)
        for par in range(4):
            ph, pw = divmod(par, 2)
            for n in range(N):
                for h2 in range(H2):
                    for w2 in range(W2):
                        sh = 2 * h2 + ph + dy - 1
                        sw = 2 * w2 + pw + dx - 1
                        if 0 <= sh < H1 and 0 <= sw < W1:
                            o = ((par * N + n) * H2 + h2) * W2 + w2
                            S2[tap, o, (n * H1 + sh) * W1 + sw] = 1.0

    S3 = np.zeros((9, N * H2 * W2, N * H2 * W2), np.float32)
    for tap in range(9):
        dy, dx = divmod(tap, 3)
        for n in range(N):
            for h in range(H2):
                for w in range(W2):
                    sh, sw = h + dy - 1, w + dx - 1
                    if 0 <= sh < H2 and 0 <= sw < W2:
                        S3[tap, (n * H2 + h) * W2 + w, (n * H2 + sh) * W2 + sw] = 1.0

    RED = np.zeros((N, N * H2 * W2), np.float32)
    for n in range(N):
        RED[n, n * H2 * W2:(n + 1) * H2 * W2] = 1.0
    return S2, S3, RED


_S2_NP, _S3_NP, _RED_NP = _build_selectors()


# ------------------------------- fused kernel -------------------------------
def net_kernel(p1_ref, w1_ref, b1_ref, s2_ref, w2_ref, b2_ref,
               s3_ref, w3_ref, b3_ref, wfc_ref, bfc_ref, red_ref, out_ref):
    f32 = jnp.float32

    # ---- conv1 (+bias) as ONE GEMM over parity-packed im2col rows (batch folded into M);
    #      2x2 maxpool == max over the 4 parity chunks (aligned 128-row slices), then relu.
    r1 = jnp.dot(p1_ref[...], w1_ref[...], preferred_element_type=f32) + b1_ref[...]
    r1 = r1.reshape(4, N * H1 * W1, C1)                       # (parity, n*h*w, c)
    x1 = jnp.maximum(jnp.maximum(r1[0], r1[1]), jnp.maximum(r1[2], r1[3]))
    x1 = jnp.maximum(x1, 0.0)                                 # (128, C1)

    # ---- conv2 (+bias) via 9 shift-select matmuls (rows parity-ordered) + per-tap GEMM;
    #      pool2 = max over the 4 parity chunks (aligned 32-row slices), then relu.
    acc2 = jnp.zeros((4 * N * H2 * W2, C2), f32)
    for tap in range(9):
        shifted = jnp.dot(s2_ref[tap], x1, preferred_element_type=f32)      # (128, C1)
        acc2 = acc2 + jnp.dot(shifted, w2_ref[tap], preferred_element_type=f32)
    r2 = (acc2 + b2_ref[...]).reshape(4, N * H2 * W2, C2)
    x2 = jnp.maximum(jnp.maximum(r2[0], r2[1]), jnp.maximum(r2[2], r2[3]))
    x2 = jnp.maximum(x2, 0.0)                                 # (32, C2), rows (n, h, w)

    # ---- conv3 (+bias, no pool) + relu.
    acc3 = jnp.zeros((N * H2 * W2, C3), f32)
    for tap in range(9):
        shifted = jnp.dot(s3_ref[tap], x2, preferred_element_type=f32)      # (32, C2)
        acc3 = acc3 + jnp.dot(shifted, w3_ref[tap], preferred_element_type=f32)
    r3 = jnp.maximum(acc3 + b3_ref[...], 0.0)                 # (32, C3), rows (n, h, w)
    # TODO(synk): Dropout2d / F.dropout are identity here (eval semantics).

    # ---- fc + log_softmax.  wfc_ref[k] is torch fc row k, permuted to the kernel's
    #      (n, h, w, c) activation layout; red_ref sums rows per image.
    lane = jax.lax.broadcasted_iota(jnp.int32, (1, NUM_CLASSES), 1)
    acc = jnp.zeros((N, NUM_CLASSES), f32)
    for k in range(NUM_CLASSES):
        t = jnp.sum(r3 * wfc_ref[k], axis=1, keepdims=True)                  # (32, 1)
        col = jnp.dot(red_ref[...], t, preferred_element_type=f32)           # (N, 1)
        acc = acc + jnp.where(lane == k, col, 0.0)
    logits = acc + bfc_ref[...]                                              # (N, NC)
    z = logits - jnp.max(logits, axis=-1, keepdims=True)
    out_ref[...] = z - jnp.log(jnp.sum(jnp.exp(z), axis=-1, keepdims=True))


# ------------------------------ host-side glue ------------------------------
def _full_spec(shape):
    nd = len(shape)
    return pl.BlockSpec(shape, lambda i, nd=nd: (0,) * nd)


def _conv1_patches(x_nhwc):
    """im2col for a 3x3 / stride 1 / pad 1 conv, packed by 2x2-pool window parity.

    Returns (4 * N * (H/2) * (W/2), 9*CIN); rows ordered (parity, n, i, j) so the kernel
    can max over the 4 parity chunks to realize the 2x2 maxpool.
    """
    n, h, w, c = x_nhwc.shape
    xp = jnp.pad(x_nhwc, ((0, 0), (1, 1), (1, 1), (0, 0)))
    cols = [xp[:, dy:dy + h, dx:dx + w, :] for dy in range(3) for dx in range(3)]
    pat = jnp.concatenate(cols, axis=-1)                      # (n, h, w, 9c)
    parts = [pat[:, ph::2, pw::2, :] for ph in (0, 1) for pw in (0, 1)]
    return jnp.stack(parts, axis=0).reshape(4 * n * (h // 2) * (w // 2), 9 * c)


def _pack_fc_weight(wfc):
    """(384, NC) torch-flatten-order fc weight -> (NC, N*H2*W2, C3) matching the kernel's
    conv3 activation layout (rows (n, h, w), lanes = channels)."""
    wr = wfc.reshape(C3, H2, W2, NUM_CLASSES)                 # (c, h, w, k)
    wb = jnp.transpose(wr, (3, 1, 2, 0))                      # (k, h, w, c)
    wb = wb.reshape(NUM_CLASSES, H2 * W2, C3)                 # (k, 16, c)
    return jnp.tile(wb, (1, N, 1))                            # (k, N*16, c)


@jax.jit
def net_forward(x_nchw, params):
    x = jnp.transpose(x_nchw, (0, 2, 3, 1)).astype(jnp.float32)   # NCHW -> NHWC
    p1 = _conv1_patches(x)                                        # (512, 27)
    wfcb = _pack_fc_weight(params["wfc"])                         # (3, 32, 24)
    s2 = jnp.asarray(_S2_NP)                                      # (9, 128, 128)
    s3 = jnp.asarray(_S3_NP)                                      # (9, 32, 32)
    red = jnp.asarray(_RED_NP)                                    # (2, 32)

    return pl.pallas_call(
        net_kernel,
        out_shape=jax.ShapeDtypeStruct((N, NUM_CLASSES), jnp.float32),
        grid=(1,),
        in_specs=[_full_spec(p1.shape),
                  _full_spec(params["w1"].shape), _full_spec(params["b1"].shape),
                  _full_spec(s2.shape),
                  _full_spec(params["w2"].shape), _full_spec(params["b2"].shape),
                  _full_spec(s3.shape),
                  _full_spec(params["w3"].shape), _full_spec(params["b3"].shape),
                  _full_spec(wfcb.shape), _full_spec(params["bfc"].shape),
                  _full_spec(red.shape)],
        out_specs=_full_spec((N, NUM_CLASSES)),
        compiler_params=pltpu.CompilerParams(dimension_semantics=("arbitrary",)),
    )(p1, params["w1"], params["b1"], s2, params["w2"], params["b2"],
      s3, params["w3"], params["b3"], wfcb, params["bfc"], red)


# --------------------------- plain-XLA reference ----------------------------
def net_reference(x_nchw, params):
    x = jnp.transpose(x_nchw, (0, 2, 3, 1)).astype(jnp.float32)

    def conv(y, w_hwio, b):
        out = jax.lax.conv_general_dilated(
            y, w_hwio, window_strides=(1, 1), padding="SAME",
            dimension_numbers=("NHWC", "HWIO", "NHWC"))
        return out + b.reshape(1, 1, 1, -1)

    def pool(y):
        return jax.lax.reduce_window(y, -jnp.inf, jax.lax.max,
                                     (1, 2, 2, 1), (1, 2, 2, 1), "VALID")

    y = jax.nn.relu(pool(conv(x, params["w1"].reshape(3, 3, CIN, C1), params["b1"])))
    y = jax.nn.relu(pool(conv(y, params["w2"].reshape(3, 3, C1, C2), params["b2"])))
    y = jax.nn.relu(conv(y, params["w3"].reshape(3, 3, C2, C3), params["b3"]))
    yf = jnp.transpose(y, (0, 3, 1, 2)).reshape(x.shape[0], -1)   # torch .view order
    logits = yf @ params["wfc"] + params["bfc"]
    return jax.nn.log_softmax(logits, axis=-1)


# --------------------------- deterministic params ---------------------------
def init_params(key, num_classes=NUM_CLASSES):
    ks = jax.random.split(key, 8)

    def conv_init(kw, kb, cin, cout, packed):
        bound = 1.0 / float(np.sqrt(cin * 9.0))
        # torch layout (cout, cin, 3, 3) ~ here generated directly as HWIO (3, 3, cin, cout).
        w = jax.random.uniform(kw, (3, 3, cin, cout), jnp.float32, -bound, bound)
        b = jax.random.uniform(kb, (1, cout), jnp.float32, -bound, bound)
        if packed:
            return w.reshape(9 * cin, cout), b       # im2col column order (tap, cin)
        return w.reshape(9, cin, cout), b            # per-tap (tap, cin, cout)

    w1, b1 = conv_init(ks[0], ks[1], CIN, C1, packed=True)
    w2, b2 = conv_init(ks[2], ks[3], C1, C2, packed=False)
    w3, b3 = conv_init(ks[4], ks[5], C2, C3, packed=False)

    feat = C3 * H2 * W2        # 384 here (95256 = 24*63*63 for the original 252x252 input)
    bound = 1.0 / float(np.sqrt(float(feat)))
    wfc = jax.random.uniform(ks[6], (feat, num_classes), jnp.float32, -bound, bound)
    bfc = jax.random.uniform(ks[7], (1, num_classes), jnp.float32, -bound, bound)
    return dict(w1=w1, b1=b1, w2=w2, b2=b2, w3=w3, b3=b3, wfc=wfc, bfc=bfc)


if __name__ == "__main__":
    key = jax.random.PRNGKey(0)
    pkey, xkey = jax.random.split(key)
    params = init_params(pkey)
    x = jax.random.normal(xkey, (N, CIN, H, W), jnp.float32)     # NCHW, like PyTorch

    out = jax.block_until_ready(net_forward(x, params))

    assert out.shape == (N, NUM_CLASSES), out.shape
    assert bool(jnp.all(jnp.isfinite(out)))
    # rows of exp(log_softmax) sum to ~1
    assert bool(jnp.allclose(jnp.sum(jnp.exp(out), axis=1), 1.0, atol=1e-4))

    # Cross-check against plain XLA (loose tol: MXU GEMM decomposition vs XLA conv path).
    ref = jax.block_until_ready(jax.jit(net_reference)(x, params))
    assert bool(jnp.allclose(out, ref, atol=5e-2)), (out, ref)

    print("KERNEL_OK")
</pallas_src>

<mosaic_0001>
module attributes {stable_mosaic.version = 11 : i64} {
  func.func @net_kernel(%arg0: i32, %arg1: memref<512x27xf32, #tpu.memory_space<vmem>>, %arg2: memref<27x12xf32, #tpu.memory_space<vmem>>, %arg3: memref<1x12xf32, #tpu.memory_space<vmem>>, %arg4: memref<9x128x128xf32, #tpu.memory_space<vmem>>, %arg5: memref<9x12x12xf32, #tpu.memory_space<vmem>>, %arg6: memref<1x12xf32, #tpu.memory_space<vmem>>, %arg7: memref<9x32x32xf32, #tpu.memory_space<vmem>>, %arg8: memref<9x12x24xf32, #tpu.memory_space<vmem>>, %arg9: memref<1x24xf32, #tpu.memory_space<vmem>>, %arg10: memref<3x32x24xf32, #tpu.memory_space<vmem>>, %arg11: memref<1x3xf32, #tpu.memory_space<vmem>>, %arg12: memref<2x32xf32, #tpu.memory_space<vmem>>, %arg13: memref<2x3xf32, #tpu.memory_space<vmem>>) attributes {dimension_semantics = [#tpu.dimension_semantics<arbitrary>], iteration_bounds = array<i64: 1>, scalar_prefetch = 0 : i64, scratch_operands = 0 : i64, tpu.core_type = #tpu.core_type<tc>, window_params = [{pipeline_mode = #tpu.pipeline_mode<synchronous>, transform_indices = @transform_0, window_bounds = array<i64: 512, 27>}, {pipeline_mode = #tpu.pipeline_mode<synchronous>, transform_indices = @transform_1, window_bounds = array<i64: 27, 12>}, {pipeline_mode = #tpu.pipeline_mode<synchronous>, transform_indices = @transform_2, window_bounds = array<i64: 1, 12>}, {pipeline_mode = #tpu.pipeline_mode<synchronous>, transform_indices = @transform_3, window_bounds = array<i64: 9, 128, 128>}, {pipeline_mode = #tpu.pipeline_mode<synchronous>, transform_indices = @transform_4, window_bounds = array<i64: 9, 12, 12>}, {pipeline_mode = #tpu.pipeline_mode<synchronous>, transform_indices = @transform_5, window_bounds = array<i64: 1, 12>}, {pipeline_mode = #tpu.pipeline_mode<synchronous>, transform_indices = @transform_6, window_bounds = array<i64: 9, 32, 32>}, {pipeline_mode = #tpu.pipeline_mode<synchronous>, transform_indices = @transform_7, window_bounds = array<i64: 9, 12, 24>}, {pipeline_mode = #tpu.pipeline_mode<synchronous>, transform_indices = @transform_8, window_bounds = array<i64: 1, 24>}, {pipeline_mode = #tpu.pipeline_mode<synchronous>, transform_indices = @transform_9, window_bounds = array<i64: 3, 32, 24>}, {pipeline_mode = #tpu.pipeline_mode<synchronous>, transform_indices = @transform_10, window_bounds = array<i64: 1, 3>}, {pipeline_mode = #tpu.pipeline_mode<synchronous>, transform_indices = @transform_11, window_bounds = array<i64: 2, 32>}, {pipeline_mode = #tpu.pipeline_mode<synchronous>, transform_indices = @transform_12, window_bounds = array<i64: 2, 3>}]} {
    %c0 = arith.constant 0 : index
    %c0_0 = arith.constant 0 : index
    %0 = vector.load %arg1[%c0, %c0_0] : memref<512x27xf32, #tpu.memory_space<vmem>>, vector<512x27xf32>
    %c0_1 = arith.constant 0 : index
    %c0_2 = arith.constant 0 : index
    %1 = vector.load %arg2[%c0_1, %c0_2] : memref<27x12xf32, #tpu.memory_space<vmem>>, vector<27x12xf32>
    %cst = arith.constant dense<0.000000e+00> : vector<512x12xf32>
    %2 = tpu.matmul %0, %1, %cst {dimension_numbers = #tpu.dot_dimension_numbers<[1], [0], [0], [1], [0, 0, 1, 1], [], []>} : vector<512x27xf32>, vector<27x12xf32>, vector<512x12xf32> -> vector<512x12xf32>
    %c0_3 = arith.constant 0 : index
    %c0_4 = arith.constant 0 : index
    %3 = vector.load %arg3[%c0_3, %c0_4] : memref<1x12xf32, #tpu.memory_space<vmem>>, vector<1x12xf32>
    %4 = vector.broadcast %3 : vector<1x12xf32> to vector<512x12xf32>
    %5 = arith.addf %2, %4 : vector<512x12xf32>
    %6 = vector.shape_cast %5 : vector<512x12xf32> to vector<4x128x12xf32>
    %7 = vector.extract_strided_slice %6 {offsets = [0, 0, 0], sizes = [1, 128, 12], strides = [1, 1, 1]} : vector<4x128x12xf32> to vector<1x128x12xf32>
    %8 = vector.shape_cast %7 : vector<1x128x12xf32> to vector<128x12xf32>
    %9 = vector.extract_strided_slice %6 {offsets = [1, 0, 0], sizes = [1, 128, 12], strides = [1, 1, 1]} : vector<4x128x12xf32> to vector<1x128x12xf32>
    %10 = vector.shape_cast %9 : vector<1x128x12xf32> to vector<128x12xf32>
    %11 = arith.maximumf %8, %10 : vector<128x12xf32>
    %12 = vector.extract_strided_slice %6 {offsets = [2, 0, 0], sizes = [1, 128, 12], strides = [1, 1, 1]} : vector<4x128x12xf32> to vector<1x128x12xf32>
    %13 = vector.shape_cast %12 : vector<1x128x12xf32> to vector<128x12xf32>
    %14 = vector.extract_strided_slice %6 {offsets = [3, 0, 0], sizes = [1, 128, 12], strides = [1, 1, 1]} : vector<4x128x12xf32> to vector<1x128x12xf32>
    %15 = vector.shape_cast %14 : vector<1x128x12xf32> to vector<128x12xf32>
    %16 = arith.maximumf %13, %15 : vector<128x12xf32>
    %17 = arith.maximumf %11, %16 : vector<128x12xf32>
    %cst_5 = arith.constant 0.000000e+00 : f32
    %18 = vector.broadcast %cst_5 : f32 to vector<128x12xf32>
    %19 = arith.maximumf %17, %18 : vector<128x12xf32>
    %cst_6 = arith.constant 0.000000e+00 : f32
    %20 = vector.broadcast %cst_6 : f32 to vector<128x12xf32>
    %c0_7 = arith.constant 0 : index
    %c0_8 = arith.constant 0 : index
    %c0_9 = arith.constant 0 : index
    %21 = vector.load %arg4[%c0_7, %c0_8, %c0_9] : memref<9x128x128xf32, #tpu.memory_space<vmem>>, vector<1x128x128xf32>
    %22 = vector.shape_cast %21 : vector<1x128x128xf32> to vector<128x128xf32>
    %cst_10 = arith.constant dense<0.000000e+00> : vector<128x12xf32>
    %23 = tpu.matmul %22, %19, %cst_10 {dimension_numbers = #tpu.dot_dimension_numbers<[1], [0], [0], [1], [0, 0, 1, 1], [], []>} : vector<128x128xf32>, vector<128x12xf32>, vector<128x12xf32> -> vector<128x12xf32>
    %c0_11 = arith.constant 0 : index
    %c0_12 = arith.constant 0 : index
    %c0_13 = arith.constant 0 : index
    %24 = vector.load %arg5[%c0_11, %c0_12, %c0_13] : memref<9x12x12xf32, #tpu.memory_space<vmem>>, vector<1x12x12xf32>
    %25 = vector.shape_cast %24 : vector<1x12x12xf32> to vector<12x12xf32>
    %cst_14 = arith.constant dense<0.000000e+00> : vector<128x12xf32>
    %26 = tpu.matmul %23, %25, %cst_14 {dimension_numbers = #tpu.dot_dimension_numbers<[1], [0], [0], [1], [0, 0, 1, 1], [], []>} : vector<128x12xf32>, vector<12x12xf32>, vector<128x12xf32> -> vector<128x12xf32>
    %27 = arith.addf %20, %26 : vector<128x12xf32>
    %c1 = arith.constant 1 : index
    %c0_15 = arith.constant 0 : index
    %c0_16 = arith.constant 0 : index
    %28 = vector.load %arg4[%c1, %c0_15, %c0_16] : memref<9x128x128xf32, #tpu.memory_space<vmem>>, vector<1x128x128xf32>
    %29 = vector.shape_cast %28 : vector<1x128x128xf32> to vector<128x128xf32>
    %cst_17 = arith.constant dense<0.000000e+00> : vector<128x12xf32>
    %30 = tpu.matmul %29, %19, %cst_17 {dimension_numbers = #tpu.dot_dimension_numbers<[1], [0], [0], [1], [0, 0, 1, 1], [], []>} : vector<128x128xf32>, vector<128x12xf32>, vector<128x12xf32> -> vector<128x12xf32>
    %c1_18 = arith.constant 1 : index
    %c0_19 = arith.constant 0 : index
    %c0_20 = arith.constant 0 : index
    %31 = vector.load %arg5[%c1_18, %c0_19, %c0_20] : memref<9x12x12xf32, #tpu.memory_space<vmem>>, vector<1x12x12xf32>
    %32 = vector.shape_cast %31 : vector<1x12x12xf32> to vector<12x12xf32>
    %cst_21 = arith.constant dense<0.000000e+00> : vector<128x12xf32>
    %33 = tpu.matmul %30, %32, %cst_21 {dimension_numbers = #tpu.dot_dimension_numbers<[1], [0], [0], [1], [0, 0, 1, 1], [], []>} : vector<128x12xf32>, vector<12x12xf32>, vector<128x12xf32> -> vector<128x12xf32>
    %34 = arith.addf %27, %33 : vector<128x12xf32>
    %c2 = arith.constant 2 : index
    %c0_22 = arith.constant 0 : index
    %c0_23 = arith.constant 0 : index
    %35 = vector.load %arg4[%c2, %c0_22, %c0_23] : memref<9x128x128xf32, #tpu.memory_space<vmem>>, vector<1x128x128xf32>
    %36 = vector.shape_cast %35 : vector<1x128x128xf32> to vector<128x128xf32>
    %cst_24 = arith.constant dense<0.000000e+00> : vector<128x12xf32>
    %37 = tpu.matmul %36, %19, %cst_24 {dimension_numbers = #tpu.dot_dimension_numbers<[1], [0], [0], [1], [0, 0, 1, 1], [], []>} : vector<128x128xf32>, vector<128x12xf32>, vector<128x12xf32> -> vector<128x12xf32>
    %c2_25 = arith.constant 2 : index
    %c0_26 = arith.constant 0 : index
    %c0_27 = arith.constant 0 : index
    %38 = vector.load %arg5[%c2_25, %c0_26, %c0_27] : memref<9x12x12xf32, #tpu.memory_space<vmem>>, vector<1x12x12xf32>
    %39 = vector.shape_cast %38 : vector<1x12x12xf32> to vector<12x12xf32>
    %cst_28 = arith.constant dense<0.000000e+00> : vector<128x12xf32>
    %40 = tpu.matmul %37, %39, %cst_28 {dimension_numbers = #tpu.dot_dimension_numbers<[1], [0], [0], [1], [0, 0, 1, 1], [], []>} : vector<128x12xf32>, vector<12x12xf32>, vector<128x12xf32> -> vector<128x12xf32>
    %41 = arith.addf %34, %40 : vector<128x12xf32>
    %c3 = arith.constant 3 : index
    %c0_29 = arith.constant 0 : index
    %c0_30 = arith.constant 0 : index
    %42 = vector.load %arg4[%c3, %c0_29, %c0_30] : memref<9x128x128xf32, #tpu.memory_space<vmem>>, vector<1x128x128xf32>
    %43 = vector.shape_cast %42 : vector<1x128x128xf32> to vector<128x128xf32>
    %cst_31 = arith.constant dense<0.000000e+00> : vector<128x12xf32>
    %44 = tpu.matmul %43, %19, %cst_31 {dimension_numbers = #tpu.dot_dimension_numbers<[1], [0], [0], [1], [0, 0, 1, 1], [], []>} : vector<128x128xf32>, vector<128x12xf32>, vector<128x12xf32> -> vector<128x12xf32>
    %c3_32 = arith.constant 3 : index
    %c0_33 = arith.constant 0 : index
    %c0_34 = arith.constant 0 : index
    %45 = vector.load %arg5[%c3_32, %c0_33, %c0_34] : memref<9x12x12xf32, #tpu.memory_space<vmem>>, vector<1x12x12xf32>
    %46 = vector.shape_cast %45 : vector<1x12x12xf32> to vector<12x12xf32>
    %cst_35 = arith.constant dense<0.000000e+00> : vector<128x12xf32>
    %47 = tpu.matmul %44, %46, %cst_35 {dimension_numbers = #tpu.dot_dimension_numbers<[1], [0], [0], [1], [0, 0, 1, 1], [], []>} : vector<128x12xf32>, vector<12x12xf32>, vector<128x12xf32> -> vector<128x12xf32>
    %48 = arith.addf %41, %47 : vector<128x12xf32>
    %c4 = arith.constant 4 : index
    %c0_36 = arith.constant 0 : index
    %c0_37 = arith.constant 0 : index
    %49 = vector.load %arg4[%c4, %c0_36, %c0_37] : memref<9x128x128xf32, #tpu.memory_space<vmem>>, vector<1x128x128xf32>
    %50 = vector.shape_cast %49 : vector<1x128x128xf32> to vector<128x128xf32>
    %cst_38 = arith.constant dense<0.000000e+00> : vector<128x12xf32>
    %51 = tpu.matmul %50, %19, %cst_38 {dimension_numbers = #tpu.dot_dimension_numbers<[1], [0], [0], [1], [0, 0, 1, 1], [], []>} : vector<128x128xf32>, vector<128x12xf32>, vector<128x12xf32> -> vector<128x12xf32>
    %c4_39 = arith.constant 4 : index
    %c0_40 = arith.constant 0 : index
    %c0_41 = arith.constant 0 : index
    %52 = vector.load %arg5[%c4_39, %c0_40, %c0_41] : memref<9x12x12xf32, #tpu.memory_space<vmem>>, vector<1x12x12xf32>
    %53 = vector.shape_cast %52 : vector<1x12x12xf32> to vector<12x12xf32>
    %cst_42 = arith.constant dense<0.000000e+00> : vector<128x12xf32>
    %54 = tpu.matmul %51, %53, %cst_42 {dimension_numbers = #tpu.dot_dimension_numbers<[1], [0], [0], [1], [0, 0, 1, 1], [], []>} : vector<128x12xf32>, vector<12x12xf32>, vector<128x12xf32> -> vector<128x12xf32>
    %55 = arith.addf %48, %54 : vector<128x12xf32>
    %c5 = arith.constant 5 : index
    %c0_43 = arith.constant 0 : index
    %c0_44 = arith.constant 0 : index
    %56 = vector.load %arg4[%c5, %c0_43, %c0_44] : memref<9x128x128xf32, #tpu.memory_space<vmem>>, vector<1x128x128xf32>
    %57 = vector.shape_cast %56 : vector<1x128x128xf32> to vector<128x128xf32>
    %cst_45 = arith.constant dense<0.000000e+00> : vector<128x12xf32>
    %58 = tpu.matmul %57, %19, %cst_45 {dimension_numbers = #tpu.dot_dimension_numbers<[1], [0], [0], [1], [0, 0, 1, 1], [], []>} : vector<128x128xf32>, vector<128x12xf32>, vector<128x12xf32> -> vector<128x12xf32>
    %c5_46 = arith.constant 5 : index
    %c0_47 = arith.constant 0 : index
    %c0_48 = arith.constant 0 : index
    %59 = vector.load %arg5[%c5_46, %c0_47, %c0_48] : memref<9x12x12xf32, #tpu.memory_space<vmem>>, vector<1x12x12xf32>
    %60 = vector.shape_cast %59 : vector<1x12x12xf32> to vector<12x12xf32>
    %cst_49 = arith.constant dense<0.000000e+00> : vector<128x12xf32>
    %61 = tpu.matmul %58, %60, %cst_49 {dimension_numbers = #tpu.dot_dimension_numbers<[1], [0], [0], [1], [0, 0, 1, 1], [], []>} : vector<128x12xf32>, vector<12x12xf32>, vector<128x12xf32> -> vector<128x12xf32>
    %62 = arith.addf %55, %61 : vector<128x12xf32>
    %c6 = arith.constant 6 : index
    %c0_50 = arith.constant 0 : index
    %c0_51 = arith.constant 0 : index
    %63 = vector.load %arg4[%c6, %c0_50, %c0_51] : memref<9x128x128xf32, #tpu.memory_space<vmem>>, vector<1x128x128xf32>
    %64 = vector.shape_cast %63 : vector<1x128x128xf32> to vector<128x128xf32>
    %cst_52 = arith.constant dense<0.000000e+00> : vector<128x12xf32>
    %65 = tpu.matmul %64, %19, %cst_52 {dimension_numbers = #tpu.dot_dimension_numbers<[1], [0], [0], [1], [0, 0, 1, 1], [], []>} : vector<128x128xf32>, vector<128x12xf32>, vector<128x12xf32> -> vector<128x12xf32>
    %c6_53 = arith.constant 6 : index
    %c0_54 = arith.constant 0 : index
    %c0_55 = arith.constant 0 : index
    %66 = vector.load %arg5[%c6_53, %c0_54, %c0_55] : memref<9x12x12xf32, #tpu.memory_space<vmem>>, vector<1x12x12xf32>
    %67 = vector.shape_cast %66 : vector<1x12x12xf32> to vector<12x12xf32>
    %cst_56 = arith.constant dense<0.000000e+00> : vector<128x12xf32>
    %68 = tpu.matmul %65, %67, %cst_56 {dimension_numbers = #tpu.dot_dimension_numbers<[1], [0], [0], [1], [0, 0, 1, 1], [], []>} : vector<128x12xf32>, vector<12x12xf32>, vector<128x12xf32> -> vector<128x12xf32>
    %69 = arith.addf %62, %68 : vector<128x12xf32>
    %c7 = arith.constant 7 : index
    %c0_57 = arith.constant 0 : index
    %c0_58 = arith.constant 0 : index
    %70 = vector.load %arg4[%c7, %c0_57, %c0_58] : memref<9x128x128xf32, #tpu.memory_space<vmem>>, vector<1x128x128xf32>
    %71 = vector.shape_cast %70 : vector<1x128x128xf32> to vector<128x128xf32>
    %cst_59 = arith.constant dense<0.000000e+00> : vector<128x12xf32>
    %72 = tpu.matmul %71, %19, %cst_59 {dimension_numbers = #tpu.dot_dimension_numbers<[1], [0], [0], [1], [0, 0, 1, 1], [], []>} : vector<128x128xf32>, vector<128x12xf32>, vector<128x12xf32> -> vector<128x12xf32>
    %c7_60 = arith.constant 7 : index
    %c0_61 = arith.constant 0 : index
    %c0_62 = arith.constant 0 : index
    %73 = vector.load %arg5[%c7_60, %c0_61, %c0_62] : memref<9x12x12xf32, #tpu.memory_space<vmem>>, vector<1x12x12xf32>
    %74 = vector.shape_cast %73 : vector<1x12x12xf32> to vector<12x12xf32>
    %cst_63 = arith.constant dense<0.000000e+00> : vector<128x12xf32>
    %75 = tpu.matmul %72, %74, %cst_63 {dimension_numbers = #tpu.dot_dimension_numbers<[1], [0], [0], [1], [0, 0, 1, 1], [], []>} : vector<128x12xf32>, vector<12x12xf32>, vector<128x12xf32> -> vector<128x12xf32>
    %76 = arith.addf %69, %75 : vector<128x12xf32>
    %c8 = arith.constant 8 : index
    %c0_64 = arith.constant 0 : index
    %c0_65 = arith.constant 0 : index
    %77 = vector.load %arg4[%c8, %c0_64, %c0_65] : memref<9x128x128xf32, #tpu.memory_space<vmem>>, vector<1x128x128xf32>
    %78 = vector.shape_cast %77 : vector<1x128x128xf32> to vector<128x128xf32>
    %cst_66 = arith.constant dense<0.000000e+00> : vector<128x12xf32>
    %79 = tpu.matmul %78, %19, %cst_66 {dimension_numbers = #tpu.dot_dimension_numbers<[1], [0], [0], [1], [0, 0, 1, 1], [], []>} : vector<128x128xf32>, vector<128x12xf32>, vector<128x12xf32> -> vector<128x12xf32>
    %c8_67 = arith.constant 8 : index
    %c0_68 = arith.constant 0 : index
    %c0_69 = arith.constant 0 : index
    %80 = vector.load %arg5[%c8_67, %c0_68, %c0_69] : memref<9x12x12xf32, #tpu.memory_space<vmem>>, vector<1x12x12xf32>
    %81 = vector.shape_cast %80 : vector<1x12x12xf32> to vector<12x12xf32>
    %cst_70 = arith.constant dense<0.000000e+00> : vector<128x12xf32>
    %82 = tpu.matmul %79, %81, %cst_70 {dimension_numbers = #tpu.dot_dimension_numbers<[1], [0], [0], [1], [0, 0, 1, 1], [], []>} : vector<128x12xf32>, vector<12x12xf32>, vector<128x12xf32> -> vector<128x12xf32>
    %83 = arith.addf %76, %82 : vector<128x12xf32>
    %c0_71 = arith.constant 0 : index
    %c0_72 = arith.constant 0 : index
    %84 = vector.load %arg6[%c0_71, %c0_72] : memref<1x12xf32, #tpu.memory_space<vmem>>, vector<1x12xf32>
    %85 = vector.broadcast %84 : vector<1x12xf32> to vector<128x12xf32>
    %86 = arith.addf %83, %85 : vector<128x12xf32>
    %87 = vector.shape_cast %86 : vector<128x12xf32> to vector<4x32x12xf32>
    %88 = vector.extract_strided_slice %87 {offsets = [0, 0, 0], sizes = [1, 32, 12], strides = [1, 1, 1]} : vector<4x32x12xf32> to vector<1x32x12xf32>
    %89 = vector.shape_cast %88 : vector<1x32x12xf32> to vector<32x12xf32>
    %90 = vector.extract_strided_slice %87 {offsets = [1, 0, 0], sizes = [1, 32, 12], strides = [1, 1, 1]} : vector<4x32x12xf32> to vector<1x32x12xf32>
    %91 = vector.shape_cast %90 : vector<1x32x12xf32> to vector<32x12xf32>
    %92 = arith.maximumf %89, %91 : vector<32x12xf32>
    %93 = vector.extract_strided_slice %87 {offsets = [2, 0, 0], sizes = [1, 32, 12], strides = [1, 1, 1]} : vector<4x32x12xf32> to vector<1x32x12xf32>
    %94 = vector.shape_cast %93 : vector<1x32x12xf32> to vector<32x12xf32>
    %95 = vector.extract_strided_slice %87 {offsets = [3, 0, 0], sizes = [1, 32, 12], strides = [1, 1, 1]} : vector<4x32x12xf32> to vector<1x32x12xf32>
    %96 = vector.shape_cast %95 : vector<1x32x12xf32> to vector<32x12xf32>
    %97 = arith.maximumf %94, %96 : vector<32x12xf32>
    %98 = arith.maximumf %92, %97 : vector<32x12xf32>
    %cst_73 = arith.constant 0.000000e+00 : f32
    %99 = vector.broadcast %cst_73 : f32 to vector<32x12xf32>
    %100 = arith.maximumf %98, %99 : vector<32x12xf32>
    %cst_74 = arith.constant 0.000000e+00 : f32
    %101 = vector.broadcast %cst_74 : f32 to vector<32x24xf32>
    %c0_75 = arith.constant 0 : index
    %c0_76 = arith.constant 0 : index
    %c0_77 = arith.constant 0 : index
    %102 = vector.load %arg7[%c0_75, %c0_76, %c0_77] : memref<9x32x32xf32, #tpu.memory_space<vmem>>, vector<1x32x32xf32>
    %103 = vector.shape_cast %102 : vector<1x32x32xf32> to vector<32x32xf32>
    %cst_78 = arith.constant dense<0.000000e+00> : vector<32x12xf32>
    %104 = tpu.matmul %103, %100, %cst_78 {dimension_numbers = #tpu.dot_dimension_numbers<[1], [0], [0], [1], [0, 0, 1, 1], [], []>} : vector<32x32xf32>, vector<32x12xf32>, vector<32x12xf32> -> vector<32x12xf32>
    %c0_79 = arith.constant 0 : index
    %c0_80 = arith.constant 0 : index
    %c0_81 = arith.constant 0 : index
    %105 = vector.load %arg8[%c0_79, %c0_80, %c0_81] : memref<9x12x24xf32, #tpu.memory_space<vmem>>, vector<1x12x24xf32>
    %106 = vector.shape_cast %105 : vector<1x12x24xf32> to vector<12x24xf32>
    %cst_82 = arith.constant dense<0.000000e+00> : vector<32x24xf32>
    %107 = tpu.matmul %104, %106, %cst_82 {dimension_numbers = #tpu.dot_dimension_numbers<[1], [0], [0], [1], [0, 0, 1, 1], [], []>} : vector<32x12xf32>, vector<12x24xf32>, vector<32x24xf32> -> vector<32x24xf32>
    %108 = arith.addf %101, %107 : vector<32x24xf32>
    %c1_83 = arith.constant 1 : index
    %c0_84 = arith.constant 0 : index
    %c0_85 = arith.constant 0 : index
    %109 = vector.load %arg7[%c1_83, %c0_84, %c0_85] : memref<9x32x32xf32, #tpu.memory_space<vmem>>, vector<1x32x32xf32>
    %110 = vector.shape_cast %109 : vector<1x32x32xf32> to vector<32x32xf32>
    %cst_86 = arith.constant dense<0.000000e+00> : vector<32x12xf32>
    %111 = tpu.matmul %110, %100, %cst_86 {dimension_numbers = #tpu.dot_dimension_numbers<[1], [0], [0], [1], [0, 0, 1, 1], [], []>} : vector<32x32xf32>, vector<32x12xf32>, vector<32x12xf32> -> vector<32x12xf32>
    %c1_87 = arith.constant 1 : index
    %c0_88 = arith.constant 0 : index
    %c0_89 = arith.constant 0 : index
    %112 = vector.load %arg8[%c1_87, %c0_88, %c0_89] : memref<9x12x24xf32, #tpu.memory_space<vmem>>, vector<1x12x24xf32>
    %113 = vector.shape_cast %112 : vector<1x12x24xf32> to vector<12x24xf32>
    %cst_90 = arith.constant dense<0.000000e+00> : vector<32x24xf32>
    %114 = tpu.matmul %111, %113, %cst_90 {dimension_numbers = #tpu.dot_dimension_numbers<[1], [0], [0], [1], [0, 0, 1, 1], [], []>} : vector<32x12xf32>, vector<12x24xf32>, vector<32x24xf32> -> vector<32x24xf32>
    %115 = arith.addf %108, %114 : vector<32x24xf32>
    %c2_91 = arith.constant 2 : index
    %c0_92 = arith.constant 0 : index
    %c0_93 = arith.constant 0 : index
    %116 = vector.load %arg7[%c2_91, %c0_92, %c0_93] : memref<9x32x32xf32, #tpu.memory_space<vmem>>, vector<1x32x32xf32>
    %117 = vector.shape_cast %116 : vector<1x32x32xf32> to vector<32x32xf32>
    %cst_94 = arith.constant dense<0.000000e+00> : vector<32x12xf32>
    %118 = tpu.matmul %117, %100, %cst_94 {dimension_numbers = #tpu.dot_dimension_numbers<[1], [0], [0], [1], [0, 0, 1, 1], [], []>} : vector<32x32xf32>, vector<32x12xf32>, vector<32x12xf32> -> vector<32x12xf32>
    %c2_95 = arith.constant 2 : index
    %c0_96 = arith.constant 0 : index
    %c0_97 = arith.constant 0 : index
    %119 = vector.load %arg8[%c2_95, %c0_96, %c0_97] : memref<9x12x24xf32, #tpu.memory_space<vmem>>, vector<1x12x24xf32>
    %120 = vector.shape_cast %119 : vector<1x12x24xf32> to vector<12x24xf32>
    %cst_98 = arith.constant dense<0.000000e+00> : vector<32x24xf32>
    %121 = tpu.matmul %118, %120, %cst_98 {dimension_numbers = #tpu.dot_dimension_numbers<[1], [0], [0], [1], [0, 0, 1, 1], [], []>} : vector<32x12xf32>, vector<12x24xf32>, vector<32x24xf32> -> vector<32x24xf32>
    %122 = arith.addf %115, %121 : vector<32x24xf32>
    %c3_99 = arith.constant 3 : index
    %c0_100 = arith.constant 0 : index
    %c0_101 = arith.constant 0 : index
    %123 = vector.load %arg7[%c3_99, %c0_100, %c0_101] : memref<9x32x32xf32, #tpu.memory_space<vmem>>, vector<1x32x32xf32>
    %124 = vector.shape_cast %123 : vector<1x32x32xf32> to vector<32x32xf32>
    %cst_102 = arith.constant dense<0.000000e+00> : vector<32x12xf32>
    %125 = tpu.matmul %124, %100, %cst_102 {dimension_numbers = #tpu.dot_dimension_numbers<[1], [0], [0], [1], [0, 0, 1, 1], [], []>} : vector<32x32xf32>, vector<32x12xf32>, vector<32x12xf32> -> vector<32x12xf32>
    %c3_103 = arith.constant 3 : index
    %c0_104 = arith.constant 0 : index
    %c0_105 = arith.constant 0 : index
    %126 = vector.load %arg8[%c3_103, %c0_104, %c0_105] : memref<9x12x24xf32, #tpu.memory_space<vmem>>, vector<1x12x24xf32>
    %127 = vector.shape_cast %126 : vector<1x12x24xf32> to vector<12x24xf32>
    %cst_106 = arith.constant dense<0.000000e+00> : vector<32x24xf32>
    %128 = tpu.matmul %125, %127, %cst_106 {dimension_numbers = #tpu.dot_dimension_numbers<[1], [0], [0], [1], [0, 0, 1, 1], [], []>} : vector<32x12xf32>, vector<12x24xf32>, vector<32x24xf32> -> vector<32x24xf32>
    %129 = arith.addf %122, %128 : vector<32x24xf32>
    %c4_107 = arith.constant 4 : index
    %c0_108 = arith.constant 0 : index
    %c0_109 = arith.constant 0 : index
    %130 = vector.load %arg7[%c4_107, %c0_108, %c0_109] : memref<9x32x32xf32, #tpu.memory_space<vmem>>, vector<1x32x32xf32>
    %131 = vector.shape_cast %130 : vector<1x32x32xf32> to vector<32x32xf32>
    %cst_110 = arith.constant dense<0.000000e+00> : vector<32x12xf32>
    %132 = tpu.matmul %131, %100, %cst_110 {dimension_numbers = #tpu.dot_dimension_numbers<[1], [0], [0], [1], [0, 0, 1, 1], [], []>} : vector<32x32xf32>, vector<32x12xf32>, vector<32x12xf32> -> vector<32x12xf32>
    %c4_111 = arith.constant 4 : index
    %c0_112 = arith.constant 0 : index
    %c0_113 = arith.constant 0 : index
    %133 = vector.load %arg8[%c4_111, %c0_112, %c0_113] : memref<9x12x24xf32, #tpu.memory_space<vmem>>, vector<1x12x24xf32>
    %134 = vector.shape_cast %133 : vector<1x12x24xf32> to vector<12x24xf32>
    %cst_114 = arith.constant dense<0.000000e+00> : vector<32x24xf32>
    %135 = tpu.matmul %132, %134, %cst_114 {dimension_numbers = #tpu.dot_dimension_numbers<[1], [0], [0], [1], [0, 0, 1, 1], [], []>} : vector<32x12xf32>, vector<12x24xf32>, vector<32x24xf32> -> vector<32x24xf32>
    %136 = arith.addf %129, %135 : vector<32x24xf32>
    %c5_115 = arith.constant 5 : index
    %c0_116 = arith.constant 0 : index
    %c0_117 = arith.constant 0 : index
    %137 = vector.load %arg7[%c5_115, %c0_116, %c0_117] : memref<9x32x32xf32, #tpu.memory_space<vmem>>, vector<1x32x32xf32>
    %138 = vector.shape_cast %137 : vector<1x32x32xf32> to vector<32x32xf32>
    %cst_118 = arith.constant dense<0.000000e+00> : vector<32x12xf32>
    %139 = tpu.matmul %138, %100, %cst_118 {dimension_numbers = #tpu.dot_dimension_numbers<[1], [0], [0], [1], [0, 0, 1, 1], [], []>} : vector<32x32xf32>, vector<32x12xf32>, vector<32x12xf32> -> vector<32x12xf32>
    %c5_119 = arith.constant 5 : index
    %c0_120 = arith.constant 0 : index
    %c0_121 = arith.constant 0 : index
    %140 = vector.load %arg8[%c5_119, %c0_120, %c0_121] : memref<9x12x24xf32, #tpu.memory_space<vmem>>, vector<1x12x24xf32>
    %141 = vector.shape_cast %140 : vector<1x12x24xf32> to vector<12x24xf32>
    %cst_122 = arith.constant dense<0.000000e+00> : vector<32x24xf32>
    %142 = tpu.matmul %139, %141, %cst_122 {dimension_numbers = #tpu.dot_dimension_numbers<[1], [0], [0], [1], [0, 0, 1, 1], [], []>} : vector<32x12xf32>, vector<12x24xf32>, vector<32x24xf32> -> vector<32x24xf32>
    %143 = arith.addf %136, %142 : vector<32x24xf32>
    %c6_123 = arith.constant 6 : index
    %c0_124 = arith.constant 0 : index
    %c0_125 = arith.constant 0 : index
    %144 = vector.load %arg7[%c6_123, %c0_124, %c0_125] : memref<9x32x32xf32, #tpu.memory_space<vmem>>, vector<1x32x32xf32>
    %145 = vector.shape_cast %144 : vector<1x32x32xf32> to vector<32x32xf32>
    %cst_126 = arith.constant dense<0.000000e+00> : vector<32x12xf32>
    %146 = tpu.matmul %145, %100, %cst_126 {dimension_numbers = #tpu.dot_dimension_numbers<[1], [0], [0], [1], [0, 0, 1, 1], [], []>} : vector<32x32xf32>, vector<32x12xf32>, vector<32x12xf32> -> vector<32x12xf32>
    %c6_127 = arith.constant 6 : index
    %c0_128 = arith.constant 0 : index
    %c0_129 = arith.constant 0 : index
    %147 = vector.load %arg8[%c6_127, %c0_128, %c0_129] : memref<9x12x24xf32, #tpu.memory_space<vmem>>, vector<1x12x24xf32>
    %148 = vector.shape_cast %147 : vector<1x12x24xf32> to vector<12x24xf32>
    %cst_130 = arith.constant dense<0.000000e+00> : vector<32x24xf32>
    %149 = tpu.matmul %146, %148, %cst_130 {dimension_numbers = #tpu.dot_dimension_numbers<[1], [0], [0], [1], [0, 0, 1, 1], [], []>} : vector<32x12xf32>, vector<12x24xf32>, vector<32x24xf32> -> vector<32x24xf32>
    %150 = arith.addf %143, %149 : vector<32x24xf32>
    %c7_131 = arith.constant 7 : index
    %c0_132 = arith.constant 0 : index
    %c0_133 = arith.constant 0 : index
    %151 = vector.load %arg7[%c7_131, %c0_132, %c0_133] : memref<9x32x32xf32, #tpu.memory_space<vmem>>, vector<1x32x32xf32>
    %152 = vector.shape_cast %151 : vector<1x32x32xf32> to vector<32x32xf32>
    %cst_134 = arith.constant dense<0.000000e+00> : vector<32x12xf32>
    %153 = tpu.matmul %152, %100, %cst_134 {dimension_numbers = #tpu.dot_dimension_numbers<[1], [0], [0], [1], [0, 0, 1, 1], [], []>} : vector<32x32xf32>, vector<32x12xf32>, vector<32x12xf32> -> vector<32x12xf32>
    %c7_135 = arith.constant 7 : index
    %c0_136 = arith.constant 0 : index
    %c0_137 = arith.constant 0 : index
    %154 = vector.load %arg8[%c7_135, %c0_136, %c0_137] : memref<9x12x24xf32, #tpu.memory_space<vmem>>, vector<1x12x24xf32>
    %155 = vector.shape_cast %154 : vector<1x12x24xf32> to vector<12x24xf32>
    %cst_138 = arith.constant dense<0.000000e+00> : vector<32x24xf32>
    %156 = tpu.matmul %153, %155, %cst_138 {dimension_numbers = #tpu.dot_dimension_numbers<[1], [0], [0], [1], [0, 0, 1, 1], [], []>} : vector<32x12xf32>, vector<12x24xf32>, vector<32x24xf32> -> vector<32x24xf32>
    %157 = arith.addf %150, %156 : vector<32x24xf32>
    %c8_139 = arith.constant 8 : index
    %c0_140 = arith.constant 0 : index
    %c0_141 = arith.constant 0 : index
    %158 = vector.load %arg7[%c8_139, %c0_140, %c0_141] : memref<9x32x32xf32, #tpu.memory_space<vmem>>, vector<1x32x32xf32>
    %159 = vector.shape_cast %158 : vector<1x32x32xf32> to vector<32x32xf32>
    %cst_142 = arith.constant dense<0.000000e+00> : vector<32x12xf32>
    %160 = tpu.matmul %159, %100, %cst_142 {dimension_numbers = #tpu.dot_dimension_numbers<[1], [0], [0], [1], [0, 0, 1, 1], [], []>} : vector<32x32xf32>, vector<32x12xf32>, vector<32x12xf32> -> vector<32x12xf32>
    %c8_143 = arith.constant 8 : index
    %c0_144 = arith.constant 0 : index
    %c0_145 = arith.constant 0 : index
    %161 = vector.load %arg8[%c8_143, %c0_144, %c0_145] : memref<9x12x24xf32, #tpu.memory_space<vmem>>, vector<1x12x24xf32>
    %162 = vector.shape_cast %161 : vector<1x12x24xf32> to vector<12x24xf32>
    %cst_146 = arith.constant dense<0.000000e+00> : vector<32x24xf32>
    %163 = tpu.matmul %160, %162, %cst_146 {dimension_numbers = #tpu.dot_dimension_numbers<[1], [0], [0], [1], [0, 0, 1, 1], [], []>} : vector<32x12xf32>, vector<12x24xf32>, vector<32x24xf32> -> vector<32x24xf32>
    %164 = arith.addf %157, %163 : vector<32x24xf32>
    %c0_147 = arith.constant 0 : index
    %c0_148 = arith.constant 0 : index
    %165 = vector.load %arg9[%c0_147, %c0_148] : memref<1x24xf32, #tpu.memory_space<vmem>>, vector<1x24xf32>
    %166 = vector.broadcast %165 : vector<1x24xf32> to vector<32x24xf32>
    %167 = arith.addf %164, %166 : vector<32x24xf32>
    %cst_149 = arith.constant 0.000000e+00 : f32
    %168 = vector.broadcast %cst_149 : f32 to vector<32x24xf32>
    %169 = arith.maximumf %167, %168 : vector<32x24xf32>
    %170 = tpu.iota {dimensions = array<i32: 1>} : vector<1x3xi32>
    %cst_150 = arith.constant 0.000000e+00 : f32
    %171 = vector.broadcast %cst_150 : f32 to vector<2x3xf32>
    %c0_151 = arith.constant 0 : index
    %c0_152 = arith.constant 0 : index
    %c0_153 = arith.constant 0 : index
    %172 = vector.load %arg10[%c0_151, %c0_152, %c0_153] : memref<3x32x24xf32, #tpu.memory_space<vmem>>, vector<1x32x24xf32>
    %173 = vector.shape_cast %172 : vector<1x32x24xf32> to vector<32x24xf32>
    %174 = arith.mulf %169, %173 : vector<32x24xf32>
    %cst_154 = arith.constant dense<0.000000e+00> : vector<32xf32>
    %175 = vector.multi_reduction <add>, %174, %cst_154 [1] : vector<32x24xf32> to vector<32xf32>
    %176 = vector.shape_cast %175 : vector<32xf32> to vector<32x1xf32>
    %c0_155 = arith.constant 0 : index
    %c0_156 = arith.constant 0 : index
    %177 = vector.load %arg12[%c0_155, %c0_156] : memref<2x32xf32, #tpu.memory_space<vmem>>, vector<2x32xf32>
    %cst_157 = arith.constant dense<0.000000e+00> : vector<2x1xf32>
    %178 = tpu.matmul %177, %176, %cst_157 {dimension_numbers = #tpu.dot_dimension_numbers<[1], [0], [0], [1], [0, 0, 1, 1], [], []>} : vector<2x32xf32>, vector<32x1xf32>, vector<2x1xf32> -> vector<2x1xf32>
    %c0_i32 = arith.constant 0 : i32
    %179 = vector.broadcast %c0_i32 : i32 to vector<1x3xi32>
    %180 = arith.cmpi eq, %170, %179 : vector<1x3xi32>
    %cst_158 = arith.constant 0.000000e+00 : f32
    %181 = vector.shape_cast %180 : vector<1x3xi1> to vector<1x3xi1>
    %182 = vector.broadcast %181 : vector<1x3xi1> to vector<2x3xi1>
    %183 = vector.shape_cast %178 : vector<2x1xf32> to vector<2x1xf32>
    %184 = vector.broadcast %183 : vector<2x1xf32> to vector<2x3xf32>
    %185 = vector.broadcast %cst_158 : f32 to vector<2x3xf32>
    %186 = arith.select %182, %184, %185 : vector<2x3xi1>, vector<2x3xf32>
    %187 = arith.addf %171, %186 : vector<2x3xf32>
    %c1_159 = arith.constant 1 : index
    %c0_160 = arith.constant 0 : index
    %c0_161 = arith.constant 0 : index
    %188 = vector.load %arg10[%c1_159, %c0_160, %c0_161] : memref<3x32x24xf32, #tpu.memory_space<vmem>>, vector<1x32x24xf32>
    %189 = vector.shape_cast %188 : vector<1x32x24xf32> to vector<32x24xf32>
    %190 = arith.mulf %169, %189 : vector<32x24xf32>
    %cst_162 = arith.constant dense<0.000000e+00> : vector<32xf32>
    %191 = vector.multi_reduction <add>, %190, %cst_162 [1] : vector<32x24xf32> to vector<32xf32>
    %192 = vector.shape_cast %191 : vector<32xf32> to vector<32x1xf32>
    %c0_163 = arith.constant 0 : index
    %c0_164 = arith.constant 0 : index
    %193 = vector.load %arg12[%c0_163, %c0_164] : memref<2x32xf32, #tpu.memory_space<vmem>>, vector<2x32xf32>
    %cst_165 = arith.constant dense<0.000000e+00> : vector<2x1xf32>
    %194 = tpu.matmul %193, %192, %cst_165 {dimension_numbers = #tpu.dot_dimension_numbers<[1], [0], [0], [1], [0, 0, 1, 1], [], []>} : vector<2x32xf32>, vector<32x1xf32>, vector<2x1xf32> -> vector<2x1xf32>
    %c1_i32 = arith.constant 1 : i32
    %195 = vector.broadcast %c1_i32 : i32 to vector<1x3xi32>
    %196 = arith.cmpi eq, %170, %195 : vector<1x3xi32>
    %cst_166 = arith.constant 0.000000e+00 : f32
    %197 = vector.shape_cast %196 : vector<1x3xi1> to vector<1x3xi1>
    %198 = vector.broadcast %197 : vector<1x3xi1> to vector<2x3xi1>
    %199 = vector.shape_cast %194 : vector<2x1xf32> to vector<2x1xf32>
    %200 = vector.broadcast %199 : vector<2x1xf32> to vector<2x3xf32>
    %201 = vector.broadcast %cst_166 : f32 to vector<2x3xf32>
    %202 = arith.select %198, %200, %201 : vector<2x3xi1>, vector<2x3xf32>
    %203 = arith.addf %187, %202 : vector<2x3xf32>
    %c2_167 = arith.constant 2 : index
    %c0_168 = arith.constant 0 : index
    %c0_169 = arith.constant 0 : index
    %204 = vector.load %arg10[%c2_167, %c0_168, %c0_169] : memref<3x32x24xf32, #tpu.memory_space<vmem>>, vector<1x32x24xf32>
    %205 = vector.shape_cast %204 : vector<1x32x24xf32> to vector<32x24xf32>
    %206 = arith.mulf %169, %205 : vector<32x24xf32>
    %cst_170 = arith.constant dense<0.000000e+00> : vector<32xf32>
    %207 = vector.multi_reduction <add>, %206, %cst_170 [1] : vector<32x24xf32> to vector<32xf32>
    %208 = vector.shape_cast %207 : vector<32xf32> to vector<32x1xf32>
    %c0_171 = arith.constant 0 : index
    %c0_172 = arith.constant 0 : index
    %209 = vector.load %arg12[%c0_171, %c0_172] : memref<2x32xf32, #tpu.memory_space<vmem>>, vector<2x32xf32>
    %cst_173 = arith.constant dense<0.000000e+00> : vector<2x1xf32>
    %210 = tpu.matmul %209, %208, %cst_173 {dimension_numbers = #tpu.dot_dimension_numbers<[1], [0], [0], [1], [0, 0, 1, 1], [], []>} : vector<2x32xf32>, vector<32x1xf32>, vector<2x1xf32> -> vector<2x1xf32>
    %c2_i32 = arith.constant 2 : i32
    %211 = vector.broadcast %c2_i32 : i32 to vector<1x3xi32>
    %212 = arith.cmpi eq, %170, %211 : vector<1x3xi32>
    %cst_174 = arith.constant 0.000000e+00 : f32
    %213 = vector.shape_cast %212 : vector<1x3xi1> to vector<1x3xi1>
    %214 = vector.broadcast %213 : vector<1x3xi1> to vector<2x3xi1>
    %215 = vector.shape_cast %210 : vector<2x1xf32> to vector<2x1xf32>
    %216 = vector.broadcast %215 : vector<2x1xf32> to vector<2x3xf32>
    %217 = vector.broadcast %cst_174 : f32 to vector<2x3xf32>
    %218 = arith.select %214, %216, %217 : vector<2x3xi1>, vector<2x3xf32>
    %219 = arith.addf %203, %218 : vector<2x3xf32>
    %c0_175 = arith.constant 0 : index
    %c0_176 = arith.constant 0 : index
    %220 = vector.load %arg11[%c0_175, %c0_176] : memref<1x3xf32, #tpu.memory_space<vmem>>, vector<1x3xf32>
    %221 = vector.broadcast %220 : vector<1x3xf32> to vector<2x3xf32>
    %222 = arith.addf %219, %221 : vector<2x3xf32>
    %cst_177 = arith.constant dense<0xFF800000> : vector<2xf32>
    %223 = vector.multi_reduction <maximumf>, %222, %cst_177 [1] : vector<2x3xf32> to vector<2xf32>
    %224 = vector.shape_cast %223 : vector<2xf32> to vector<2x1xf32>
    %225 = vector.broadcast %224 : vector<2x1xf32> to vector<2x3xf32>
    %226 = arith.subf %222, %225 : vector<2x3xf32>
    %227 = math.exp %226 : vector<2x3xf32>
    %cst_178 = arith.constant dense<0.000000e+00> : vector<2xf32>
    %228 = vector.multi_reduction <add>, %227, %cst_178 [1] : vector<2x3xf32> to vector<2xf32>
    %229 = vector.shape_cast %228 : vector<2xf32> to vector<2x1xf32>
    %230 = math.log %229 : vector<2x1xf32>
    %231 = vector.broadcast %230 : vector<2x1xf32> to vector<2x3xf32>
    %232 = arith.subf %226, %231 : vector<2x3xf32>
    %c0_179 = arith.constant 0 : index
    %c0_180 = arith.constant 0 : index
    %233 = vector.load %arg13[%c0_179, %c0_180] : memref<2x3xf32, #tpu.memory_space<vmem>>, vector<2x3xf32>
    tpu.vector_store %arg13[%c0_179, %c0_180], %232 {strides = array<i32>} : memref<2x3xf32, #tpu.memory_space<vmem>>, vector<2x3xf32>,
    return
  }
  func.func @transform_0(%arg0: i32) -> (i32, i32) {
    %c0_i32 = arith.constant 0 : i32
    %c0_i32_0 = arith.constant 0 : i32
    %c0_i32_1 = arith.constant 0 : i32
    return %c0_i32, %c0_i32_0 : i32, i32
  }
  func.func @transform_1(%arg0: i32) -> (i32, i32) {
    %c0_i32 = arith.constant 0 : i32
    %c0_i32_0 = arith.constant 0 : i32
    %c0_i32_1 = arith.constant 0 : i32
    return %c0_i32, %c0_i32_0 : i32, i32
  }
  func.func @transform_2(%arg0: i32) -> (i32, i32) {
    %c0_i32 = arith.constant 0 : i32
    %c0_i32_0 = arith.constant 0 : i32
    %c0_i32_1 = arith.constant 0 : i32
    return %c0_i32, %c0_i32_0 : i32, i32
  }
  func.func @transform_3(%arg0: i32) -> (i32, i32, i32) {
    %c0_i32 = arith.constant 0 : i32
    %c0_i32_0 = arith.constant 0 : i32
    %c0_i32_1 = arith.constant 0 : i32
    %c0_i32_2 = arith.constant 0 : i32
    return %c0_i32, %c0_i32_0, %c0_i32_1 : i32, i32, i32
  }
  func.func @transform_4(%arg0: i32) -> (i32, i32, i32) {
    %c0_i32 = arith.constant 0 : i32
    %c0_i32_0 = arith.constant 0 : i32
    %c0_i32_1 = arith.constant 0 : i32
    %c0_i32_2 = arith.constant 0 : i32
    return %c0_i32, %c0_i32_0, %c0_i32_1 : i32, i32, i32
  }
  func.func @transform_5(%arg0: i32) -> (i32, i32) {
    %c0_i32 = arith.constant 0 : i32
    %c0_i32_0 = arith.constant 0 : i32
    %c0_i32_1 = arith.constant 0 : i32
    return %c0_i32, %c0_i32_0 : i32, i32
  }
  func.func @transform_6(%arg0: i32) -> (i32, i32, i32) {
    %c0_i32 = arith.constant 0 : i32
    %c0_i32_0 = arith.constant 0 : i32
    %c0_i32_1 = arith.constant 0 : i32
    %c0_i32_2 = arith.constant 0 : i32
    return %c0_i32, %c0_i32_0, %c0_i32_1 : i32, i32, i32
  }
  func.func @transform_7(%arg0: i32) -> (i32, i32, i32) {
    %c0_i32 = arith.constant 0 : i32
    %c0_i32_0 = arith.constant 0 : i32
    %c0_i32_1 = arith.constant 0 : i32
    %c0_i32_2 = arith.constant 0 : i32
    return %c0_i32, %c0_i32_0, %c0_i32_1 : i32, i32, i32
  }
  func.func @transform_8(%arg0: i32) -> (i32, i32) {
    %c0_i32 = arith.constant 0 : i32
    %c0_i32_0 = arith.constant 0 : i32
    %c0_i32_1 = arith.constant 0 : i32
    return %c0_i32, %c0_i32_0 : i32, i32
  }
  func.func @transform_9(%arg0: i32) -> (i32, i32, i32) {
    %c0_i32 = arith.constant 0 : i32
    %c0_i32_0 = arith.constant 0 : i32
    %c0_i32_1 = arith.constant 0 : i32
    %c0_i32_2 = arith.constant 0 : i32
    return %c0_i32, %c0_i32_0, %c0_i32_1 : i32, i32, i32
  }
  func.func @transform_10(%arg0: i32) -> (i32, i32) {
    %c0_i32 = arith.constant 0 : i32
    %c0_i32_0 = arith.constant 0 : i32
    %c0_i32_1 = arith.constant 0 : i32
    return %c0_i32, %c0_i32_0 : i32, i32
  }
  func.func @transform_11(%arg0: i32) -> (i32, i32) {
    %c0_i32 = arith.constant 0 : i32
    %c0_i32_0 = arith.constant 0 : i32
    %c0_i32_1 = arith.constant 0 : i32
    return %c0_i32, %c0_i32_0 : i32, i32
  }
  func.func @transform_12(%arg0: i32) -> (i32, i32) {
    %c0_i32 = arith.constant 0 : i32
    %c0_i32_0 = arith.constant 0 : i32
    %c0_i32_1 = arith.constant 0 : i32
    return %c0_i32, %c0_i32_0 : i32, i32
  }
}

</mosaic_0001>

<bundles_post_ra>
// kernel: net_forward.1
= control target key start
LH: loop header
LB: loop body
LE: loop exit
PB: predicated region body
PF: predicated region fallthrough
CT: control target
= control target key end

     0   :  { %vm307_vm0 = vcmask 1042432   ;;  %s6224_s0 = inlined_call_operand.vmem [shape: f32[512,27], index: 0, kind: input, shape index: {}]   ;;  %s6225_s1 = inlined_call_operand.vmem [shape: f32[27,12], index: 1, kind: input, shape index: {}]   ;;  %s6226_s2 = inlined_call_operand.vmem [shape: f32[1,12], index: 2, kind: input, shape index: {}]   ;;  %s6227_s3 = inlined_call_operand.vmem [shape: f32[9,128,128], index: 3, kind: input, shape index: {}]   ;;  %s6228_s4 = inlined_call_operand.vmem [shape: f32[9,12,12], index: 4, kind: input, shape index: {}]   ;;  %s6229_s5 = inlined_call_operand.vmem [shape: f32[1,12], index: 5, kind: input, shape index: {}]   ;;  %s6230_s6 = inlined_call_operand.vmem [shape: f32[9,32,32], index: 6, kind: input, shape index: {}]   ;;  %s6231_s7 = inlined_call_operand.vmem [shape: f32[9,12,24], index: 7, kind: input, shape index: {}]   ;;  %s6232_s8 = inlined_call_operand.vmem [shape: f32[1,24], index: 8, kind: input, shape index: {}]   ;;  %s6233_s9 = inlined_call_operand.vmem [shape: f32[3,32,24], index: 9, kind: input, shape index: {}]   ;;  %s6234_s10 = inlined_call_operand.vmem [shape: f32[1,3], index: 10, kind: input, shape index: {}]   ;;  %s6235_s11 = inlined_call_operand.vmem [shape: f32[2,32], index: 11, kind: input, shape index: {}]   ;;  %s6236_s12 = inlined_call_operand.hbm [shape: f32[2,3], index: 12, kind: output, shape index: {}]  }
   0x1   :  { %v109_v0 = vld [vmem:[%s6225_s1 + $0x18] sm:$0x7]  ;;  %v108_v1 = vld [vmem:[%s6225_s1 + $0x10] sm:$0xff]  ;;  %v107_v2 = vld [vmem:[%s6225_s1 + $0x8] sm:$0xff] }
   0x2   :  { %3611 = vmatpush.msk.msra.mxu0 %vm307_vm0, %v109_v0  ;;  %v106_v3 = vld [vmem:[%s6225_s1] sm:$0xff] }
   0x4   :  { %324 = vmatpush.msra.mxu0 %v108_v1 }
   0x5   :  { %17 = vsyncpa [#allocation3], 0  ;;  %v42_v4 = vld [vmem:[%s6224_s0] sm:$0xff]  ;;  %vm114_vm1 = vcmask 220160   ;;  %v43_v5 = vld [vmem:[%s6224_s0 + $0x8] sm:$0xff]  ;;  %vm801_vm2 = vcmask 1043456  }
   0x6   :  { %325 = vmatpush.msra.mxu0 %v107_v2  ;;  %v44_v6 = vld [vmem:[%s6224_s0 + $0x10] sm:$0xff]  ;;  %v45_v7 = vld [vmem:[%s6224_s0 + $0x18] sm:$0xff]  ;;  %v46_v8 = vld [vmem:[%s6224_s0 + $0x20] sm:$0xff]  ;;  %vm752_vm3 = vcmask 97280   ;;  %vm2545_vm4 = vcmask 261120   ;;  %vm3427_vm5 = vcmask 195584  }
   0x7   :  { %v47_v9 = vld [vmem:[%s6224_s0 + $0x28] sm:$0xff]  ;;  %v48_v10 = vld [vmem:[%s6224_s0 + $0x30] sm:$0xff]  ;;  %v49_v11 = vld [vmem:[%s6224_s0 + $0x38] sm:$0xff]  ;;  %vm3581_vm9 = vcmask 17408  }
   0x8   :  { %326 = vmatpush.msra.mxu0 %v106_v3  ;;  %v50_v12 = vld [vmem:[%s6224_s0 + $0x40] sm:$0xff]  ;;  %v51_v13 = vld [vmem:[%s6224_s0 + $0x48] sm:$0xff]  ;;  %v52_v14 = vld [vmem:[%s6224_s0 + $0x50] sm:$0xff] }
   0x9   :  { %3612 = vmatmul.msk.f32.vlgmr.msra.gmra.mxu0 %vm114_vm1, %v42_v4  ;;  %v53_v15 = vld [vmem:[%s6224_s0 + $0x58] sm:$0xff]  ;;  %v54_v16 = vld [vmem:[%s6224_s0 + $0x60] sm:$0xff]  ;;  %v55_v17 = vld [vmem:[%s6224_s0 + $0x68] sm:$0xff] }
   0xa   :  { %v56_v18 = vld [vmem:[%s6224_s0 + $0x70] sm:$0xff]  ;;  %v57_v19 = vld [vmem:[%s6224_s0 + $0x78] sm:$0xff]  ;;  %v58_v21 = vld [vmem:[%s6224_s0 + $0x80] sm:$0xff] }
   0xb   :  { %v59_v23 = vld [vmem:[%s6224_s0 + $0x88] sm:$0xff]  ;;  %v60_v25 = vld [vmem:[%s6224_s0 + $0x90] sm:$0xff]  ;;  %v61_v27 = vld [vmem:[%s6224_s0 + $0x98] sm:$0xff] }
   0xc   :  { %v62_v29 = vld [vmem:[%s6224_s0 + $0xa0] sm:$0xff]  ;;  %v63_v31 = vld [vmem:[%s6224_s0 + $0xa8] sm:$0xff]  ;;  %v64_v33 = vld [vmem:[%s6224_s0 + $0xb0] sm:$0xff] }
   0xd   :  { %v65_v35 = vld [vmem:[%s6224_s0 + $0xb8] sm:$0xff]  ;;  %v66_v37 = vld [vmem:[%s6224_s0 + $0xc0] sm:$0xff]  ;;  %v67_v39 = vld [vmem:[%s6224_s0 + $0xc8] sm:$0xff] }
   0xe   :  { %v68_v41 = vld [vmem:[%s6224_s0 + $0xd0] sm:$0xff]  ;;  %v69_v43 = vld [vmem:[%s6224_s0 + $0xd8] sm:$0xff]  ;;  %v70_v45 = vld [vmem:[%s6224_s0 + $0xe0] sm:$0xff] }
   0xf   :  { %v71_v47 = vld [vmem:[%s6224_s0 + $0xe8] sm:$0xff]  ;;  %v72_v49 = vld [vmem:[%s6224_s0 + $0xf0] sm:$0xff]  ;;  %v73_v51 = vld [vmem:[%s6224_s0 + $0xf8] sm:$0xff] }
  0x10   :  { %v74_v53 = vld [vmem:[%s6224_s0 + $0x100] sm:$0xff]  ;;  %v75_v55 = vld [vmem:[%s6224_s0 + $0x108] sm:$0xff]  ;;  %v76_v57 = vld [vmem:[%s6224_s0 + $0x110] sm:$0xff] }
  0x11   :  { %3613 = vmatmul.msk.f32.gmra.mxu0 %vm114_vm1, %v43_v5  ;;  %v77_v59 = vld [vmem:[%s6224_s0 + $0x118] sm:$0xff]  ;;  %v78_v61 = vld [vmem:[%s6224_s0 + $0x120] sm:$0xff]  ;;  %v79_v63 = vld [vmem:[%s6224_s0 + $0x128] sm:$0xff] }
  0x12   :  { %v80_v1 = vld [vmem:[%s6224_s0 + $0x130] sm:$0xff]  ;;  %v81_v3 = vld [vmem:[%s6224_s0 + $0x138] sm:$0xff]  ;;  %v82_v5 = vld [vmem:[%s6224_s0 + $0x140] sm:$0xff] }
  0x19   :  { %3614 = vmatmul.msk.f32.gmra.mxu0 %vm114_vm1, %v44_v6 }
  0x21   :  { %3615 = vmatmul.msk.f32.gmra.mxu0 %vm114_vm1, %v45_v7  ;;  %v83_v7 = vld [vmem:[%s6224_s0 + $0x148] sm:$0xff] }
  0x29   :  { %3616 = vmatmul.msk.f32.gmra.mxu0 %vm114_vm1, %v46_v8 }
  0x31   :  { %3617 = vmatmul.msk.f32.gmra.mxu0 %vm114_vm1, %v47_v9  ;;  %v84_v9 = vld [vmem:[%s6224_s0 + $0x150] sm:$0xff] }
  0x39   :  { %3618 = vmatmul.msk.f32.gmra.mxu0 %vm114_vm1, %v48_v10 }
  0x41   :  { %3619 = vmatmul.msk.f32.gmra.mxu0 %vm114_vm1, %v49_v11  ;;  %v85_v11 = vld [vmem:[%s6224_s0 + $0x158] sm:$0xff] }
  0x49   :  { %3620 = vmatmul.msk.f32.gmra.mxu0 %vm114_vm1, %v50_v12 }
  0x51   :  { %3621 = vmatmul.msk.f32.gmra.mxu0 %vm114_vm1, %v51_v13  ;;  %v86_v13 = vld [vmem:[%s6224_s0 + $0x160] sm:$0xff] }
  0x59   :  { %3622 = vmatmul.msk.f32.gmra.mxu0 %vm114_vm1, %v52_v14 }
  0x61   :  { %3623 = vmatmul.msk.f32.gmra.mxu0 %vm114_vm1, %v53_v15  ;;  %v87_v15 = vld [vmem:[%s6224_s0 + $0x168] sm:$0xff] }
  0x69   :  { %3624 = vmatmul.msk.f32.gmra.mxu0 %vm114_vm1, %v54_v16 }
  0x71   :  { %3625 = vmatmul.msk.f32.gmra.mxu0 %vm114_vm1, %v55_v17  ;;  %v88_v17 = vld [vmem:[%s6224_s0 + $0x170] sm:$0xff] }
  0x79   :  { %3626 = vmatmul.msk.f32.gmra.mxu0 %vm114_vm1, %v56_v18 }
  0x81   :  { %3627 = vmatmul.msk.f32.gmra.mxu0 %vm114_vm1, %v57_v19  ;;  %v89_v19 = vld [vmem:[%s6224_s0 + $0x178] sm:$0xff] }
  0x86   :  { %v4295_v20 = vpop.f32.mrf.mxu0 }
  0x87   :  { %6237 = vst [vmem:[#allocation5_spill] sm:$0xff] %v4295_v20 }
  0x89   :  { %3628 = vmatmul.msk.f32.gmra.mxu0 %vm114_vm1, %v58_v21 }
  0x8e   :  { %v4301_v22 = vpop.f32.mrf.mxu0 }
  0x8f   :  { %6238 = vst [vmem:[#allocation6_spill] sm:$0xff] %v4301_v22 }
  0x91   :  { %3629 = vmatmul.msk.f32.gmra.mxu0 %vm114_vm1, %v59_v23  ;;  %v90_v23 = vld [vmem:[%s6224_s0 + $0x180] sm:$0xff] }
  0x96   :  { %v4307_v24 = vpop.f32.mrf.mxu0 }
  0x97   :  { %6239 = vst [vmem:[#allocation7_spill] sm:$0xff] %v4307_v24 }
  0x99   :  { %3630 = vmatmul.msk.f32.gmra.mxu0 %vm114_vm1, %v60_v25 }
  0x9e   :  { %v4313_v26 = vpop.f32.mrf.mxu0 }
  0x9f   :  { %6240 = vst [vmem:[#allocation8_spill] sm:$0xff] %v4313_v26 }
  0xa1   :  { %3631 = vmatmul.msk.f32.gmra.mxu0 %vm114_vm1, %v61_v27  ;;  %v91_v27 = vld [vmem:[%s6224_s0 + $0x188] sm:$0xff] }
  0xa6   :  { %v4319_v28 = vpop.f32.mrf.mxu0 }
  0xa9   :  { %3632 = vmatmul.msk.f32.gmra.mxu0 %vm114_vm1, %v62_v29 }
  0xae   :  { %v4325_v30 = vpop.f32.mrf.mxu0 }
  0xb1   :  { %3633 = vmatmul.msk.f32.gmra.mxu0 %vm114_vm1, %v63_v31  ;;  %v92_v31 = vld [vmem:[%s6224_s0 + $0x190] sm:$0xff] }
  0xb6   :  { %v4331_v32 = vpop.f32.mrf.mxu0 }
  0xb9   :  { %3634 = vmatmul.msk.f32.gmra.mxu0 %vm114_vm1, %v64_v33 }
  0xbe   :  { %v4337_v34 = vpop.f32.mrf.mxu0 }
  0xc1   :  { %3635 = vmatmul.msk.f32.gmra.mxu0 %vm114_vm1, %v65_v35  ;;  %v93_v35 = vld [vmem:[%s6224_s0 + $0x198] sm:$0xff] }
  0xc6   :  { %v4343_v36 = vpop.f32.mrf.mxu0 }
  0xc9   :  { %3636 = vmatmul.msk.f32.gmra.mxu0 %vm114_vm1, %v66_v37 }
  0xce   :  { %v4349_v38 = vpop.f32.mrf.mxu0 }
  0xd1   :  { %3637 = vmatmul.msk.f32.gmra.mxu0 %vm114_vm1, %v67_v39  ;;  %v94_v39 = vld [vmem:[%s6224_s0 + $0x1a0] sm:$0xff] }
  0xd6   :  { %v4355_v40 = vpop.f32.mrf.mxu0 }
  0xd9   :  { %3638 = vmatmul.msk.f32.gmra.mxu0 %vm114_vm1, %v68_v41 }
  0xde   :  { %v4361_v42 = vpop.f32.mrf.mxu0 }
  0xe1   :  { %3639 = vmatmul.msk.f32.gmra.mxu0 %vm114_vm1, %v69_v43  ;;  %v95_v43 = vld [vmem:[%s6224_s0 + $0x1a8] sm:$0xff] }
  0xe6   :  { %v4367_v44 = vpop.f32.mrf.mxu0 }
  0xe9   :  { %3640 = vmatmul.msk.f32.gmra.mxu0 %vm114_vm1, %v70_v45 }
  0xee   :  { %v4373_v46 = vpop.f32.mrf.mxu0 }
  0xf1   :  { %3641 = vmatmul.msk.f32.gmra.mxu0 %vm114_vm1, %v71_v47  ;;  %v96_v47 = vld [vmem:[%s6224_s0 + $0x1b0] sm:$0xff] }
  0xf6   :  { %v4379_v48 = vpop.f32.mrf.mxu0 }
  0xf9   :  { %3642 = vmatmul.msk.f32.gmra.mxu0 %vm114_vm1, %v72_v49 }
  0xfe   :  { %v4385_v50 = vpop.f32.mrf.mxu0 }
 0x101   :  { %3643 = vmatmul.msk.f32.gmra.mxu0 %vm114_vm1, %v73_v51  ;;  %v97_v51 = vld [vmem:[%s6224_s0 + $0x1b8] sm:$0xff] }
 0x106   :  { %v4391_v52 = vpop.f32.mrf.mxu0 }
 0x107   :  { %6241 = vst [vmem:[#allocation9_spill] sm:$0xff] %v4391_v52 }
 0x109   :  { %3644 = vmatmul.msk.f32.gmra.mxu0 %vm114_vm1, %v74_v53 }
 0x10e   :  { %v4397_v54 = vpop.f32.mrf.mxu0 }
 0x10f   :  { %6242 = vst [vmem:[#allocation10_spill] sm:$0xff] %v4397_v54 }
 0x111   :  { %3645 = vmatmul.msk.f32.gmra.mxu0 %vm114_vm1, %v75_v55  ;;  %v98_v55 = vld [vmem:[%s6224_s0 + $0x1c0] sm:$0xff] }
 0x116   :  { %v4403_v56 = vpop.f32.mrf.mxu0 }
 0x117   :  { %6243 = vst [vmem:[#allocation11_spill] sm:$0xff] %v4403_v56 }
 0x119   :  { %3646 = vmatmul.msk.f32.gmra.mxu0 %vm114_vm1, %v76_v57 }
 0x11e   :  { %v4409_v58 = vpop.f32.mrf.mxu0 }
 0x121   :  { %3647 = vmatmul.msk.f32.gmra.mxu0 %vm114_vm1, %v77_v59  ;;  %v99_v59 = vld [vmem:[%s6224_s0 + $0x1c8] sm:$0xff] }
 0x126   :  { %v4415_v60 = vpop.f32.mrf.mxu0 }
 0x129   :  { %3648 = vmatmul.msk.f32.gmra.mxu0 %vm114_vm1, %v78_v61 }
 0x12e   :  { %v4421_v62 = vpop.f32.mrf.mxu0 }
 0x131   :  { %3649 = vmatmul.msk.f32.gmra.mxu0 %vm114_vm1, %v79_v63  ;;  %v100_v63 = vld [vmem:[%s6224_s0 + $0x1d0] sm:$0xff] }
 0x136   :  { %v4427_v0 = vpop.f32.mrf.mxu0 }
 0x139   :  { %3650 = vmatmul.msk.f32.gmra.mxu0 %vm114_vm1, %v80_v1 }
 0x13e   :  { %v4433_v2 = vpop.f32.mrf.mxu0 }
 0x141   :  { %3651 = vmatmul.msk.f32.gmra.mxu0 %vm114_vm1, %v81_v3  ;;  %v101_v3 = vld [vmem:[%s6224_s0 + $0x1d8] sm:$0xff] }
 0x146   :  { %v4439_v4 = vpop.f32.mrf.mxu0 }
 0x149   :  { %3652 = vmatmul.msk.f32.gmra.mxu0 %vm114_vm1, %v82_v5 }
 0x14e   :  { %v4445_v6 = vpop.f32.mrf.mxu0 }
 0x151   :  { %3653 = vmatmul.msk.f32.gmra.mxu0 %vm114_vm1, %v83_v7  ;;  %v102_v7 = vld [vmem:[%s6224_s0 + $0x1e0] sm:$0xff] }
 0x156   :  { %v4451_v8 = vpop.f32.mrf.mxu0 }
 0x159   :  { %3654 = vmatmul.msk.f32.gmra.mxu0 %vm114_vm1, %v84_v9 }
 0x15e   :  { %v4457_v10 = vpop.f32.mrf.mxu0 }
 0x161   :  { %3655 = vmatmul.msk.f32.gmra.mxu0 %vm114_vm1, %v85_v11  ;;  %v103_v11 = vld [vmem:[%s6224_s0 + $0x1e8] sm:$0xff] }
 0x166   :  { %v4463_v12 = vpop.f32.mrf.mxu0 }
 0x169   :  { %3656 = vmatmul.msk.f32.gmra.mxu0 %vm114_vm1, %v86_v13 }
 0x16e   :  { %v4469_v14 = vpop.f32.mrf.mxu0 }
 0x171   :  { %3657 = vmatmul.msk.f32.gmra.mxu0 %vm114_vm1, %v87_v15  ;;  %v104_v15 = vld [vmem:[%s6224_s0 + $0x1f0] sm:$0xff] }
 0x176   :  { %v4475_v16 = vpop.f32.mrf.mxu0 }
 0x179   :  { %3658 = vmatmul.msk.f32.gmra.mxu0 %vm114_vm1, %v88_v17 }
 0x17e   :  { %v4481_v18 = vpop.f32.mrf.mxu0 }
 0x181   :  { %3659 = vmatmul.msk.f32.gmra.mxu0 %vm114_vm1, %v89_v19  ;;  %v105_v19 = vld [vmem:[%s6224_s0 + $0x1f8] sm:$0xff]  ;;  %s4153_s0 = smov [#allocation2]  }
 0x182   :  { %s3600_s24 = sshll.u32 %s4153_s0, 4  ;;  %s3601_s24 = int_to_ptr.vmem [resolvable:$true] %s3600_s24 }
 0x186   :  { %v4487_v21 = vpop.f32.mrf.mxu0 }
 0x187   :  { %6244 = vst [vmem:[#allocation12_spill] sm:$0xff] %v4487_v21 }
 0x189   :  { %3660 = vmatmul.msk.f32.gmra.mxu0 %vm114_vm1, %v90_v23 }
 0x18e   :  { %v4493_v25 = vpop.f32.mrf.mxu0 }
 0x18f   :  { %6245 = vst [vmem:[#allocation13_spill] sm:$0xff] %v4493_v25 }
 0x191   :  { %3661 = vmatmul.msk.f32.gmra.mxu0 %vm114_vm1, %v91_v27 }
 0x196   :  { %v4499_v29 = vpop.f32.mrf.mxu0 }
 0x197   :  { %6246 = vst [vmem:[#allocation14_spill] sm:$0xff] %v4499_v29 }
 0x199   :  { %3662 = vmatmul.msk.f32.gmra.mxu0 %vm114_vm1, %v92_v31 }
 0x19e   :  { %v4505_v33 = vpop.f32.mrf.mxu0 }
 0x1a1   :  { %3663 = vmatmul.msk.f32.gmra.mxu0 %vm114_vm1, %v93_v35 }
 0x1a6   :  { %v4511_v37 = vpop.f32.mrf.mxu0 }
 0x1a9   :  { %3664 = vmatmul.msk.f32.gmra.mxu0 %vm114_vm1, %v94_v39 }
 0x1ae   :  { %v4517_v41 = vpop.f32.mrf.mxu0 }
 0x1b1   :  { %3665 = vmatmul.msk.f32.gmra.mxu0 %vm114_vm1, %v95_v43 }
 0x1b6   :  { %v4523_v45 = vpop.f32.mrf.mxu0 }
 0x1b9   :  { %3666 = vmatmul.msk.f32.gmra.mxu0 %vm114_vm1, %v96_v47 }
 0x1be   :  { %v4529_v49 = vpop.f32.mrf.mxu0 }
 0x1c1   :  { %3667 = vmatmul.msk.f32.gmra.mxu0 %vm114_vm1, %v97_v51 }
 0x1c6   :  { %v4535_v53 = vpop.f32.mrf.mxu0 }
 0x1c9   :  { %3668 = vmatmul.msk.f32.gmra.mxu0 %vm114_vm1, %v98_v55 }
 0x1ce   :  { %v4541_v57 = vpop.f32.mrf.mxu0 }
 0x1d1   :  { %3669 = vmatmul.msk.f32.gmra.mxu0 %vm114_vm1, %v99_v59 }
 0x1d6   :  { %v4547_v61 = vpop.f32.mrf.mxu0 }
 0x1d9   :  { %3670 = vmatmul.msk.f32.gmra.mxu0 %vm114_vm1, %v100_v63 }
 0x1de   :  { %v457_v1 = vpop.f32.mrf.mxu0 }
 0x1e1   :  { %3671 = vmatmul.msk.f32.gmra.mxu0 %vm114_vm1, %v101_v3 }
 0x1e6   :  { %v460_v5 = vpop.f32.mrf.mxu0 }
 0x1e9   :  { %3672 = vmatmul.msk.f32.gmra.mxu0 %vm114_vm1, %v102_v7 }
 0x1ee   :  { %v463_v9 = vpop.f32.mrf.mxu0 }
 0x1f1   :  { %3673 = vmatmul.msk.f32.gmra.mxu0 %vm114_vm1, %v103_v11 }
 0x1f6   :  { %v466_v13 = vpop.f32.mrf.mxu0 }
 0x1f9   :  { %3674 = vmatmul.msk.f32.gmra.mxu0 %vm114_vm1, %v104_v15 }
 0x1fe   :  { %v469_v17 = vpop.f32.mrf.mxu0 }
 0x201   :  { %3675 = vmatmul.msk.f32.gmra.mxu0 %vm114_vm1, %v105_v19  ;;  %v4590_v19 = vld [vmem:[%s6226_s2] ss:$0 sm:$0xff] }
 0x202   :  { %v419_v21 = vadd.f32 %v4590_v19, %v4475_v16  ;;  %v422_v52 = vadd.f32 %v4590_v19, %v4481_v18  ;;  %v467_v22 = vadd.f32 %v4590_v19, %v466_v13  ;;  %v371_v25 = vadd.f32 %v4590_v19, %v4379_v48 }
 0x203   :  { %v374_v54 = vadd.f32 %v4590_v19, %v4385_v50  ;;  %v416_v24 = vadd.f32 %v4590_v19, %v4469_v14  ;;  %v470_v16 = vadd.f32 %v4590_v19, %v469_v17  ;;  %v413_v48 = vadd.f32 %v4590_v19, %v4463_v12 }
 0x204   :  { %v534_v50 = vmax.f32 %v371_v25, %v419_v21  ;;  %v461_v14 = vadd.f32 %v4590_v19, %v460_v5  ;;  %v365_v17 = vadd.f32 %v4590_v19, %v4367_v44  ;;  %v407_v25 = vadd.f32 %v4590_v19, %v4451_v8 }
 0x205   :  { %v535_v56 = vmax.f32 %v374_v54, %v422_v52  ;;  %v362_v54 = vadd.f32 %v4590_v19, %v4361_v42  ;;  %v455_v44 = vadd.f32 %v4590_v19, %v4547_v61  ;;  %v452_v8 = vadd.f32 %v4590_v19, %v4541_v57 }
 0x206   :  { %v4573_v23 = vpop.f32.mrf.mxu0  ;;  %v532_v5 = vmax.f32 %v365_v17, %v413_v48  ;;  %v449_v57 = vadd.f32 %v4590_v19, %v4535_v53  ;;  %v446_v53 = vadd.f32 %v4590_v19, %v4529_v49  ;;  %v443_v49 = vadd.f32 %v4590_v19, %v4523_v45 }
 0x207   :  { %6247 = vst [vmem:[#allocation15_spill] sm:$0xff] %v4573_v23  ;;  %v440_v45 = vadd.f32 %v4590_v19, %v4517_v41  ;;  %v437_v41 = vadd.f32 %v4590_v19, %v4511_v37  ;;  %v434_v37 = vadd.f32 %v4590_v19, %v4505_v33 }
 0x20e   :  { %v4575_v27 = vpop.f32.mrf.mxu0 }
 0x20f   :  { %6248 = vst [vmem:[#allocation16_spill] sm:$0xff] %v4575_v27 }
 0x216   :  { %v4577_v31 = vpop.f32.mrf.mxu0 }
 0x217   :  { %6249 = vst [vmem:[#allocation17_spill] sm:$0xff] %v4577_v31 }
 0x21e   :  { %v4579_v35 = vpop.f32.mrf.mxu0 }
 0x226   :  { %v4581_v39 = vpop.f32.mrf.mxu0 }
 0x22e   :  { %v4583_v43 = vpop.f32.mrf.mxu0 }
 0x236   :  { %v4585_v47 = vpop.f32.mrf.mxu0 }
 0x23e   :  { %v493_v51 = vpop.f32.mrf.mxu0 }
 0x246   :  { %v496_v55 = vpop.f32.mrf.mxu0 }
 0x24e   :  { %v499_v59 = vpop.f32.mrf.mxu0 }
 0x256   :  { %v502_v63 = vpop.f32.mrf.mxu0 }
 0x25e   :  { %v505_v3 = vpop.f32.mrf.mxu0 }
 0x266   :  { %v508_v7 = vpop.f32.mrf.mxu0 }
 0x267   :  { %v509_v18 = vadd.f32 %v4590_v19, %v508_v7 }
 0x269   :  { %v548_v12 = vmax.f32 %v461_v14, %v509_v18 }
 0x26b   :  { %v564_v61 = vmax.f32 %v532_v5, %v548_v12 }
 0x26e   :  { %v511_v11 = vpop.f32.mrf.mxu0 }
 0x26f   :  { %v512_v23 = vadd.f32 %v4590_v19, %v511_v11  ;;  %v368_v11 = vadd.f32 %v4590_v19, %v4373_v46  ;;  %v458_v46 = vadd.f32 %v4590_v19, %v457_v1 }
 0x276   :  { %v514_v15 = vpop.f32.mrf.mxu0 }
 0x277   :  { %v515_v20 = vadd.f32 %v4590_v19, %v514_v15  ;;  %v464_v15 = vadd.f32 %v4590_v19, %v463_v9  ;;  %v506_v9 = vadd.f32 %v4590_v19, %v505_v3 }
 0x279   :  { %v550_v29 = vmax.f32 %v467_v22, %v515_v20  ;;  %v549_v26 = vmax.f32 %v464_v15, %v512_v23  ;;  %v410_v20 = vadd.f32 %v4590_v19, %v4457_v10  ;;  %v533_v22 = vmax.f32 %v368_v11, %v416_v24 }
 0x27a   :  { %v500_v10 = vadd.f32 %v4590_v19, %v499_v59  ;;  %v547_v24 = vmax.f32 %v458_v46, %v506_v9  ;;  %v4660_v11 = vmax.f32 %v564_v61, 0.0 }
 0x27b   :  { %v566_v21 = vmax.f32 %v534_v50, %v550_v29  ;;  %v565_v23 = vmax.f32 %v533_v22, %v549_v26  ;;  %v359_v29 = vadd.f32 %v4590_v19, %v4355_v40  ;;  %v531_v42 = vmax.f32 %v362_v54, %v410_v20 }
 0x27c   :  { %v356_v26 = vadd.f32 %v4590_v19, %v4349_v38  ;;  %v401_v40 = vadd.f32 %v4590_v19, %v4439_v4  ;;  %v545_v59 = vmax.f32 %v452_v8, %v500_v10  ;;  %v353_v38 = vadd.f32 %v4590_v19, %v4343_v36 }
 0x27d   :  { %v4637_v3 = vmax.f32 %v566_v21, 0.0  ;;  %v563_v7 = vmax.f32 %v531_v42, %v547_v24  ;;  %v4648_v15 = vmax.f32 %v565_v23, 0.0  ;;  %v398_v4 = vadd.f32 %v4590_v19, %v4433_v2  ;;  %v6251_v24 = vld [vmem:[#allocation8_spill] sm:$0xff]  ;;  %v6252_v23 = vld [vmem:[#allocation11_spill] sm:$0xff] }
 0x27e   :  { %v517_v27 = vpop.f32.mrf.mxu0  ;;  %v350_v36 = vadd.f32 %v4590_v19, %v4337_v34  ;;  %v395_v2 = vadd.f32 %v4590_v19, %v4427_v0  ;;  %v528_v48 = vmax.f32 %v353_v38, %v401_v40  ;;  %v347_v34 = vadd.f32 %v4590_v19, %v4331_v32  ;;  %v6254_v42 = vld [vmem:[#allocation16_spill] sm:$0xff]  ;;  %v6258_v38 = vld [vmem:[#allocation15_spill] sm:$0xff] }
 0x27f   :  { %v518_v13 = vadd.f32 %v4590_v19, %v517_v27  ;;  %v503_v27 = vadd.f32 %v4590_v19, %v502_v63  ;;  %v4672_v9 = vmax.f32 %v563_v7, 0.0  ;;  %v392_v0 = vadd.f32 %v4590_v19, %v4421_v62 }
 0x280   :  { %v527_v17 = vmax.f32 %v350_v36, %v398_v4  ;;  %v344_v32 = vadd.f32 %v4590_v19, %v4325_v30  ;;  %v389_v62 = vadd.f32 %v4590_v19, %v4415_v60  ;;  %v341_v30 = vadd.f32 %v4590_v19, %v4319_v28  ;;  %v6260_v36 = vld [vmem:[#allocation9_spill] sm:$0xff] }
 0x281   :  { %v551_v31 = vmax.f32 %v470_v16, %v518_v13  ;;  %v546_v63 = vmax.f32 %v455_v44, %v503_v27  ;;  %v526_v27 = vmax.f32 %v347_v34, %v395_v2  ;;  %v386_v60 = vadd.f32 %v4590_v19, %v4409_v58 }
 0x282   :  { %v525_v54 = vmax.f32 %v344_v32, %v392_v0  ;;  %v338_v28 = vadd.f32 %v4590_v19, %v6251_v24  ;;  %v383_v58 = vadd.f32 %v4590_v19, %v6252_v23  ;;  %v476_v8 = vadd.f32 %v4590_v19, %v6254_v42  ;;  %v6262_v0 = vld [vmem:[#allocation5_spill] sm:$0xff]  ;;  %v3679_v24 = vld [vmem:[%s6227_s3 + $0x98] sm:$0xff] }
 0x283   :  { %v567_v52 = vmax.f32 %v535_v56, %v551_v31  ;;  %v404_v56 = vadd.f32 %v4590_v19, %v4445_v6  ;;  %v497_v31 = vadd.f32 %v4590_v19, %v496_v55  ;;  %v530_v6 = vmax.f32 %v359_v29, %v407_v25  ;;  %v6250_v25 = vld [vmem:[#allocation17_spill] sm:$0xff]  ;;  %v591_v42 = vld [vmem:[%s6227_s3 + $0x38] sm:$0xff] }
 0x284   :  { %v494_v55 = vadd.f32 %v4590_v19, %v493_v51  ;;  %v491_v51 = vadd.f32 %v4590_v19, %v4585_v47  ;;  %v488_v47 = vadd.f32 %v4590_v19, %v4583_v43  ;;  %v485_v43 = vadd.f32 %v4590_v19, %v4581_v39  ;;  %v3680_v23 = vld [vmem:[%s6227_s3 + $0xa0] sm:$0xff] }
 0x285   :  { %v4628_v1 = vmax.f32 %v567_v52, 0.0  ;;  %v529_v16 = vmax.f32 %v356_v26, %v404_v56  ;;  %v544_v18 = vmax.f32 %v449_v57, %v497_v31  ;;  %v562_v13 = vmax.f32 %v530_v6, %v546_v63  ;;  %v6253_v56 = vld [vmem:[#allocation14_spill] sm:$0xff]  ;;  %v6255_v26 = vld [vmem:[#allocation7_spill] sm:$0xff] }
 0x286   :  { %v543_v50 = vmax.f32 %v446_v53, %v494_v55  ;;  %v542_v20 = vmax.f32 %v443_v49, %v491_v51  ;;  %v482_v39 = vadd.f32 %v4590_v19, %v4579_v35  ;;  %v541_v12 = vmax.f32 %v440_v45, %v488_v47  ;;  %v6256_v6 = vld [vmem:[#allocation10_spill] sm:$0xff]  ;;  %v6261_v49 = vld [vmem:[#allocation12_spill] sm:$0xff] }
 0x287   :  { %600 = vmatpush.msra.mxu1 %v4628_v1  ;;  %684 = vmatpush.msra.mxu2 %v4628_v1  ;;  %v561_v14 = vmax.f32 %v529_v16, %v545_v59  ;;  %v560_v22 = vmax.f32 %v528_v48, %v544_v18  ;;  %v4684_v46 = vmax.f32 %v562_v13, 0.0  ;;  %v479_v35 = vadd.f32 %v4590_v19, %v6250_v25  ;;  %v6257_v59 = vld [vmem:[#allocation13_spill] sm:$0xff]  ;;  %v6259_v18 = vld [vmem:[#allocation6_spill] sm:$0xff] }
 0x288   :  { %v559_v21 = vmax.f32 %v527_v17, %v543_v50  ;;  %v540_v5 = vmax.f32 %v437_v41, %v485_v43  ;;  %v558_v44 = vmax.f32 %v526_v27, %v542_v20  ;;  %v524_v29 = vmax.f32 %v341_v30, %v389_v62  ;;  %v3676_v30 = vld [vmem:[%s6227_s3 + $0x80] sm:$0xff]  ;;  %v3677_v25 = vld [vmem:[%s6227_s3 + $0x88] sm:$0xff] }
 0x289   :  { %601 = vmatpush.msra.mxu1 %v4637_v3  ;;  %685 = vmatpush.msra.mxu2 %v4637_v3  ;;  %v4696_v52 = vmax.f32 %v561_v14, 0.0  ;;  %v4708_v10 = vmax.f32 %v560_v22, 0.0  ;;  %v431_v33 = vadd.f32 %v4590_v19, %v6253_v56  ;;  %v539_v31 = vmax.f32 %v434_v37, %v482_v39  ;;  %v585_v37 = vld [vmem:[%s6227_s3 + $0x8] sm:$0xff]  ;;  %v590_v56 = vld [vmem:[%s6227_s3 + $0x30] sm:$0xff] }
 0x28a   :  { %v557_v63 = vmax.f32 %v525_v54, %v541_v12  ;;  %v4720_v61 = vmax.f32 %v559_v21, 0.0  ;;  %v335_v40 = vadd.f32 %v4590_v19, %v6255_v26  ;;  %v380_v57 = vadd.f32 %v4590_v19, %v6256_v6  ;;  %v584_v21 = vld [vmem:[%s6227_s3] sm:$0xff]  ;;  %v593_v26 = vld [vmem:[%s6227_s3 + $0x48] sm:$0xff]  ;;  %v594_v6 = vld [vmem:[%s6227_s3 + $0x50] sm:$0xff] }
 0x28b   :  { %602 = vmatpush.msra.mxu1 %v4648_v15  ;;  %686 = vmatpush.msra.mxu2 %v4648_v15  ;;  %v523_v55 = vmax.f32 %v338_v28, %v386_v60  ;;  %v428_v7 = vadd.f32 %v4590_v19, %v6257_v59  ;;  %v473_v4 = vadd.f32 %v4590_v19, %v6258_v38  ;;  %v4732_v51 = vmax.f32 %v558_v44, 0.0  ;;  %v3745_v60 = vld [vmem:[%s6228_s4 + $0x28] sm:$0xf]  ;;  %v3744_v54 = vld [vmem:[%s6228_s4 + $0x20] sm:$0xff]  ;;  %v587_v44 = vld [vmem:[%s6227_s3 + $0x18] sm:$0xff] }
 0x28c   :  { %v538_v16 = vmax.f32 %v431_v33, %v479_v35  ;;  %v556_v53 = vmax.f32 %v524_v29, %v540_v5  ;;  %v332_v13 = vadd.f32 %v4590_v19, %v6259_v18  ;;  %v377_v2 = vadd.f32 %v4590_v19, %v6260_v36  ;;  %v586_v35 = vld [vmem:[%s6227_s3 + $0x10] sm:$0xff]  ;;  %v588_v28 = vld [vmem:[%s6227_s3 + $0x20] sm:$0xff]  ;;  %v3681_v29 = vld [vmem:[%s6227_s3 + $0xa8] sm:$0xff] }
 0x28d   :  { %603 = vmatpush.msra.mxu1 %v4660_v11  ;;  %687 = vmatpush.msra.mxu2 %v4660_v11  ;;  %v522_v48 = vmax.f32 %v335_v40, %v383_v58  ;;  %v425_v47 = vadd.f32 %v4590_v19, %v6261_v49  ;;  %v537_v50 = vmax.f32 %v428_v7, %v476_v8  ;;  %v4742_v34 = vmax.f32 %v557_v63, 0.0  ;;  %v3678_v5 = vld [vmem:[%s6227_s3 + $0x90] sm:$0xff]  ;;  %v589_v58 = vld [vmem:[%s6227_s3 + $0x28] sm:$0xff]  ;;  %v3683_v8 = vld [vmem:[%s6227_s3 + $0xb8] sm:$0xff] }
 0x28e   :  { %v555_v14 = vmax.f32 %v523_v55, %v539_v31  ;;  %v329_v17 = vadd.f32 %v4590_v19, %v6262_v0  ;;  %v521_v45 = vmax.f32 %v332_v13, %v380_v57  ;;  %v4748_v22 = vmax.f32 %v556_v53, 0.0  ;;  %v3682_v33 = vld [vmem:[%s6227_s3 + $0xb0] sm:$0xff]  ;;  %v592_v31 = vld [vmem:[%s6227_s3 + $0x40] sm:$0xff]  ;;  %v3685_v40 = vld [vmem:[%s6227_s3 + $0xc8] sm:$0xff] }
 0x28f   :  { %604 = vmatpush.msra.mxu1 %v4672_v9  ;;  %688 = vmatpush.msra.mxu2 %v4672_v9  ;;  %v536_v43 = vmax.f32 %v425_v47, %v473_v4  ;;  %v554_v20 = vmax.f32 %v522_v48, %v538_v16  ;;  %v3684_v63 = vld [vmem:[%s6227_s3 + $0xc0] sm:$0xff]  ;;  %v3686_v57 = vld [vmem:[%s6227_s3 + $0xd0] sm:$0xff]  ;;  %v595_v55 = vld [vmem:[%s6227_s3 + $0x58] sm:$0xff] }
 0x290   :  { %v520_v32 = vmax.f32 %v329_v17, %v377_v2  ;;  %v553_v62 = vmax.f32 %v521_v45, %v537_v50  ;;  %v4752_v27 = vmax.f32 %v555_v14, 0.0  ;;  %v3687_v59 = vld [vmem:[%s6227_s3 + $0xd8] sm:$0xff]  ;;  %v596_v4 = vld [vmem:[%s6227_s3 + $0x60] sm:$0xff]  ;;  %v3779_v16 = vld [vmem:[%s6228_s4 + $0x30] sm:$0xff] }
 0x291   :  { %605 = vmatpush.msra.mxu1 %v4684_v46  ;;  %689 = vmatpush.msra.mxu2 %v4684_v46  ;;  %v4756_v39 = vmax.f32 %v554_v20, 0.0  ;;  %v3780_v7 = vld [vmem:[%s6228_s4 + $0x38] sm:$0xf]  ;;  %v3692_v53 = vld [vmem:[%s6228_s4 + $0x10] sm:$0xff]  ;;  %v3688_v18 = vld [vmem:[%s6227_s3 + $0xe0] sm:$0xff] }
 0x292   :  { %v552_v41 = vmax.f32 %v520_v32, %v536_v43  ;;  %v4760_v19 = vmax.f32 %v553_v62, 0.0  ;;  %v3693_v38 = vld [vmem:[%s6228_s4 + $0x18] sm:$0xf]  ;;  %v666_v13 = vld [vmem:[%s6228_s4 + $0x8] sm:$0xf]  ;;  %v665_v36 = vld [vmem:[%s6228_s4] sm:$0xff] }
 0x293   :  { %606 = vmatpush.msra.mxu1 %v4696_v52  ;;  %690 = vmatpush.msra.mxu2 %v4696_v52  ;;  %v597_v2 = vld [vmem:[%s6227_s3 + $0x68] sm:$0xff]  ;;  %v598_v49 = vld [vmem:[%s6227_s3 + $0x70] sm:$0xff]  ;;  %v599_v50 = vld [vmem:[%s6227_s3 + $0x78] sm:$0xff] }
 0x294   :  { %v4764_v12 = vmax.f32 %v552_v41, 0.0  ;;  %3694 = vmatpush.msk.msra.mxu3 %vm801_vm2, %v3693_v38  ;;  %v3689_v48 = vld [vmem:[%s6227_s3 + $0xe8] sm:$0xff]  ;;  %v3690_v47 = vld [vmem:[%s6227_s3 + $0xf0] sm:$0xff]  ;;  %v3691_v14 = vld [vmem:[%s6227_s3 + $0xf8] sm:$0xff] }
 0x295   :  { %607 = vmatpush.msra.mxu1 %v4708_v10  ;;  %691 = vmatpush.msra.mxu2 %v4708_v10  ;;  %v3728_v17 = vld [vmem:[%s6227_s3 + $0x100] sm:$0xff]  ;;  %v3729_v20 = vld [vmem:[%s6227_s3 + $0x108] sm:$0xff]  ;;  %v3730_v41 = vld [vmem:[%s6227_s3 + $0x110] sm:$0xff] }
 0x296   :  { %820 = vmatpush.msra.mxu3 %v3692_v53 }
 0x297   :  { %608 = vmatpush.msra.mxu1 %v4720_v61  ;;  %692 = vmatpush.msra.mxu2 %v4720_v61 }
 0x298   :  { %3711 = vmatpush.msk.msrb.mxu3 %vm801_vm2, %v666_v13  ;;  %v3741_v13 = vld [vmem:[%s6227_s3 + $0x168] sm:$0xff] }
 0x299   :  { %609 = vmatpush.msra.mxu1 %v4732_v51  ;;  %693 = vmatpush.msra.mxu2 %v4732_v51 }
 0x29a   :  { %936 = vmatpush.msrb.mxu3 %v665_v36 }
 0x29b   :  { %610 = vmatpush.msra.mxu1 %v4742_v34  ;;  %694 = vmatpush.msra.mxu2 %v4742_v34 }
 0x29d   :  { %611 = vmatpush.msra.mxu1 %v4748_v22  ;;  %695 = vmatpush.msra.mxu2 %v4748_v22 }
 0x29f   :  { %612 = vmatpush.msra.mxu1 %v4752_v27  ;;  %696 = vmatpush.msra.mxu2 %v4752_v27 }
 0x2a1   :  { %613 = vmatpush.msra.mxu1 %v4756_v39  ;;  %697 = vmatpush.msra.mxu2 %v4756_v39 }
 0x2a3   :  { %614 = vmatpush.msra.mxu1 %v4760_v19  ;;  %698 = vmatpush.msra.mxu2 %v4760_v19 }
 0x2a5   :  { %615 = vmatpush.msra.mxu1 %v4764_v12  ;;  %699 = vmatpush.msra.mxu2 %v4764_v12 }
 0x2a6   :  { %616 = vmatmul.f32.vlgmr.msra.gmra.mxu1 %v584_v21  ;;  %700 = vmatmul.f32.vlgmr.msra.gmra.mxu2 %v3676_v30 }
 0x2a7   :  { %1003 = vmatpush.msrb.mxu1 %v4628_v1  ;;  %3746 = vmatpush.msk.msrb.mxu2 %vm801_vm2, %v3745_v60  ;;  %v3731_v60 = vld [vmem:[%s6227_s3 + $0x118] sm:$0xff] }
 0x2a9   :  { %1004 = vmatpush.msrb.mxu1 %v4637_v3  ;;  %1137 = vmatpush.msrb.mxu2 %v3744_v54 }
 0x2ab   :  { %1437 = vmatpush.msra.mxu2 %v4628_v1  ;;  %1005 = vmatpush.msrb.mxu1 %v4648_v15 }
 0x2ad   :  { %1438 = vmatpush.msra.mxu2 %v4637_v3  ;;  %1006 = vmatpush.msrb.mxu1 %v4660_v11 }
 0x2ae   :  { %619 = vmatmul.f32.gmra.mxu1 %v585_v37  ;;  %703 = vmatmul.f32.gmra.mxu2 %v3677_v25  ;;  %v3732_v25 = vld [vmem:[%s6227_s3 + $0x120] sm:$0xff] }
 0x2af   :  { %1439 = vmatpush.msra.mxu2 %v4648_v15  ;;  %1007 = vmatpush.msrb.mxu1 %v4672_v9 }
 0x2b1   :  { %1440 = vmatpush.msra.mxu2 %v4660_v11  ;;  %1008 = vmatpush.msrb.mxu1 %v4684_v46 }
 0x2b3   :  { %1441 = vmatpush.msra.mxu2 %v4672_v9  ;;  %1009 = vmatpush.msrb.mxu1 %v4696_v52 }
 0x2b5   :  { %1442 = vmatpush.msra.mxu2 %v4684_v46  ;;  %1010 = vmatpush.msrb.mxu1 %v4708_v10 }
 0x2b6   :  { %622 = vmatmul.f32.gmra.mxu1 %v586_v35  ;;  %706 = vmatmul.f32.gmra.mxu2 %v3678_v5 }
 0x2b7   :  { %1443 = vmatpush.msra.mxu2 %v4696_v52  ;;  %1011 = vmatpush.msrb.mxu1 %v4720_v61 }
 0x2b9   :  { %1444 = vmatpush.msra.mxu2 %v4708_v10  ;;  %1012 = vmatpush.msrb.mxu1 %v4732_v51 }
 0x2bb   :  { %1445 = vmatpush.msra.mxu2 %v4720_v61  ;;  %1013 = vmatpush.msrb.mxu1 %v4742_v34 }
 0x2bd   :  { %1446 = vmatpush.msra.mxu2 %v4732_v51  ;;  %1014 = vmatpush.msrb.mxu1 %v4748_v22 }
 0x2be   :  { %625 = vmatmul.f32.gmra.mxu1 %v587_v44  ;;  %709 = vmatmul.f32.gmra.mxu2 %v3679_v24  ;;  %v3733_v44 = vld [vmem:[%s6227_s3 + $0x128] sm:$0xff] }
 0x2bf   :  { %1447 = vmatpush.msra.mxu2 %v4742_v34  ;;  %1015 = vmatpush.msrb.mxu1 %v4752_v27 }
 0x2c1   :  { %1448 = vmatpush.msra.mxu2 %v4748_v22  ;;  %1016 = vmatpush.msrb.mxu1 %v4756_v39 }
 0x2c3   :  { %1449 = vmatpush.msra.mxu2 %v4752_v27  ;;  %1017 = vmatpush.msrb.mxu1 %v4760_v19 }
 0x2c5   :  { %1450 = vmatpush.msra.mxu2 %v4756_v39  ;;  %1018 = vmatpush.msrb.mxu1 %v4764_v12 }
 0x2c6   :  { %628 = vmatmul.f32.gmra.mxu1 %v588_v28  ;;  %712 = vmatmul.f32.gmra.mxu2 %v3680_v23  ;;  %v3734_v23 = vld [vmem:[%s6227_s3 + $0x130] sm:$0xff] }
 0x2c7   :  { %1451 = vmatpush.msra.mxu2 %v4760_v19  ;;  %3781 = vmatpush.msk.msra.mxu1 %vm801_vm2, %v3780_v7  ;;  %v3739_v7 = vld [vmem:[%s6227_s3 + $0x158] sm:$0xff] }
 0x2c9   :  { %1452 = vmatpush.msra.mxu2 %v4764_v12  ;;  %1354 = vmatpush.msra.mxu1 %v3779_v16  ;;  %v3740_v16 = vld [vmem:[%s6227_s3 + $0x160] sm:$0xff] }
 0x2ce   :  { %631 = vmatmul.f32.gmra.mxu1 %v589_v58  ;;  %715 = vmatmul.f32.gmra.mxu2 %v3681_v29 }
 0x2d6   :  { %634 = vmatmul.f32.gmra.mxu1 %v590_v56  ;;  %718 = vmatmul.f32.gmra.mxu2 %v3682_v33  ;;  %v3735_v56 = vld [vmem:[%s6227_s3 + $0x138] sm:$0xff] }
 0x2de   :  { %637 = vmatmul.f32.gmra.mxu1 %v591_v42  ;;  %721 = vmatmul.f32.gmra.mxu2 %v3683_v8  ;;  %v3736_v8 = vld [vmem:[%s6227_s3 + $0x140] sm:$0xff] }
 0x2e6   :  { %640 = vmatmul.f32.gmra.mxu1 %v592_v31  ;;  %724 = vmatmul.f32.gmra.mxu2 %v3684_v63 }
 0x2ee   :  { %643 = vmatmul.f32.gmra.mxu1 %v593_v26  ;;  %727 = vmatmul.f32.gmra.mxu2 %v3685_v40  ;;  %v3737_v26 = vld [vmem:[%s6227_s3 + $0x148] sm:$0xff] }
 0x2f6   :  { %646 = vmatmul.f32.gmra.mxu1 %v594_v6  ;;  %730 = vmatmul.f32.gmra.mxu2 %v3686_v57  ;;  %v3738_v57 = vld [vmem:[%s6227_s3 + $0x150] sm:$0xff] }
 0x2fe   :  { %649 = vmatmul.f32.gmra.mxu1 %v595_v55  ;;  %733 = vmatmul.f32.gmra.mxu2 %v3687_v59 }
 0x306   :  { %652 = vmatmul.f32.gmra.mxu1 %v596_v4  ;;  %736 = vmatmul.f32.gmra.mxu2 %v3688_v18 }
 0x30e   :  { %655 = vmatmul.f32.gmra.mxu1 %v597_v2  ;;  %739 = vmatmul.f32.gmra.mxu2 %v3689_v48  ;;  %v3742_v48 = vld [vmem:[%s6227_s3 + $0x170] sm:$0xff] }
 0x316   :  { %658 = vmatmul.f32.gmra.mxu1 %v598_v49  ;;  %742 = vmatmul.f32.gmra.mxu2 %v3690_v47 }
 0x31e   :  { %661 = vmatmul.f32.gmra.mxu1 %v599_v50  ;;  %745 = vmatmul.f32.gmra.mxu2 %v3691_v14  ;;  %v3743_v50 = vld [vmem:[%s6227_s3 + $0x178] sm:$0xff] }
 0x323   :  { %v4926_v0 = vpop.f32.mrf.mxu1 }
 0x326   :  { %1019 = vmatmul.f32.vlgmr.msrb.gmra.mxu1 %v3728_v17 }
 0x327   :  { %1654 = vmatpush.msrb.mxu1 %v4628_v1 }
 0x329   :  { %1655 = vmatpush.msrb.mxu1 %v4637_v3  ;;  %v701_v45 = vpop.f32.mrf.mxu2 }
 0x32a   :  { %3695 = vmatmul.msk.f32.vlgmr.msra.gmra.mxu3 %vm752_vm3, %v701_v45 }
 0x32b   :  { %1220 = vmatpush.msra.mxu3 %v4628_v1  ;;  %1656 = vmatpush.msrb.mxu1 %v4648_v15  ;;  %v4936_v43 = vpop.f32.mrf.mxu1 }
 0x32d   :  { %1221 = vmatpush.msra.mxu3 %v4637_v3  ;;  %1657 = vmatpush.msrb.mxu1 %v4660_v11 }
 0x32e   :  { %1022 = vmatmul.f32.gmra.mxu1 %v3729_v20 }
 0x32f   :  { %1222 = vmatpush.msra.mxu3 %v4648_v15  ;;  %1658 = vmatpush.msrb.mxu1 %v4672_v9 }
 0x331   :  { %1223 = vmatpush.msra.mxu3 %v4660_v11  ;;  %1659 = vmatpush.msrb.mxu1 %v4684_v46  ;;  %v704_v32 = vpop.f32.mrf.mxu2 }
 0x332   :  { %3696 = vmatmul.msk.f32.gmra.mxu3 %vm752_vm3, %v704_v32 }
 0x333   :  { %1660 = vmatpush.msrb.mxu1 %v4696_v52  ;;  %v4949_v62 = vpop.f32.mrf.mxu1  ;;  %1224 = vmatpush.msra.mxu3 %v4672_v9 }
 0x335   :  { %1661 = vmatpush.msrb.mxu1 %v4708_v10  ;;  %1225 = vmatpush.msra.mxu3 %v4684_v46 }
 0x336   :  { %1025 = vmatmul.f32.gmra.mxu1 %v3730_v41 }
 0x337   :  { %1662 = vmatpush.msrb.mxu1 %v4720_v61  ;;  %1226 = vmatpush.msra.mxu3 %v4696_v52 }
 0x339   :  { %1663 = vmatpush.msrb.mxu1 %v4732_v51  ;;  %1227 = vmatpush.msra.mxu3 %v4708_v10  ;;  %v707_v21 = vpop.f32.mrf.mxu2 }
 0x33a   :  { %3697 = vmatmul.msk.f32.gmra.mxu3 %vm752_vm3, %v707_v21 }
 0x33b   :  { %1664 = vmatpush.msrb.mxu1 %v4742_v34  ;;  %v4963_v30 = vpop.f32.mrf.mxu1  ;;  %1228 = vmatpush.msra.mxu3 %v4720_v61 }
 0x33d   :  { %1665 = vmatpush.msrb.mxu1 %v4748_v22  ;;  %1229 = vmatpush.msra.mxu3 %v4732_v51 }
 0x33e   :  { %1028 = vmatmul.f32.gmra.mxu1 %v3731_v60 }
 0x33f   :  { %1666 = vmatpush.msrb.mxu1 %v4752_v27  ;;  %1230 = vmatpush.msra.mxu3 %v4742_v34 }
 0x341   :  { %1667 = vmatpush.msrb.mxu1 %v4756_v39  ;;  %1231 = vmatpush.msra.mxu3 %v4748_v22  ;;  %v710_v54 = vpop.f32.mrf.mxu2 }
 0x342   :  { %3698 = vmatmul.msk.f32.gmra.mxu3 %vm752_vm3, %v710_v54 }
 0x343   :  { %1668 = vmatpush.msrb.mxu1 %v4760_v19  ;;  %v4977_v37 = vpop.f32.mrf.mxu1  ;;  %1232 = vmatpush.msra.mxu3 %v4752_v27 }
 0x345   :  { %1669 = vmatpush.msrb.mxu1 %v4764_v12  ;;  %1233 = vmatpush.msra.mxu3 %v4756_v39 }
 0x346   :  { %1031 = vmatmul.f32.gmra.mxu1 %v3732_v25 }
 0x347   :  { %1234 = vmatpush.msra.mxu3 %v4760_v19 }
 0x349   :  { %1235 = vmatpush.msra.mxu3 %v4764_v12  ;;  %v713_v35 = vpop.f32.mrf.mxu2 }
 0x34a   :  { %3699 = vmatmul.msk.f32.gmra.mxu3 %vm752_vm3, %v713_v35 }
 0x34b   :  { %v4988_v5 = vpop.f32.mrf.mxu1 }
 0x34e   :  { %1034 = vmatmul.f32.gmra.mxu1 %v3733_v44 }
 0x351   :  { %v716_v24 = vpop.f32.mrf.mxu2 }
 0x352   :  { %3700 = vmatmul.msk.f32.gmra.mxu3 %vm752_vm3, %v716_v24 }
 0x353   :  { %v4994_v28 = vpop.f32.mrf.mxu1 }
 0x356   :  { %1037 = vmatmul.f32.gmra.mxu1 %v3734_v23 }
 0x359   :  { %v719_v58 = vpop.f32.mrf.mxu2 }
 0x35a   :  { %3701 = vmatmul.msk.f32.gmra.mxu3 %vm752_vm3, %v719_v58 }
 0x35b   :  { %v5000_v29 = vpop.f32.mrf.mxu1 }
 0x35e   :  { %1040 = vmatmul.f32.gmra.mxu1 %v3735_v56 }
 0x361   :  { %v722_v33 = vpop.f32.mrf.mxu2 }
 0x362   :  { %3702 = vmatmul.msk.f32.gmra.mxu3 %vm752_vm3, %v722_v33 }
 0x363   :  { %v5006_v42 = vpop.f32.mrf.mxu1 }
 0x366   :  { %1043 = vmatmul.f32.gmra.mxu1 %v3736_v8  ;;  %v3815_v8 = vld [vmem:[%s6228_s4 + $0x48] sm:$0xf] }
 0x369   :  { %v725_v31 = vpop.f32.mrf.mxu2 }
 0x36a   :  { %3703 = vmatmul.msk.f32.gmra.mxu3 %vm752_vm3, %v725_v31  ;;  %v3814_v31 = vld [vmem:[%s6228_s4 + $0x40] sm:$0xff] }
 0x36b   :  { %v5012_v63 = vpop.f32.mrf.mxu1 }
 0x36e   :  { %1046 = vmatmul.f32.gmra.mxu1 %v3737_v26 }
 0x371   :  { %v728_v40 = vpop.f32.mrf.mxu2 }
 0x372   :  { %3704 = vmatmul.msk.f32.gmra.mxu3 %vm752_vm3, %v728_v40  ;;  %v3885_v40 = vld [vmem:[%s6228_s4 + $0x68] sm:$0xf] }
 0x373   :  { %v5018_v6 = vpop.f32.mrf.mxu1  ;;  %3886 = vmatpush.msk.msrb.mxu0 %vm801_vm2, %v3885_v40 }
 0x376   :  { %1049 = vmatmul.f32.gmra.mxu1 %v3738_v57 }
 0x379   :  { %v731_v55 = vpop.f32.mrf.mxu2 }
 0x37a   :  { %3705 = vmatmul.msk.f32.gmra.mxu3 %vm752_vm3, %v731_v55 }
 0x37b   :  { %v5024_v59 = vpop.f32.mrf.mxu1 }
 0x37e   :  { %1052 = vmatmul.f32.gmra.mxu1 %v3739_v7  ;;  %v3798_v7 = vld [vmem:[%s6227_s3 + $0x200] sm:$0xff] }
 0x381   :  { %v734_v38 = vpop.f32.mrf.mxu2 }
 0x382   :  { %3706 = vmatmul.msk.f32.gmra.mxu3 %vm752_vm3, %v734_v38 }
 0x383   :  { %v5030_v4 = vpop.f32.mrf.mxu1 }
 0x386   :  { %1055 = vmatmul.f32.gmra.mxu1 %v3740_v16  ;;  %v3763_v16 = vld [vmem:[%s6227_s3 + $0x180] sm:$0xff] }
 0x389   :  { %v737_v53 = vpop.f32.mrf.mxu2 }
 0x38a   :  { %3707 = vmatmul.msk.f32.gmra.mxu3 %vm752_vm3, %v737_v53  ;;  %v3799_v53 = vld [vmem:[%s6227_s3 + $0x208] sm:$0xff] }
 0x38b   :  { %v5036_v18 = vpop.f32.mrf.mxu1 }
 0x38e   :  { %1058 = vmatmul.f32.gmra.mxu1 %v3741_v13 }
 0x391   :  { %v740_v36 = vpop.f32.mrf.mxu2 }
 0x392   :  { %3708 = vmatmul.msk.f32.gmra.mxu3 %vm752_vm3, %v740_v36 }
 0x393   :  { %v5042_v2 = vpop.f32.mrf.mxu1 }
 0x396   :  { %1061 = vmatmul.f32.gmra.mxu1 %v3742_v48  ;;  %v3800_v48 = vld [vmem:[%s6227_s3 + $0x210] sm:$0xff] }
 0x399   :  { %v743_v49 = vpop.f32.mrf.mxu2 }
 0x39a   :  { %3709 = vmatmul.msk.f32.gmra.mxu3 %vm752_vm3, %v743_v49 }
 0x39b   :  { %v5048_v47 = vpop.f32.mrf.mxu1 }
 0x39e   :  { %1064 = vmatmul.f32.gmra.mxu1 %v3743_v50 }
 0x3a1   :  { %v746_v14 = vpop.f32.mrf.mxu2 }
 0x3a2   :  { %3710 = vmatmul.msk.f32.gmra.mxu3 %vm752_vm3, %v746_v14 }
 0x3a3   :  { %v1020_v17 = vpop.f32.mrf.mxu1 }
 0x3a4   :  { %3747 = vmatmul.msk.f32.vlgmr.msrb.gmra.mxu2 %vm752_vm3, %v1020_v17  ;;  %v3765_v17 = vld [vmem:[%s6227_s3 + $0x190] sm:$0xff] }
 0x3aa   :  { %3712 = vmatmul.msk.f32.vlgmr.msrb.gmra.mxu3 %vm752_vm3, %v4926_v0 }
 0x3ab   :  { %v1023_v45 = vpop.f32.mrf.mxu1  ;;  %3816 = vmatpush.msk.msrb.mxu3 %vm801_vm2, %v3815_v8 }
 0x3ac   :  { %3748 = vmatmul.msk.f32.gmra.mxu2 %vm752_vm3, %v1023_v45  ;;  %v3801_v45 = vld [vmem:[%s6227_s3 + $0x218] sm:$0xff] }
 0x3ad   :  { %v5058_v20 = vpop.f32.mrf.mxu3  ;;  %1571 = vmatpush.msrb.mxu3 %v3814_v31  ;;  %v3768_v31 = vld [vmem:[%s6227_s3 + $0x1a8] sm:$0xff] }
 0x3b2   :  { %3713 = vmatmul.msk.f32.gmra.mxu3 %vm752_vm3, %v4936_v43 }
 0x3b3   :  { %v1026_v32 = vpop.f32.mrf.mxu1 }
 0x3b4   :  { %3749 = vmatmul.msk.f32.gmra.mxu2 %vm752_vm3, %v1026_v32 }
 0x3b5   :  { %v5063_v41 = vpop.f32.mrf.mxu3 }
 0x3ba   :  { %3714 = vmatmul.msk.f32.gmra.mxu3 %vm752_vm3, %v4949_v62 }
 0x3bb   :  { %v1029_v21 = vpop.f32.mrf.mxu1 }
 0x3bc   :  { %3750 = vmatmul.msk.f32.gmra.mxu2 %vm752_vm3, %v1029_v21 }
 0x3bd   :  { %v5068_v0 = vpop.f32.mrf.mxu3 }
 0x3c2   :  { %3715 = vmatmul.msk.f32.gmra.mxu3 %vm752_vm3, %v4963_v30 }
 0x3c3   :  { %v1032_v60 = vpop.f32.mrf.mxu1 }
 0x3c4   :  { %3751 = vmatmul.msk.f32.gmra.mxu2 %vm752_vm3, %v1032_v60  ;;  %v3766_v60 = vld [vmem:[%s6227_s3 + $0x198] sm:$0xff] }
 0x3c5   :  { %v5073_v43 = vpop.f32.mrf.mxu3 }
 0x3ca   :  { %3716 = vmatmul.msk.f32.gmra.mxu3 %vm752_vm3, %v4977_v37 }
 0x3cb   :  { %v1035_v54 = vpop.f32.mrf.mxu1 }
 0x3cc   :  { %3752 = vmatmul.msk.f32.gmra.mxu2 %vm752_vm3, %v1035_v54  ;;  %v3802_v54 = vld [vmem:[%s6227_s3 + $0x220] sm:$0xff] }
 0x3cd   :  { %v5078_v62 = vpop.f32.mrf.mxu3 }
 0x3d2   :  { %3717 = vmatmul.msk.f32.gmra.mxu3 %vm752_vm3, %v4988_v5 }
 0x3d3   :  { %v1038_v25 = vpop.f32.mrf.mxu1 }
 0x3d4   :  { %3753 = vmatmul.msk.f32.gmra.mxu2 %vm752_vm3, %v1038_v25 }
 0x3d5   :  { %v5083_v30 = vpop.f32.mrf.mxu3 }
 0x3da   :  { %3718 = vmatmul.msk.f32.gmra.mxu3 %vm752_vm3, %v4994_v28 }
 0x3db   :  { %v1041_v35 = vpop.f32.mrf.mxu1 }
 0x3dc   :  { %3754 = vmatmul.msk.f32.gmra.mxu2 %vm752_vm3, %v1041_v35 }
 0x3dd   :  { %v5088_v37 = vpop.f32.mrf.mxu3 }
 0x3e2   :  { %3719 = vmatmul.msk.f32.gmra.mxu3 %vm752_vm3, %v5000_v29 }
 0x3e3   :  { %v1044_v44 = vpop.f32.mrf.mxu1 }
 0x3e4   :  { %3755 = vmatmul.msk.f32.gmra.mxu2 %vm752_vm3, %v1044_v44 }
 0x3e5   :  { %v5093_v5 = vpop.f32.mrf.mxu3 }
 0x3ea   :  { %3720 = vmatmul.msk.f32.gmra.mxu3 %vm752_vm3, %v5006_v42 }
 0x3eb   :  { %v1047_v24 = vpop.f32.mrf.mxu1 }
 0x3ec   :  { %3756 = vmatmul.msk.f32.gmra.mxu2 %vm752_vm3, %v1047_v24  ;;  %v3767_v24 = vld [vmem:[%s6227_s3 + $0x1a0] sm:$0xff] }
 0x3ed   :  { %v5098_v28 = vpop.f32.mrf.mxu3 }
 0x3f2   :  { %3721 = vmatmul.msk.f32.gmra.mxu3 %vm752_vm3, %v5012_v63 }
 0x3f3   :  { %v1050_v23 = vpop.f32.mrf.mxu1 }
 0x3f4   :  { %3757 = vmatmul.msk.f32.gmra.mxu2 %vm752_vm3, %v1050_v23  ;;  %v3803_v23 = vld [vmem:[%s6227_s3 + $0x228] sm:$0xff] }
 0x3f5   :  { %v5103_v58 = vpop.f32.mrf.mxu3 }
 0x3fa   :  { %3722 = vmatmul.msk.f32.gmra.mxu3 %vm752_vm3, %v5018_v6 }
 0x3fb   :  { %v1053_v29 = vpop.f32.mrf.mxu1 }
 0x3fc   :  { %3758 = vmatmul.msk.f32.gmra.mxu2 %vm752_vm3, %v1053_v29 }
 0x3fd   :  { %v5108_v56 = vpop.f32.mrf.mxu3 }
 0x402   :  { %3723 = vmatmul.msk.f32.gmra.mxu3 %vm752_vm3, %v5024_v59 }
 0x403   :  { %v1056_v33 = vpop.f32.mrf.mxu1 }
 0x404   :  { %3759 = vmatmul.msk.f32.gmra.mxu2 %vm752_vm3, %v1056_v33 }
 0x405   :  { %v5113_v42 = vpop.f32.mrf.mxu3 }
 0x40a   :  { %3724 = vmatmul.msk.f32.gmra.mxu3 %vm752_vm3, %v5030_v4 }
 0x40b   :  { %v1059_v63 = vpop.f32.mrf.mxu1 }
 0x40c   :  { %3760 = vmatmul.msk.f32.gmra.mxu2 %vm752_vm3, %v1059_v63  ;;  %v3804_v63 = vld [vmem:[%s6227_s3 + $0x230] sm:$0xff] }
 0x40d   :  { %v5125_v26 = vpop.f32.mrf.mxu3 }
 0x412   :  { %3725 = vmatmul.msk.f32.gmra.mxu3 %vm752_vm3, %v5036_v18 }
 0x413   :  { %v1062_v6 = vpop.f32.mrf.mxu1 }
 0x414   :  { %3761 = vmatmul.msk.f32.gmra.mxu2 %vm752_vm3, %v1062_v6 }
 0x415   :  { %v5134_v57 = vpop.f32.mrf.mxu3 }
 0x41a   :  { %3726 = vmatmul.msk.f32.gmra.mxu3 %vm752_vm3, %v5042_v2  ;;  %v3764_v2 = vld [vmem:[%s6227_s3 + $0x188] sm:$0xff] }
 0x41b   :  { %v1065_v55 = vpop.f32.mrf.mxu1 }
 0x41c   :  { %3762 = vmatmul.msk.f32.gmra.mxu2 %vm752_vm3, %v1065_v55 }
 0x41d   :  { %v5139_v59 = vpop.f32.mrf.mxu3 }
 0x422   :  { %3727 = vmatmul.msk.f32.gmra.mxu3 %vm752_vm3, %v5048_v47 }
 0x424   :  { %1453 = vmatmul.f32.vlgmr.msra.gmra.mxu2 %v3798_v7 }
 0x425   :  { %v5146_v38 = vpop.f32.mrf.mxu3 }
 0x427   :  { %v1139_v4 = vpop.f32.mrf.mxu2 }
 0x42a   :  { %1236 = vmatmul.f32.vlgmr.msra.gmra.mxu3 %v3763_v16 }
 0x42b   :  { %1871 = vmatpush.msra.mxu3 %v4628_v1 }
 0x42c   :  { %1456 = vmatmul.f32.gmra.mxu2 %v3799_v53 }
 0x42d   :  { %1872 = vmatpush.msra.mxu3 %v4637_v3  ;;  %v938_v18 = vpop.f32.mrf.mxu3 }
 0x42e   :  { %v939_v13 = vadd.f32 %v938_v18, %v5058_v20 }
 0x42f   :  { %v1142_v36 = vpop.f32.mrf.mxu2  ;;  %1873 = vmatpush.msra.mxu3 %v4648_v15 }
 0x430   :  { %v5164_v49 = vadd.f32 %v1139_v4, %v939_v13  ;;  %v3805_v4 = vld [vmem:[%s6227_s3 + $0x238] sm:$0xff] }
 0x431   :  { %1874 = vmatpush.msra.mxu3 %v4660_v11 }
 0x432   :  { %1239 = vmatmul.f32.gmra.mxu3 %v3764_v2 }
 0x433   :  { %1875 = vmatpush.msra.mxu3 %v4672_v9 }
 0x434   :  { %1459 = vmatmul.f32.gmra.mxu2 %v3800_v48 }
 0x435   :  { %1876 = vmatpush.msra.mxu3 %v4684_v46  ;;  %v941_v47 = vpop.f32.mrf.mxu3 }
 0x436   :  { %v942_v50 = vadd.f32 %v941_v47, %v5063_v41 }
 0x437   :  { %v1145_v14 = vpop.f32.mrf.mxu2  ;;  %1877 = vmatpush.msra.mxu3 %v4696_v52 }
 0x438   :  { %v5177_v20 = vadd.f32 %v1142_v36, %v942_v50  ;;  %v3806_v36 = vld [vmem:[%s6227_s3 + $0x240] sm:$0xff] }
 0x439   :  { %1878 = vmatpush.msra.mxu3 %v4708_v10 }
 0x43a   :  { %1242 = vmatmul.f32.gmra.mxu3 %v3765_v17 }
 0x43b   :  { %1879 = vmatpush.msra.mxu3 %v4720_v61 }
 0x43c   :  { %1462 = vmatmul.f32.gmra.mxu2 %v3801_v45 }
 0x43d   :  { %1880 = vmatpush.msra.mxu3 %v4732_v51  ;;  %v944_v32 = vpop.f32.mrf.mxu3 }
 0x43e   :  { %v945_v41 = vadd.f32 %v944_v32, %v5068_v0 }
 0x43f   :  { %v1148_v21 = vpop.f32.mrf.mxu2  ;;  %1881 = vmatpush.msra.mxu3 %v4742_v34 }
 0x440   :  { %v5190_v25 = vadd.f32 %v1145_v14, %v945_v41  ;;  %v3807_v14 = vld [vmem:[%s6227_s3 + $0x248] sm:$0xff]  ;;  %v3808_v41 = vld [vmem:[%s6227_s3 + $0x250] sm:$0xff] }
 0x441   :  { %1882 = vmatpush.msra.mxu3 %v4748_v22 }
 0x442   :  { %1245 = vmatmul.f32.gmra.mxu3 %v3766_v60 }
 0x443   :  { %1883 = vmatpush.msra.mxu3 %v4752_v27 }
 0x444   :  { %1465 = vmatmul.f32.gmra.mxu2 %v3802_v54  ;;  %v3773_v54 = vld [vmem:[%s6227_s3 + $0x1d0] sm:$0xff] }
 0x445   :  { %1884 = vmatpush.msra.mxu3 %v4756_v39  ;;  %v947_v0 = vpop.f32.mrf.mxu3 }
 0x446   :  { %v948_v35 = vadd.f32 %v947_v0, %v5073_v43  ;;  %v3809_v0 = vld [vmem:[%s6227_s3 + $0x258] sm:$0xff] }
 0x447   :  { %v1151_v44 = vpop.f32.mrf.mxu2  ;;  %1885 = vmatpush.msra.mxu3 %v4760_v19 }
 0x448   :  { %v5203_v29 = vadd.f32 %v1148_v21, %v948_v35 }
 0x449   :  { %1886 = vmatpush.msra.mxu3 %v4764_v12 }
 0x44a   :  { %1248 = vmatmul.f32.gmra.mxu3 %v3767_v24  ;;  %v3774_v24 = vld [vmem:[%s6227_s3 + $0x1d8] sm:$0xff] }
 0x44c   :  { %1468 = vmatmul.f32.gmra.mxu2 %v3803_v23  ;;  %v3810_v23 = vld [vmem:[%s6227_s3 + $0x260] sm:$0xff] }
 0x44d   :  { %v950_v33 = vpop.f32.mrf.mxu3 }
 0x44e   :  { %v951_v43 = vadd.f32 %v950_v33, %v5078_v62  ;;  %v3769_v62 = vld [vmem:[%s6227_s3 + $0x1b0] sm:$0xff] }
 0x44f   :  { %v1154_v8 = vpop.f32.mrf.mxu2 }
 0x450   :  { %v5213_v40 = vadd.f32 %v1151_v44, %v951_v43 }
 0x452   :  { %1251 = vmatmul.f32.gmra.mxu3 %v3768_v31  ;;  %v3811_v31 = vld [vmem:[%s6227_s3 + $0x268] sm:$0xff] }
 0x454   :  { %1471 = vmatmul.f32.gmra.mxu2 %v3804_v63 }
 0x455   :  { %v953_v6 = vpop.f32.mrf.mxu3 }
 0x456   :  { %v954_v55 = vadd.f32 %v953_v6, %v5083_v30  ;;  %v3770_v30 = vld [vmem:[%s6227_s3 + $0x1b8] sm:$0xff] }
 0x457   :  { %v1157_v7 = vpop.f32.mrf.mxu2 }
 0x458   :  { %v5222_v16 = vadd.f32 %v1154_v8, %v954_v55  ;;  %v3775_v8 = vld [vmem:[%s6227_s3 + $0x1e0] sm:$0xff]  ;;  %v3776_v55 = vld [vmem:[%s6227_s3 + $0x1e8] sm:$0xff] }
 0x45a   :  { %1254 = vmatmul.f32.gmra.mxu3 %v3769_v62 }
 0x45c   :  { %1474 = vmatmul.f32.gmra.mxu2 %v3805_v4 }
 0x45d   :  { %v956_v53 = vpop.f32.mrf.mxu3 }
 0x45e   :  { %v957_v18 = vadd.f32 %v956_v53, %v5088_v37  ;;  %v3771_v37 = vld [vmem:[%s6227_s3 + $0x1c0] sm:$0xff]  ;;  %v3777_v53 = vld [vmem:[%s6227_s3 + $0x1f0] sm:$0xff] }
 0x45f   :  { %v1160_v13 = vpop.f32.mrf.mxu2 }
 0x460   :  { %v5231_v2 = vadd.f32 %v1157_v7, %v957_v18  ;;  %v3812_v7 = vld [vmem:[%s6227_s3 + $0x270] sm:$0xff]  ;;  %v3813_v18 = vld [vmem:[%s6227_s3 + $0x278] sm:$0xff] }
 0x462   :  { %1257 = vmatmul.f32.gmra.mxu3 %v3770_v30 }
 0x464   :  { %1477 = vmatmul.f32.gmra.mxu2 %v3806_v36  ;;  %v3778_v36 = vld [vmem:[%s6227_s3 + $0x1f8] sm:$0xff] }
 0x465   :  { %v959_v48 = vpop.f32.mrf.mxu3 }
 0x466   :  { %v960_v47 = vadd.f32 %v959_v48, %v5093_v5  ;;  %v3772_v5 = vld [vmem:[%s6227_s3 + $0x1c8] sm:$0xff] }
 0x467   :  { %v5234_v50 = vpop.f32.mrf.mxu2 }
 0x468   :  { %v5242_v17 = vadd.f32 %v1160_v13, %v960_v47 }
 0x46a   :  { %1260 = vmatmul.f32.gmra.mxu3 %v3771_v37 }
 0x46c   :  { %1480 = vmatmul.f32.gmra.mxu2 %v3807_v14 }
 0x46d   :  { %v5244_v45 = vpop.f32.mrf.mxu3 }
 0x46f   :  { %v5246_v32 = vpop.f32.mrf.mxu2 }
 0x472   :  { %1263 = vmatmul.f32.gmra.mxu3 %v3772_v5 }
 0x474   :  { %1483 = vmatmul.f32.gmra.mxu2 %v3808_v41 }
 0x475   :  { %v5254_v21 = vpop.f32.mrf.mxu3 }
 0x477   :  { %v5256_v60 = vpop.f32.mrf.mxu2 }
 0x47a   :  { %1266 = vmatmul.f32.gmra.mxu3 %v3773_v54 }
 0x47c   :  { %1486 = vmatmul.f32.gmra.mxu2 %v3809_v0 }
 0x47d   :  { %v5264_v35 = vpop.f32.mrf.mxu3 }
 0x47f   :  { %v5266_v44 = vpop.f32.mrf.mxu2 }
 0x482   :  { %1269 = vmatmul.f32.gmra.mxu3 %v3774_v24 }
 0x484   :  { %1489 = vmatmul.f32.gmra.mxu2 %v3810_v23 }
 0x485   :  { %v5274_v33 = vpop.f32.mrf.mxu3 }
 0x487   :  { %v5276_v43 = vpop.f32.mrf.mxu2 }
 0x48a   :  { %1272 = vmatmul.f32.gmra.mxu3 %v3775_v8 }
 0x48c   :  { %1492 = vmatmul.f32.gmra.mxu2 %v3811_v31 }
 0x48d   :  { %v5284_v63 = vpop.f32.mrf.mxu3 }
 0x48f   :  { %v5286_v6 = vpop.f32.mrf.mxu2 }
 0x492   :  { %1275 = vmatmul.f32.gmra.mxu3 %v3776_v55  ;;  %v3884_v55 = vld [vmem:[%s6228_s4 + $0x60] sm:$0xff] }
 0x493   :  { %2005 = vmatpush.msrb.mxu0 %v3884_v55 }
 0x494   :  { %1495 = vmatmul.f32.gmra.mxu2 %v3812_v7 }
 0x495   :  { %v5294_v62 = vpop.f32.mrf.mxu3 }
 0x497   :  { %v5296_v4 = vpop.f32.mrf.mxu2 }
 0x49a   :  { %1278 = vmatmul.f32.gmra.mxu3 %v3777_v53 }
 0x49c   :  { %1498 = vmatmul.f32.gmra.mxu2 %v3813_v18 }
 0x49d   :  { %v5304_v13 = vpop.f32.mrf.mxu3 }
 0x49f   :  { %v5306_v30 = vpop.f32.mrf.mxu2 }
 0x4a2   :  { %1281 = vmatmul.f32.gmra.mxu3 %v3778_v36 }
 0x4a5   :  { %v5311_v48 = vpop.f32.mrf.mxu3 }
 0x4a7   :  { %v1454_v47 = vpop.f32.mrf.mxu2 }
 0x4aa   :  { %3817 = vmatmul.msk.f32.vlgmr.msrb.gmra.mxu3 %vm752_vm3, %v1454_v47 }
 0x4ab   :  { %2305 = vmatpush.msrb.mxu3 %v4628_v1 }
 0x4ad   :  { %2306 = vmatpush.msrb.mxu3 %v4637_v3  ;;  %v1237_v37 = vpop.f32.mrf.mxu3 }
 0x4ae   :  { %3782 = vmatmul.msk.f32.vlgmr.msra.gmra.mxu1 %vm752_vm3, %v1237_v37  ;;  %v3868_v37 = vld [vmem:[%s6227_s3 + $0x300] sm:$0xff] }
 0x4af   :  { %v1457_v14 = vpop.f32.mrf.mxu2  ;;  %2088 = vmatpush.msra.mxu1 %v4628_v1  ;;  %2307 = vmatpush.msrb.mxu3 %v4648_v15 }
 0x4b1   :  { %2089 = vmatpush.msra.mxu1 %v4637_v3  ;;  %2308 = vmatpush.msrb.mxu3 %v4660_v11 }
 0x4b2   :  { %3818 = vmatmul.msk.f32.gmra.mxu3 %vm752_vm3, %v1457_v14 }
 0x4b3   :  { %2090 = vmatpush.msra.mxu1 %v4648_v15  ;;  %2309 = vmatpush.msrb.mxu3 %v4672_v9 }
 0x4b5   :  { %2091 = vmatpush.msra.mxu1 %v4660_v11  ;;  %2310 = vmatpush.msrb.mxu3 %v4684_v46  ;;  %v1240_v5 = vpop.f32.mrf.mxu3 }
 0x4b6   :  { %3783 = vmatmul.msk.f32.gmra.mxu1 %vm752_vm3, %v1240_v5  ;;  %v3833_v5 = vld [vmem:[%s6227_s3 + $0x280] sm:$0xff] }
 0x4b7   :  { %v1460_v1 = vpop.f32.mrf.mxu2  ;;  %2092 = vmatpush.msra.mxu1 %v4672_v9  ;;  %2311 = vmatpush.msrb.mxu3 %v4696_v52 }
 0x4b9   :  { %2093 = vmatpush.msra.mxu1 %v4684_v46  ;;  %2312 = vmatpush.msrb.mxu3 %v4708_v10 }
 0x4ba   :  { %3819 = vmatmul.msk.f32.gmra.mxu3 %vm752_vm3, %v1460_v1 }
 0x4bb   :  { %2094 = vmatpush.msra.mxu1 %v4696_v52  ;;  %2313 = vmatpush.msrb.mxu3 %v4720_v61 }
 0x4bd   :  { %2095 = vmatpush.msra.mxu1 %v4708_v10  ;;  %2314 = vmatpush.msrb.mxu3 %v4732_v51  ;;  %v1243_v3 = vpop.f32.mrf.mxu3 }
 0x4be   :  { %3784 = vmatmul.msk.f32.gmra.mxu1 %vm752_vm3, %v1243_v3 }
 0x4bf   :  { %v1463_v15 = vpop.f32.mrf.mxu2  ;;  %2096 = vmatpush.msra.mxu1 %v4720_v61  ;;  %2315 = vmatpush.msrb.mxu3 %v4742_v34 }
 0x4c1   :  { %2097 = vmatpush.msra.mxu1 %v4732_v51  ;;  %2316 = vmatpush.msrb.mxu3 %v4748_v22 }
 0x4c2   :  { %3820 = vmatmul.msk.f32.gmra.mxu3 %vm752_vm3, %v1463_v15 }
 0x4c3   :  { %2098 = vmatpush.msra.mxu1 %v4742_v34  ;;  %2317 = vmatpush.msrb.mxu3 %v4752_v27 }
 0x4c5   :  { %2099 = vmatpush.msra.mxu1 %v4748_v22  ;;  %2318 = vmatpush.msrb.mxu3 %v4756_v39  ;;  %v1246_v11 = vpop.f32.mrf.mxu3 }
 0x4c6   :  { %3785 = vmatmul.msk.f32.gmra.mxu1 %vm752_vm3, %v1246_v11  ;;  %v3869_v11 = vld [vmem:[%s6227_s3 + $0x308] sm:$0xff] }
 0x4c7   :  { %v1466_v9 = vpop.f32.mrf.mxu2  ;;  %2100 = vmatpush.msra.mxu1 %v4752_v27  ;;  %2319 = vmatpush.msrb.mxu3 %v4760_v19 }
 0x4c9   :  { %2101 = vmatpush.msra.mxu1 %v4756_v39  ;;  %2320 = vmatpush.msrb.mxu3 %v4764_v12 }
 0x4ca   :  { %3821 = vmatmul.msk.f32.gmra.mxu3 %vm752_vm3, %v1466_v9 }
 0x4cb   :  { %2102 = vmatpush.msra.mxu1 %v4760_v19 }
 0x4cd   :  { %2103 = vmatpush.msra.mxu1 %v4764_v12  ;;  %v1249_v46 = vpop.f32.mrf.mxu3 }
 0x4ce   :  { %3786 = vmatmul.msk.f32.gmra.mxu1 %vm752_vm3, %v1249_v46  ;;  %v3834_v46 = vld [vmem:[%s6227_s3 + $0x288] sm:$0xff] }
 0x4cf   :  { %v1469_v52 = vpop.f32.mrf.mxu2 }
 0x4d2   :  { %3822 = vmatmul.msk.f32.gmra.mxu3 %vm752_vm3, %v1469_v52 }
 0x4d5   :  { %v1252_v10 = vpop.f32.mrf.mxu3 }
 0x4d6   :  { %3787 = vmatmul.msk.f32.gmra.mxu1 %vm752_vm3, %v1252_v10 }
 0x4d7   :  { %v1472_v61 = vpop.f32.mrf.mxu2 }
 0x4da   :  { %3823 = vmatmul.msk.f32.gmra.mxu3 %vm752_vm3, %v1472_v61 }
 0x4dd   :  { %v1255_v51 = vpop.f32.mrf.mxu3 }
 0x4de   :  { %3788 = vmatmul.msk.f32.gmra.mxu1 %vm752_vm3, %v1255_v51 }
 0x4df   :  { %v1475_v34 = vpop.f32.mrf.mxu2 }
 0x4e2   :  { %3824 = vmatmul.msk.f32.gmra.mxu3 %vm752_vm3, %v1475_v34  ;;  %v3835_v34 = vld [vmem:[%s6227_s3 + $0x290] sm:$0xff] }
 0x4e5   :  { %v1258_v22 = vpop.f32.mrf.mxu3 }
 0x4e6   :  { %3789 = vmatmul.msk.f32.gmra.mxu1 %vm752_vm3, %v1258_v22 }
 0x4e7   :  { %v1478_v27 = vpop.f32.mrf.mxu2 }
 0x4ea   :  { %3825 = vmatmul.msk.f32.gmra.mxu3 %vm752_vm3, %v1478_v27 }
 0x4ed   :  { %v1261_v39 = vpop.f32.mrf.mxu3 }
 0x4ee   :  { %3790 = vmatmul.msk.f32.gmra.mxu1 %vm752_vm3, %v1261_v39 }
 0x4ef   :  { %v1481_v19 = vpop.f32.mrf.mxu2 }
 0x4f2   :  { %3826 = vmatmul.msk.f32.gmra.mxu3 %vm752_vm3, %v1481_v19 }
 0x4f5   :  { %v1264_v12 = vpop.f32.mrf.mxu3 }
 0x4f6   :  { %3791 = vmatmul.msk.f32.gmra.mxu1 %vm752_vm3, %v1264_v12  ;;  %v3836_v12 = vld [vmem:[%s6227_s3 + $0x298] sm:$0xff] }
 0x4f7   :  { %v1484_v41 = vpop.f32.mrf.mxu2 }
 0x4fa   :  { %3827 = vmatmul.msk.f32.gmra.mxu3 %vm752_vm3, %v1484_v41 }
 0x4fd   :  { %v1267_v54 = vpop.f32.mrf.mxu3 }
 0x4fe   :  { %3792 = vmatmul.msk.f32.gmra.mxu1 %vm752_vm3, %v1267_v54 }
 0x4ff   :  { %v1487_v0 = vpop.f32.mrf.mxu2 }
 0x502   :  { %3828 = vmatmul.msk.f32.gmra.mxu3 %vm752_vm3, %v1487_v0 }
 0x505   :  { %v1270_v24 = vpop.f32.mrf.mxu3 }
 0x506   :  { %3793 = vmatmul.msk.f32.gmra.mxu1 %vm752_vm3, %v1270_v24 }
 0x507   :  { %v1490_v23 = vpop.f32.mrf.mxu2 }
 0x50a   :  { %3829 = vmatmul.msk.f32.gmra.mxu3 %vm752_vm3, %v1490_v23  ;;  %v3837_v23 = vld [vmem:[%s6227_s3 + $0x2a0] sm:$0xff] }
 0x50d   :  { %v1273_v8 = vpop.f32.mrf.mxu3 }
 0x50e   :  { %3794 = vmatmul.msk.f32.gmra.mxu1 %vm752_vm3, %v1273_v8 }
 0x50f   :  { %v1493_v31 = vpop.f32.mrf.mxu2 }
 0x512   :  { %3830 = vmatmul.msk.f32.gmra.mxu3 %vm752_vm3, %v1493_v31 }
 0x515   :  { %v1276_v7 = vpop.f32.mrf.mxu3 }
 0x516   :  { %3795 = vmatmul.msk.f32.gmra.mxu1 %vm752_vm3, %v1276_v7 }
 0x517   :  { %v1496_v53 = vpop.f32.mrf.mxu2 }
 0x51a   :  { %3831 = vmatmul.msk.f32.gmra.mxu3 %vm752_vm3, %v1496_v53  ;;  %v3838_v53 = vld [vmem:[%s6227_s3 + $0x2a8] sm:$0xff] }
 0x51d   :  { %v1279_v18 = vpop.f32.mrf.mxu3 }
 0x51e   :  { %3796 = vmatmul.msk.f32.gmra.mxu1 %vm752_vm3, %v1279_v18 }
 0x51f   :  { %v1499_v36 = vpop.f32.mrf.mxu2 }
 0x522   :  { %3832 = vmatmul.msk.f32.gmra.mxu3 %vm752_vm3, %v1499_v36 }
 0x525   :  { %v1282_v47 = vpop.f32.mrf.mxu3 }
 0x526   :  { %3797 = vmatmul.msk.f32.gmra.mxu1 %vm752_vm3, %v1282_v47 }
 0x52a   :  { %1887 = vmatmul.f32.vlgmr.msra.gmra.mxu3 %v3868_v37 }
 0x52b   :  { %v1356_v14 = vpop.f32.mrf.mxu1 }
 0x52c   :  { %v1404_v1 = vadd.f32 %v1356_v14, %v5164_v49  ;;  %v3870_v49 = vld [vmem:[%s6227_s3 + $0x310] sm:$0xff] }
 0x52d   :  { %v1573_v3 = vpop.f32.mrf.mxu3  ;;  %v3839_v14 = vld [vmem:[%s6227_s3 + $0x2b0] sm:$0xff] }
 0x52e   :  { %v5387_v15 = vadd.f32 %v1573_v3, %v1404_v1  ;;  %1670 = vmatmul.f32.vlgmr.msrb.gmra.mxu1 %v3833_v5 }
 0x532   :  { %1890 = vmatmul.f32.gmra.mxu3 %v3869_v11 }
 0x533   :  { %v1359_v9 = vpop.f32.mrf.mxu1 }
 0x534   :  { %v1405_v52 = vadd.f32 %v1359_v9, %v5177_v20  ;;  %v3871_v20 = vld [vmem:[%s6227_s3 + $0x318] sm:$0xff] }
 0x535   :  { %v1576_v10 = vpop.f32.mrf.mxu3  ;;  %v3840_v9 = vld [vmem:[%s6227_s3 + $0x2b8] sm:$0xff] }
 0x536   :  { %v5396_v61 = vadd.f32 %v1576_v10, %v1405_v52  ;;  %1673 = vmatmul.f32.gmra.mxu1 %v3834_v46 }
 0x53a   :  { %1893 = vmatmul.f32.gmra.mxu3 %v3870_v49  ;;  %v3876_v49 = vld [vmem:[%s6227_s3 + $0x340] sm:$0xff] }
 0x53b   :  { %v1362_v51 = vpop.f32.mrf.mxu1 }
 0x53c   :  { %v1406_v22 = vadd.f32 %v1362_v51, %v5190_v25  ;;  %v3872_v25 = vld [vmem:[%s6227_s3 + $0x320] sm:$0xff] }
 0x53d   :  { %v1579_v27 = vpop.f32.mrf.mxu3 }
 0x53e   :  { %v5405_v39 = vadd.f32 %v1579_v27, %v1406_v22  ;;  %1676 = vmatmul.f32.gmra.mxu1 %v3835_v34  ;;  %v3841_v22 = vld [vmem:[%s6227_s3 + $0x2c0] sm:$0xff] }
 0x542   :  { %1896 = vmatmul.f32.gmra.mxu3 %v3871_v20  ;;  %v3877_v20 = vld [vmem:[%s6227_s3 + $0x348] sm:$0xff] }
 0x543   :  { %v1365_v19 = vpop.f32.mrf.mxu1 }
 0x544   :  { %v1407_v41 = vadd.f32 %v1365_v19, %v5203_v29  ;;  %v3873_v29 = vld [vmem:[%s6227_s3 + $0x328] sm:$0xff] }
 0x545   :  { %v1582_v54 = vpop.f32.mrf.mxu3 }
 0x546   :  { %v5414_v0 = vadd.f32 %v1582_v54, %v1407_v41  ;;  %1679 = vmatmul.f32.gmra.mxu1 %v3836_v12  ;;  %v3842_v12 = vld [vmem:[%s6227_s3 + $0x2c8] sm:$0xff] }
 0x54a   :  { %1899 = vmatmul.f32.gmra.mxu3 %v3872_v25  ;;  %v3878_v25 = vld [vmem:[%s6227_s3 + $0x350] sm:$0xff] }
 0x54b   :  { %v1368_v24 = vpop.f32.mrf.mxu1 }
 0x54c   :  { %v1408_v8 = vadd.f32 %v1368_v24, %v5213_v40  ;;  %v3874_v40 = vld [vmem:[%s6227_s3 + $0x330] sm:$0xff] }
 0x54d   :  { %v1585_v31 = vpop.f32.mrf.mxu3 }
 0x54e   :  { %v5423_v55 = vadd.f32 %v1585_v31, %v1408_v8  ;;  %1682 = vmatmul.f32.gmra.mxu1 %v3837_v23  ;;  %v3843_v23 = vld [vmem:[%s6227_s3 + $0x2d0] sm:$0xff] }
 0x552   :  { %1902 = vmatmul.f32.gmra.mxu3 %v3873_v29  ;;  %v3879_v29 = vld [vmem:[%s6227_s3 + $0x358] sm:$0xff] }
 0x553   :  { %v1371_v7 = vpop.f32.mrf.mxu1 }
 0x554   :  { %v1409_v18 = vadd.f32 %v1371_v7, %v5222_v16  ;;  %v3875_v16 = vld [vmem:[%s6227_s3 + $0x338] sm:$0xff] }
 0x555   :  { %v1588_v36 = vpop.f32.mrf.mxu3 }
 0x556   :  { %v5432_v47 = vadd.f32 %v1588_v36, %v1409_v18  ;;  %1685 = vmatmul.f32.gmra.mxu1 %v3838_v53  ;;  %v3844_v53 = vld [vmem:[%s6227_s3 + $0x2d8] sm:$0xff] }
 0x55a   :  { %1905 = vmatmul.f32.gmra.mxu3 %v3874_v40  ;;  %v3850_v40 = vld [vmem:[%s6228_s4 + $0x58] sm:$0xf] }
 0x55b   :  { %v1374_v37 = vpop.f32.mrf.mxu1  ;;  %3851 = vmatpush.msk.msrb.mxu2 %vm801_vm2, %v3850_v40 }
 0x55c   :  { %v1410_v5 = vadd.f32 %v1374_v37, %v5231_v2  ;;  %v963_v2 = vadd.f32 %v5244_v45, %v5098_v28  ;;  %v966_v28 = vadd.f32 %v5254_v21, %v5103_v58  ;;  %v969_v58 = vadd.f32 %v5264_v35, %v5108_v56 }
 0x55d   :  { %v1591_v1 = vpop.f32.mrf.mxu3  ;;  %v972_v56 = vadd.f32 %v5274_v33, %v5113_v42  ;;  %v975_v42 = vadd.f32 %v5284_v63, %v5125_v26  ;;  %v3845_v26 = vld [vmem:[%s6227_s3 + $0x2e0] sm:$0xff]  ;;  %v3849_v63 = vld [vmem:[%s6228_s4 + $0x50] sm:$0xff] }
 0x55e   :  { %v5441_v3 = vadd.f32 %v1591_v1, %v1410_v5  ;;  %1688 = vmatmul.f32.gmra.mxu1 %v3839_v14  ;;  %v1195_v51 = vadd.f32 %v5234_v50, %v963_v2  ;;  %v1196_v50 = vadd.f32 %v5246_v32, %v966_v28  ;;  %v1197_v32 = vadd.f32 %v5256_v60, %v969_v58  ;;  %v3883_v28 = vld [vmem:[%s6227_s3 + $0x378] sm:$0xff]  ;;  %v3939_v58 = vld [vmem:[%s6227_s3 + $0x408] sm:$0xff] }
 0x55f   :  { %v1198_v60 = vadd.f32 %v5266_v44, %v972_v56  ;;  %v3880_v44 = vld [vmem:[%s6227_s3 + $0x360] sm:$0xff]  ;;  %v1199_v37 = vadd.f32 %v5276_v43, %v975_v42  ;;  %1788 = vmatpush.msrb.mxu2 %v3849_v63  ;;  %v3881_v43 = vld [vmem:[%s6227_s3 + $0x368] sm:$0xff]  ;;  %v3944_v63 = vld [vmem:[%s6227_s3 + $0x430] sm:$0xff] }
 0x560   :  { %v3907_v42 = vld [vmem:[%s6227_s3 + $0x3a0] sm:$0xff] }
 0x562   :  { %1908 = vmatmul.f32.gmra.mxu3 %v3875_v16  ;;  %v978_v16 = vadd.f32 %v5294_v62, %v5134_v57  ;;  %v981_v57 = vadd.f32 %v5304_v13, %v5139_v59  ;;  %v984_v59 = vadd.f32 %v5311_v48, %v5146_v38  ;;  %v3938_v38 = vld [vmem:[%s6227_s3 + $0x400] sm:$0xff] }
 0x563   :  { %v1377_v11 = vpop.f32.mrf.mxu1 }
 0x564   :  { %v1411_v46 = vadd.f32 %v1377_v11, %v5242_v17 }
 0x565   :  { %v1594_v52 = vpop.f32.mrf.mxu3 }
 0x566   :  { %v5452_v10 = vadd.f32 %v1594_v52, %v1411_v46  ;;  %1691 = vmatmul.f32.gmra.mxu1 %v3840_v9  ;;  %v1200_v9 = vadd.f32 %v5286_v6, %v978_v16  ;;  %v3846_v52 = vld [vmem:[%s6227_s3 + $0x2e8] sm:$0xff]  ;;  %v1201_v6 = vadd.f32 %v5296_v4, %v981_v57  ;;  %v1202_v4 = vadd.f32 %v5306_v30, %v984_v59  ;;  %v3903_v30 = vld [vmem:[%s6227_s3 + $0x380] sm:$0xff] }
 0x567   :  { %v3911_v57 = vld [vmem:[%s6227_s3 + $0x3c0] sm:$0xff] }
 0x56a   :  { %1911 = vmatmul.f32.gmra.mxu3 %v3876_v49 }
 0x56b   :  { %v1380_v34 = vpop.f32.mrf.mxu1 }
 0x56c   :  { %v1412_v17 = vadd.f32 %v1380_v34, %v1195_v51  ;;  %v3882_v51 = vld [vmem:[%s6227_s3 + $0x370] sm:$0xff] }
 0x56d   :  { %v1597_v27 = vpop.f32.mrf.mxu3 }
 0x56e   :  { %v5463_v45 = vadd.f32 %v1597_v27, %v1412_v17  ;;  %1694 = vmatmul.f32.gmra.mxu1 %v3841_v22  ;;  %v3847_v22 = vld [vmem:[%s6227_s3 + $0x2f0] sm:$0xff] }
 0x572   :  { %1914 = vmatmul.f32.gmra.mxu3 %v3877_v20 }
 0x573   :  { %v1383_v19 = vpop.f32.mrf.mxu1 }
 0x574   :  { %v1413_v41 = vadd.f32 %v1383_v19, %v1196_v50  ;;  %v3848_v50 = vld [vmem:[%s6227_s3 + $0x2f8] sm:$0xff] }
 0x575   :  { %v1600_v54 = vpop.f32.mrf.mxu3 }
 0x576   :  { %v5474_v21 = vadd.f32 %v1600_v54, %v1413_v41  ;;  %1697 = vmatmul.f32.gmra.mxu1 %v3842_v12 }
 0x57a   :  { %1917 = vmatmul.f32.gmra.mxu3 %v3878_v25 }
 0x57b   :  { %v1386_v24 = vpop.f32.mrf.mxu1 }
 0x57c   :  { %v1414_v8 = vadd.f32 %v1386_v24, %v1197_v32  ;;  %v3904_v32 = vld [vmem:[%s6227_s3 + $0x388] sm:$0xff] }
 0x57d   :  { %v1603_v31 = vpop.f32.mrf.mxu3 }
 0x57e   :  { %v5485_v35 = vadd.f32 %v1603_v31, %v1414_v8  ;;  %1700 = vmatmul.f32.gmra.mxu1 %v3843_v23  ;;  %v3940_v23 = vld [vmem:[%s6227_s3 + $0x410] sm:$0xff] }
 0x57f   :  { %v3905_v31 = vld [vmem:[%s6227_s3 + $0x390] sm:$0xff] }
 0x582   :  { %1920 = vmatmul.f32.gmra.mxu3 %v3879_v29  ;;  %v3941_v29 = vld [vmem:[%s6227_s3 + $0x418] sm:$0xff] }
 0x583   :  { %v1389_v7 = vpop.f32.mrf.mxu1 }
 0x584   :  { %v1415_v18 = vadd.f32 %v1389_v7, %v1198_v60  ;;  %v3906_v7 = vld [vmem:[%s6227_s3 + $0x398] sm:$0xff] }
 0x585   :  { %v1606_v36 = vpop.f32.mrf.mxu3 }
 0x586   :  { %v5496_v33 = vadd.f32 %v1606_v36, %v1415_v18  ;;  %1703 = vmatmul.f32.gmra.mxu1 %v3844_v53  ;;  %v3942_v18 = vld [vmem:[%s6227_s3 + $0x420] sm:$0xff] }
 0x58a   :  { %1923 = vmatmul.f32.gmra.mxu3 %v3880_v44  ;;  %v3943_v44 = vld [vmem:[%s6227_s3 + $0x428] sm:$0xff] }
 0x58b   :  { %v1392_v14 = vpop.f32.mrf.mxu1 }
 0x58c   :  { %v1416_v5 = vadd.f32 %v1392_v14, %v1199_v37  ;;  %v3908_v14 = vld [vmem:[%s6227_s3 + $0x3a8] sm:$0xff] }
 0x58d   :  { %v1609_v1 = vpop.f32.mrf.mxu3 }
 0x58e   :  { %v5514_v11 = vadd.f32 %v1609_v1, %v1416_v5  ;;  %1706 = vmatmul.f32.gmra.mxu1 %v3845_v26  ;;  %v3909_v1 = vld [vmem:[%s6227_s3 + $0x3b0] sm:$0xff] }
 0x592   :  { %1926 = vmatmul.f32.gmra.mxu3 %v3881_v43  ;;  %v3945_v43 = vld [vmem:[%s6227_s3 + $0x438] sm:$0xff] }
 0x593   :  { %v1395_v46 = vpop.f32.mrf.mxu1 }
 0x594   :  { %v1417_v2 = vadd.f32 %v1395_v46, %v1200_v9  ;;  %v3910_v46 = vld [vmem:[%s6227_s3 + $0x3b8] sm:$0xff] }
 0x595   :  { %v1612_v49 = vpop.f32.mrf.mxu3 }
 0x596   :  { %v5525_v62 = vadd.f32 %v1612_v49, %v1417_v2  ;;  %1709 = vmatmul.f32.gmra.mxu1 %v3846_v52  ;;  %v3946_v2 = vld [vmem:[%s6227_s3 + $0x440] sm:$0xff] }
 0x59a   :  { %1929 = vmatmul.f32.gmra.mxu3 %v3882_v51 }
 0x59b   :  { %v1398_v34 = vpop.f32.mrf.mxu1 }
 0x59c   :  { %v1418_v17 = vadd.f32 %v1398_v34, %v1201_v6  ;;  %v3947_v6 = vld [vmem:[%s6227_s3 + $0x448] sm:$0xff] }
 0x59d   :  { %v1615_v27 = vpop.f32.mrf.mxu3 }
 0x59e   :  { %v5536_v13 = vadd.f32 %v1615_v27, %v1418_v17  ;;  %1712 = vmatmul.f32.gmra.mxu1 %v3847_v22  ;;  %v3912_v22 = vld [vmem:[%s6227_s3 + $0x3c8] sm:$0xff]  ;;  %v3948_v27 = vld [vmem:[%s6227_s3 + $0x450] sm:$0xff] }
 0x5a2   :  { %1932 = vmatmul.f32.gmra.mxu3 %v3883_v28  ;;  %v3913_v28 = vld [vmem:[%s6227_s3 + $0x3d0] sm:$0xff] }
 0x5a3   :  { %v1401_v20 = vpop.f32.mrf.mxu1 }
 0x5a4   :  { %v1419_v19 = vadd.f32 %v1401_v20, %v1202_v4  ;;  %v3949_v20 = vld [vmem:[%s6227_s3 + $0x458] sm:$0xff] }
 0x5a5   :  { %v1618_v12 = vpop.f32.mrf.mxu3 }
 0x5a6   :  { %v5545_v41 = vadd.f32 %v1618_v12, %v1419_v19  ;;  %1715 = vmatmul.f32.gmra.mxu1 %v3848_v50  ;;  %v3914_v19 = vld [vmem:[%s6227_s3 + $0x3d8] sm:$0xff] }
 0x5a7   :  { %v3920_v12 = vld [vmem:[%s6228_s4 + $0x78] sm:$0xf] }
 0x5a8   :  { %3921 = vmatpush.msk.msra.mxu2 %vm801_vm2, %v3920_v12 }
 0x5aa   :  { %2321 = vmatmul.f32.vlgmr.msrb.gmra.mxu3 %v3938_v38 }
 0x5ab   :  { %v1671_v48 = vpop.f32.mrf.mxu1 }
 0x5ac   :  { %3852 = vmatmul.msk.f32.vlgmr.msrb.gmra.mxu2 %vm752_vm3, %v1671_v48  ;;  %v3950_v48 = vld [vmem:[%s6227_s3 + $0x460] sm:$0xff] }
 0x5ad   :  { %v1888_v54 = vpop.f32.mrf.mxu3 }
 0x5ae   :  { %2104 = vmatmul.f32.vlgmr.msra.gmra.mxu1 %v3903_v30  ;;  %3887 = vmatmul.msk.f32.vlgmr.msrb.gmra.mxu0 %vm752_vm3, %v1888_v54  ;;  %v3915_v54 = vld [vmem:[%s6227_s3 + $0x3e0] sm:$0xff] }
 0x5b2   :  { %2324 = vmatmul.f32.gmra.mxu3 %v3939_v58  ;;  %v3919_v58 = vld [vmem:[%s6228_s4 + $0x70] sm:$0xff] }
 0x5b3   :  { %v1674_v25 = vpop.f32.mrf.mxu1  ;;  %2222 = vmatpush.msra.mxu2 %v3919_v58 }
 0x5b4   :  { %3853 = vmatmul.msk.f32.gmra.mxu2 %vm752_vm3, %v1674_v25  ;;  %v3955_v25 = vld [vmem:[%s6228_s4 + $0x88] sm:$0xf] }
 0x5b5   :  { %v1891_v24 = vpop.f32.mrf.mxu3  ;;  %3956 = vmatpush.msk.msra.mxu0 %vm801_vm2, %v3955_v25 }
 0x5b6   :  { %2107 = vmatmul.f32.gmra.mxu1 %v3904_v32  ;;  %3888 = vmatmul.msk.f32.gmra.mxu0 %vm752_vm3, %v1891_v24  ;;  %v3951_v24 = vld [vmem:[%s6227_s3 + $0x468] sm:$0xff] }
 0x5ba   :  { %2327 = vmatmul.f32.gmra.mxu3 %v3940_v23 }
 0x5bb   :  { %v1677_v8 = vpop.f32.mrf.mxu1 }
 0x5bc   :  { %3854 = vmatmul.msk.f32.gmra.mxu2 %vm752_vm3, %v1677_v8  ;;  %v3916_v8 = vld [vmem:[%s6227_s3 + $0x3e8] sm:$0xff] }
 0x5bd   :  { %v1894_v56 = vpop.f32.mrf.mxu3 }
 0x5be   :  { %2110 = vmatmul.f32.gmra.mxu1 %v3905_v31  ;;  %3889 = vmatmul.msk.f32.gmra.mxu0 %vm752_vm3, %v1894_v56  ;;  %v3954_v31 = vld [vmem:[%s6228_s4 + $0x80] sm:$0xff] }
 0x5bf   :  { %2439 = vmatpush.msra.mxu0 %v3954_v31 }
 0x5c2   :  { %2330 = vmatmul.f32.gmra.mxu3 %v3941_v29  ;;  %v3952_v29 = vld [vmem:[%s6227_s3 + $0x470] sm:$0xff] }
 0x5c3   :  { %v1680_v60 = vpop.f32.mrf.mxu1 }
 0x5c4   :  { %3855 = vmatmul.msk.f32.gmra.mxu2 %vm752_vm3, %v1680_v60 }
 0x5c5   :  { %v1897_v53 = vpop.f32.mrf.mxu3 }
 0x5c6   :  { %2113 = vmatmul.f32.gmra.mxu1 %v3906_v7  ;;  %3890 = vmatmul.msk.f32.gmra.mxu0 %vm752_vm3, %v1897_v53  ;;  %v3917_v7 = vld [vmem:[%s6227_s3 + $0x3f0] sm:$0xff] }
 0x5ca   :  { %2333 = vmatmul.f32.gmra.mxu3 %v3942_v18  ;;  %v3953_v18 = vld [vmem:[%s6227_s3 + $0x478] sm:$0xff] }
 0x5cb   :  { %v1683_v36 = vpop.f32.mrf.mxu1 }
 0x5cc   :  { %3856 = vmatmul.msk.f32.gmra.mxu2 %vm752_vm3, %v1683_v36 }
 0x5cd   :  { %v1900_v40 = vpop.f32.mrf.mxu3 }
 0x5ce   :  { %2116 = vmatmul.f32.gmra.mxu1 %v3907_v42  ;;  %3891 = vmatmul.msk.f32.gmra.mxu0 %vm752_vm3, %v1900_v40  ;;  %v3918_v42 = vld [vmem:[%s6227_s3 + $0x3f8] sm:$0xff] }
 0x5d2   :  { %2336 = vmatmul.f32.gmra.mxu3 %v3943_v44 }
 0x5d3   :  { %v1686_v37 = vpop.f32.mrf.mxu1 }
 0x5d4   :  { %3857 = vmatmul.msk.f32.gmra.mxu2 %vm752_vm3, %v1686_v37 }
 0x5d5   :  { %v1903_v26 = vpop.f32.mrf.mxu3 }
 0x5d6   :  { %2119 = vmatmul.f32.gmra.mxu1 %v3908_v14  ;;  %3892 = vmatmul.msk.f32.gmra.mxu0 %vm752_vm3, %v1903_v26 }
 0x5da   :  { %2339 = vmatmul.f32.gmra.mxu3 %v3944_v63 }
 0x5db   :  { %v1689_v5 = vpop.f32.mrf.mxu1 }
 0x5dc   :  { %3858 = vmatmul.msk.f32.gmra.mxu2 %vm752_vm3, %v1689_v5 }
 0x5dd   :  { %v1906_v16 = vpop.f32.mrf.mxu3 }
 0x5de   :  { %2122 = vmatmul.f32.gmra.mxu1 %v3909_v1  ;;  %3893 = vmatmul.msk.f32.gmra.mxu0 %vm752_vm3, %v1906_v16 }
 0x5e2   :  { %2342 = vmatmul.f32.gmra.mxu3 %v3945_v43 }
 0x5e3   :  { %v1692_v9 = vpop.f32.mrf.mxu1 }
 0x5e4   :  { %3859 = vmatmul.msk.f32.gmra.mxu2 %vm752_vm3, %v1692_v9 }
 0x5e5   :  { %v1909_v52 = vpop.f32.mrf.mxu3 }
 0x5e6   :  { %2125 = vmatmul.f32.gmra.mxu1 %v3910_v46  ;;  %3894 = vmatmul.msk.f32.gmra.mxu0 %vm752_vm3, %v1909_v52 }
 0x5ea   :  { %2345 = vmatmul.f32.gmra.mxu3 %v3946_v2 }
 0x5eb   :  { %v1695_v49 = vpop.f32.mrf.mxu1 }
 0x5ec   :  { %3860 = vmatmul.msk.f32.gmra.mxu2 %vm752_vm3, %v1695_v49 }
 0x5ed   :  { %v1912_v51 = vpop.f32.mrf.mxu3 }
 0x5ee   :  { %2128 = vmatmul.f32.gmra.mxu1 %v3911_v57  ;;  %3895 = vmatmul.msk.f32.gmra.mxu0 %vm752_vm3, %v1912_v51 }
 0x5f2   :  { %2348 = vmatmul.f32.gmra.mxu3 %v3947_v6 }
 0x5f3   :  { %v1698_v34 = vpop.f32.mrf.mxu1 }
 0x5f4   :  { %3861 = vmatmul.msk.f32.gmra.mxu2 %vm752_vm3, %v1698_v34 }
 0x5f5   :  { %v1915_v17 = vpop.f32.mrf.mxu3 }
 0x5f6   :  { %2131 = vmatmul.f32.gmra.mxu1 %v3912_v22  ;;  %3896 = vmatmul.msk.f32.gmra.mxu0 %vm752_vm3, %v1915_v17 }
 0x5fa   :  { %2351 = vmatmul.f32.gmra.mxu3 %v3948_v27 }
 0x5fb   :  { %v1701_v59 = vpop.f32.mrf.mxu1 }
 0x5fc   :  { %3862 = vmatmul.msk.f32.gmra.mxu2 %vm752_vm3, %v1701_v59 }
 0x5fd   :  { %v1918_v4 = vpop.f32.mrf.mxu3 }
 0x5fe   :  { %2134 = vmatmul.f32.gmra.mxu1 %v3913_v28  ;;  %3897 = vmatmul.msk.f32.gmra.mxu0 %vm752_vm3, %v1918_v4 }
 0x602   :  { %2354 = vmatmul.f32.gmra.mxu3 %v3949_v20 }
 0x603   :  { %v1704_v50 = vpop.f32.mrf.mxu1 }
 0x604   :  { %3863 = vmatmul.msk.f32.gmra.mxu2 %vm752_vm3, %v1704_v50 }
 0x605   :  { %v1921_v38 = vpop.f32.mrf.mxu3 }
 0x606   :  { %2137 = vmatmul.f32.gmra.mxu1 %v3914_v19  ;;  %3898 = vmatmul.msk.f32.gmra.mxu0 %vm752_vm3, %v1921_v38 }
 0x60a   :  { %2357 = vmatmul.f32.gmra.mxu3 %v3950_v48 }
 0x60b   :  { %v1707_v30 = vpop.f32.mrf.mxu1 }
 0x60c   :  { %3864 = vmatmul.msk.f32.gmra.mxu2 %vm752_vm3, %v1707_v30 }
 0x60d   :  { %v1924_v32 = vpop.f32.mrf.mxu3 }
 0x60e   :  { %2140 = vmatmul.f32.gmra.mxu1 %v3915_v54  ;;  %3899 = vmatmul.msk.f32.gmra.mxu0 %vm752_vm3, %v1924_v32 }
 0x612   :  { %2360 = vmatmul.f32.gmra.mxu3 %v3951_v24 }
 0x613   :  { %v1710_v23 = vpop.f32.mrf.mxu1 }
 0x614   :  { %3865 = vmatmul.msk.f32.gmra.mxu2 %vm752_vm3, %v1710_v23 }
 0x615   :  { %v1927_v56 = vpop.f32.mrf.mxu3 }
 0x616   :  { %2143 = vmatmul.f32.gmra.mxu1 %v3916_v8  ;;  %3900 = vmatmul.msk.f32.gmra.mxu0 %vm752_vm3, %v1927_v56 }
 0x61a   :  { %2363 = vmatmul.f32.gmra.mxu3 %v3952_v29 }
 0x61b   :  { %v1713_v60 = vpop.f32.mrf.mxu1 }
 0x61c   :  { %3866 = vmatmul.msk.f32.gmra.mxu2 %vm752_vm3, %v1713_v60 }
 0x61d   :  { %v1930_v53 = vpop.f32.mrf.mxu3 }
 0x61e   :  { %2146 = vmatmul.f32.gmra.mxu1 %v3917_v7  ;;  %3901 = vmatmul.msk.f32.gmra.mxu0 %vm752_vm3, %v1930_v53 }
 0x622   :  { %2366 = vmatmul.f32.gmra.mxu3 %v3953_v18 }
 0x623   :  { %v1716_v36 = vpop.f32.mrf.mxu1 }
 0x624   :  { %3867 = vmatmul.msk.f32.gmra.mxu2 %vm752_vm3, %v1716_v36 }
 0x625   :  { %v1933_v40 = vpop.f32.mrf.mxu3 }
 0x626   :  { %2149 = vmatmul.f32.gmra.mxu1 %v3918_v42  ;;  %3902 = vmatmul.msk.f32.gmra.mxu0 %vm752_vm3, %v1933_v40 }
 0x62b   :  { %v2105_v44 = vpop.f32.mrf.mxu1  ;;  %v2007_v37 = vpop.f32.mrf.mxu0 }
 0x62c   :  { %3922 = vmatmul.msk.f32.vlgmr.msra.gmra.mxu2 %vm752_vm3, %v2105_v44 }
 0x62d   :  { %v2322_v14 = vpop.f32.mrf.mxu3 }
 0x62e   :  { %3957 = vmatmul.msk.f32.vlgmr.msra.gmra.mxu0 %vm752_vm3, %v2322_v14 }
 0x62f   :  { %v1790_v26 = vpop.f32.mrf.mxu2 }
 0x630   :  { %v1838_v63 = vadd.f32 %v1790_v26, %v5387_v15 }
 0x632   :  { %v5692_v5 = vadd.f32 %v2007_v37, %v1838_v63 }
 0x633   :  { %v2108_v1 = vpop.f32.mrf.mxu1  ;;  %v2010_v16 = vpop.f32.mrf.mxu0 }
 0x634   :  { %3923 = vmatmul.msk.f32.gmra.mxu2 %vm752_vm3, %v2108_v1 }
 0x635   :  { %v2325_v43 = vpop.f32.mrf.mxu3 }
 0x636   :  { %3958 = vmatmul.msk.f32.gmra.mxu0 %vm752_vm3, %v2325_v43 }
 0x637   :  { %v1793_v9 = vpop.f32.mrf.mxu2 }
 0x638   :  { %v1839_v46 = vadd.f32 %v1793_v9, %v5396_v61 }
 0x63a   :  { %v5697_v52 = vadd.f32 %v2010_v16, %v1839_v46 }
 0x63b   :  { %v2111_v2 = vpop.f32.mrf.mxu1  ;;  %v2013_v49 = vpop.f32.mrf.mxu0 }
 0x63c   :  { %3924 = vmatmul.msk.f32.gmra.mxu2 %vm752_vm3, %v2111_v2 }
 0x63d   :  { %v2328_v57 = vpop.f32.mrf.mxu3 }
 0x63e   :  { %3959 = vmatmul.msk.f32.gmra.mxu0 %vm752_vm3, %v2328_v57 }
 0x63f   :  { %v1796_v15 = vpop.f32.mrf.mxu2 }
 0x640   :  { %v1840_v51 = vadd.f32 %v1796_v15, %v5405_v39 }
 0x642   :  { %v5702_v6 = vadd.f32 %v2013_v49, %v1840_v51 }
 0x643   :  { %v2114_v34 = vpop.f32.mrf.mxu1  ;;  %v2016_v22 = vpop.f32.mrf.mxu0 }
 0x644   :  { %3925 = vmatmul.msk.f32.gmra.mxu2 %vm752_vm3, %v2114_v34 }
 0x645   :  { %v2331_v17 = vpop.f32.mrf.mxu3 }
 0x646   :  { %3960 = vmatmul.msk.f32.gmra.mxu0 %vm752_vm3, %v2331_v17 }
 0x647   :  { %v1799_v61 = vpop.f32.mrf.mxu2 }
 0x648   :  { %v1841_v27 = vadd.f32 %v1799_v61, %v5414_v0 }
 0x64a   :  { %v5707_v59 = vadd.f32 %v2016_v22, %v1841_v27 }
 0x64b   :  { %v2117_v28 = vpop.f32.mrf.mxu1  ;;  %v2019_v4 = vpop.f32.mrf.mxu0 }
 0x64c   :  { %3926 = vmatmul.msk.f32.gmra.mxu2 %vm752_vm3, %v2117_v28 }
 0x64d   :  { %v2334_v20 = vpop.f32.mrf.mxu3 }
 0x64e   :  { %3961 = vmatmul.msk.f32.gmra.mxu0 %vm752_vm3, %v2334_v20 }
 0x64f   :  { %v1802_v39 = vpop.f32.mrf.mxu2 }
 0x650   :  { %v1842_v50 = vadd.f32 %v1802_v39, %v5423_v55 }
 0x652   :  { %v5712_v19 = vadd.f32 %v2019_v4, %v1842_v50 }
 0x653   :  { %v2120_v12 = vpop.f32.mrf.mxu1  ;;  %v2022_v38 = vpop.f32.mrf.mxu0 }
 0x654   :  { %3927 = vmatmul.msk.f32.gmra.mxu2 %vm752_vm3, %v2120_v12 }
 0x655   :  { %v2337_v48 = vpop.f32.mrf.mxu3 }
 0x656   :  { %3962 = vmatmul.msk.f32.gmra.mxu0 %vm752_vm3, %v2337_v48 }
 0x657   :  { %v1805_v0 = vpop.f32.mrf.mxu2 }
 0x658   :  { %v1843_v30 = vadd.f32 %v1805_v0, %v5432_v47 }
 0x65a   :  { %v5717_v54 = vadd.f32 %v2022_v38, %v1843_v30 }
 0x65b   :  { %v2123_v58 = vpop.f32.mrf.mxu1  ;;  %v2025_v25 = vpop.f32.mrf.mxu0 }
 0x65c   :  { %3928 = vmatmul.msk.f32.gmra.mxu2 %vm752_vm3, %v2123_v58 }
 0x65d   :  { %v2340_v32 = vpop.f32.mrf.mxu3 }
 0x65e   :  { %3963 = vmatmul.msk.f32.gmra.mxu0 %vm752_vm3, %v2340_v32 }
 0x65f   :  { %v1808_v55 = vpop.f32.mrf.mxu2 }
 0x660   :  { %v1844_v24 = vadd.f32 %v1808_v55, %v5441_v3 }
 0x662   :  { %v5722_v23 = vadd.f32 %v2025_v25, %v1844_v24 }
 0x663   :  { %v2126_v8 = vpop.f32.mrf.mxu1  ;;  %v2028_v31 = vpop.f32.mrf.mxu0 }
 0x664   :  { %3929 = vmatmul.msk.f32.gmra.mxu2 %vm752_vm3, %v2126_v8 }
 0x665   :  { %v2343_v56 = vpop.f32.mrf.mxu3 }
 0x666   :  { %3964 = vmatmul.msk.f32.gmra.mxu0 %vm752_vm3, %v2343_v56 }
 0x667   :  { %v1811_v47 = vpop.f32.mrf.mxu2 }
 0x668   :  { %v1845_v29 = vadd.f32 %v1811_v47, %v5452_v10 }
 0x66a   :  { %v5727_v60 = vadd.f32 %v2028_v31, %v1845_v29  ;;  %v5781_v31 = vld [vmem:[%s6229_s5] ss:$0 sm:$0xff] }
 0x66b   :  { %v2129_v7 = vpop.f32.mrf.mxu1  ;;  %v5729_v53 = vpop.f32.mrf.mxu0 }
 0x66c   :  { %3930 = vmatmul.msk.f32.gmra.mxu2 %vm752_vm3, %v2129_v7 }
 0x66d   :  { %v2346_v3 = vpop.f32.mrf.mxu3 }
 0x66e   :  { %3965 = vmatmul.msk.f32.gmra.mxu0 %vm752_vm3, %v2346_v3 }
 0x66f   :  { %v5733_v18 = vpop.f32.mrf.mxu2 }
 0x673   :  { %v2132_v36 = vpop.f32.mrf.mxu1  ;;  %v5735_v42 = vpop.f32.mrf.mxu0 }
 0x674   :  { %3931 = vmatmul.msk.f32.gmra.mxu2 %vm752_vm3, %v2132_v36 }
 0x675   :  { %v2349_v40 = vpop.f32.mrf.mxu3 }
 0x676   :  { %3966 = vmatmul.msk.f32.gmra.mxu0 %vm752_vm3, %v2349_v40 }
 0x677   :  { %v5739_v10 = vpop.f32.mrf.mxu2 }
 0x67b   :  { %v2135_v44 = vpop.f32.mrf.mxu1  ;;  %v5741_v37 = vpop.f32.mrf.mxu0 }
 0x67c   :  { %3932 = vmatmul.msk.f32.gmra.mxu2 %vm752_vm3, %v2135_v44 }
 0x67d   :  { %v2352_v14 = vpop.f32.mrf.mxu3 }
 0x67e   :  { %3967 = vmatmul.msk.f32.gmra.mxu0 %vm752_vm3, %v2352_v14 }
 0x67f   :  { %v5745_v26 = vpop.f32.mrf.mxu2 }
 0x683   :  { %v2138_v63 = vpop.f32.mrf.mxu1  ;;  %v5747_v1 = vpop.f32.mrf.mxu0 }
 0x684   :  { %3933 = vmatmul.msk.f32.gmra.mxu2 %vm752_vm3, %v2138_v63 }
 0x685   :  { %v2355_v16 = vpop.f32.mrf.mxu3 }
 0x686   :  { %3968 = vmatmul.msk.f32.gmra.mxu0 %vm752_vm3, %v2355_v16 }
 0x687   :  { %v5751_v43 = vpop.f32.mrf.mxu2 }
 0x68b   :  { %v2141_v9 = vpop.f32.mrf.mxu1  ;;  %v5753_v46 = vpop.f32.mrf.mxu0 }
 0x68c   :  { %3934 = vmatmul.msk.f32.gmra.mxu2 %vm752_vm3, %v2141_v9 }
 0x68d   :  { %v2358_v2 = vpop.f32.mrf.mxu3 }
 0x68e   :  { %3969 = vmatmul.msk.f32.gmra.mxu0 %vm752_vm3, %v2358_v2 }
 0x68f   :  { %v5757_v49 = vpop.f32.mrf.mxu2 }
 0x693   :  { %v2144_v57 = vpop.f32.mrf.mxu1  ;;  %v5759_v15 = vpop.f32.mrf.mxu0 }
 0x694   :  { %3935 = vmatmul.msk.f32.gmra.mxu2 %vm752_vm3, %v2144_v57 }
 0x695   :  { %v2361_v51 = vpop.f32.mrf.mxu3 }
 0x696   :  { %3970 = vmatmul.msk.f32.gmra.mxu0 %vm752_vm3, %v2361_v51 }
 0x697   :  { %v5763_v34 = vpop.f32.mrf.mxu2 }
 0x69b   :  { %v2147_v22 = vpop.f32.mrf.mxu1  ;;  %v5765_v17 = vpop.f32.mrf.mxu0 }
 0x69c   :  { %3936 = vmatmul.msk.f32.gmra.mxu2 %vm752_vm3, %v2147_v22 }
 0x69d   :  { %v2364_v61 = vpop.f32.mrf.mxu3 }
 0x69e   :  { %3971 = vmatmul.msk.f32.gmra.mxu0 %vm752_vm3, %v2364_v61 }
 0x69f   :  { %v5769_v27 = vpop.f32.mrf.mxu2 }
 0x6a3   :  { %v2150_v28 = vpop.f32.mrf.mxu1  ;;  %v5771_v4 = vpop.f32.mrf.mxu0 }
 0x6a4   :  { %3937 = vmatmul.msk.f32.gmra.mxu2 %vm752_vm3, %v2150_v28 }
 0x6a5   :  { %v2367_v20 = vpop.f32.mrf.mxu3 }
 0x6a6   :  { %3972 = vmatmul.msk.f32.gmra.mxu0 %vm752_vm3, %v2367_v20 }
 0x6a7   :  { %v5775_v39 = vpop.f32.mrf.mxu2 }
 0x6ab   :  { %v2441_v50 = vpop.f32.mrf.mxu0 }
 0x6af   :  { %v2224_v12 = vpop.f32.mrf.mxu2 }
 0x6b0   :  { %v2272_v55 = vadd.f32 %v2224_v12, %v5692_v5 }
 0x6b2   :  { %v2489_v8 = vadd.f32 %v2441_v50, %v2272_v55 }
 0x6b3   :  { %v2444_v38 = vpop.f32.mrf.mxu0 }
 0x6b4   :  { %v2509_v7 = vadd.f32 %v5781_v31, %v2489_v8 }
 0x6b7   :  { %v2227_v48 = vpop.f32.mrf.mxu2 }
 0x6b8   :  { %v2273_v3 = vadd.f32 %v2227_v48, %v5697_v52 }
 0x6ba   :  { %v2490_v5 = vadd.f32 %v2444_v38, %v2273_v3 }
 0x6bb   :  { %v2447_v0 = vpop.f32.mrf.mxu0 }
 0x6bc   :  { %v5789_v9 = vadd.f32 %v5781_v31, %v2490_v5 }
 0x6bf   :  { %v2230_v30 = vpop.f32.mrf.mxu2 }
 0x6c3   :  { %v2450_v58 = vpop.f32.mrf.mxu0 }
 0x6c7   :  { %v2233_v25 = vpop.f32.mrf.mxu2 }
 0x6c8   :  { %v2275_v20 = vadd.f32 %v2233_v25, %v5707_v59 }
 0x6ca   :  { %v2492_v38 = vadd.f32 %v2450_v58, %v2275_v20 }
 0x6cb   :  { %v2453_v32 = vpop.f32.mrf.mxu0 }
 0x6cf   :  { %v2236_v24 = vpop.f32.mrf.mxu2 }
 0x6d0   :  { %v2276_v56 = vadd.f32 %v2236_v24, %v5712_v19  ;;  %v2274_v19 = vadd.f32 %v2230_v30, %v5702_v6 }
 0x6d2   :  { %v2493_v47 = vadd.f32 %v2453_v32, %v2276_v56  ;;  %v2491_v51 = vadd.f32 %v2447_v0, %v2274_v19 }
 0x6d3   :  { %v2456_v29 = vpop.f32.mrf.mxu0 }
 0x6d4   :  { %v2513_v36 = vadd.f32 %v5781_v31, %v2493_v47 }
 0x6d6   :  { %v2525_v40 = vmax.f32 %v2509_v7, %v2513_v36  ;;  %v1850_v7 = vadd.f32 %v5757_v49, %v5514_v11 }
 0x6d7   :  { %v2239_v44 = vpop.f32.mrf.mxu2 }
 0x6d8   :  { %v2277_v14 = vadd.f32 %v2239_v44, %v5717_v54  ;;  %v5799_v54 = vadd.f32 %v5781_v31, %v2491_v51  ;;  %v1847_v44 = vadd.f32 %v5739_v10, %v5474_v21  ;;  %v2067_v5 = vadd.f32 %v5753_v46, %v1850_v7  ;;  %v2542_v7 = vld [vmem:[%s6230_s6 + $0x8] sm:$0xff] }
 0x6d9   :  { %v1848_v21 = vadd.f32 %v5745_v26, %v5485_v35  ;;  %v1849_v35 = vadd.f32 %v5751_v43, %v5496_v33 }
 0x6da   :  { %v2494_v63 = vadd.f32 %v2456_v29, %v2277_v14 }
 0x6db   :  { %v2459_v16 = vpop.f32.mrf.mxu0 }
 0x6dc   :  { %v5793_v2 = vadd.f32 %v5781_v31, %v2494_v63 }
 0x6de   :  { %v2526_v52 = vmax.f32 %v5789_v9, %v5793_v2  ;;  %v2064_v9 = vadd.f32 %v5735_v42, %v1847_v44  ;;  %v3980_v44 = vld [vmem:[%s6230_s6 + $0x38] sm:$0xff] }
 0x6df   :  { %v2242_v57 = vpop.f32.mrf.mxu2 }
 0x6e0   :  { %v2278_v22 = vadd.f32 %v2242_v57, %v5722_v23  ;;  %v5809_v23 = vadd.f32 %v5781_v31, %v2492_v38 }
 0x6e2   :  { %v2495_v61 = vadd.f32 %v2459_v16, %v2278_v22  ;;  %v2065_v22 = vadd.f32 %v5741_v37, %v1848_v21  ;;  %v3997_v21 = vld [vmem:[%s6230_s6 + $0x40] sm:$0xff] }
 0x6e3   :  { %v2462_v28 = vpop.f32.mrf.mxu0 }
 0x6e4   :  { %v5803_v50 = vadd.f32 %v5781_v31, %v2495_v61 }
 0x6e6   :  { %v2527_v6 = vmax.f32 %v5799_v54, %v5803_v50  ;;  %v3977_v50 = vld [vmem:[%s6230_s6 + $0x20] sm:$0xff] }
 0x6e7   :  { %v2245_v12 = vpop.f32.mrf.mxu2 }
 0x6e8   :  { %v2279_v48 = vadd.f32 %v2245_v12, %v5727_v60  ;;  %v1846_v60 = vadd.f32 %v5733_v18, %v5463_v45  ;;  %v1851_v45 = vadd.f32 %v5763_v34, %v5525_v62  ;;  %v1852_v62 = vadd.f32 %v5769_v27, %v5536_v13 }
 0x6e9   :  { %v1853_v13 = vadd.f32 %v5775_v39, %v5545_v41 }
 0x6ea   :  { %v2496_v0 = vadd.f32 %v2462_v28, %v2279_v48  ;;  %v2063_v29 = vadd.f32 %v5729_v53, %v1846_v60  ;;  %v2068_v10 = vadd.f32 %v5759_v15, %v1851_v45  ;;  %v2069_v26 = vadd.f32 %v5765_v17, %v1852_v62  ;;  %v4057_v62 = vld [vmem:[%s6230_s6 + $0xc0] sm:$0xff] }
 0x6eb   :  { %v2465_v30 = vpop.f32.mrf.mxu0  ;;  %v2070_v33 = vadd.f32 %v5771_v4, %v1853_v13  ;;  %v4090_v13 = vld [vmem:[%s6230_s6 + $0x118] sm:$0xff] }
 0x6ec   :  { %v5812_v32 = vadd.f32 %v5781_v31, %v2496_v0  ;;  %v2066_v0 = vadd.f32 %v5747_v1, %v1849_v35  ;;  %v4060_v35 = vld [vmem:[%s6230_s6 + $0xd8] sm:$0xff] }
 0x6ee   :  { %v2528_v59 = vmax.f32 %v5809_v23, %v5812_v32  ;;  %v2541_v23 = vld [vmem:[%s6230_s6] sm:$0xff] }
 0x6ef   :  { %v2248_v25 = vpop.f32.mrf.mxu2  ;;  %v4027_v32 = vld [vmem:[%s6230_s6 + $0x80] sm:$0xff] }
 0x6f0   :  { %v2280_v36 = vadd.f32 %v2248_v25, %v2063_v29 }
 0x6f2   :  { %v2497_v63 = vadd.f32 %v2465_v30, %v2280_v36  ;;  %v2543_v36 = vld [vmem:[%s6230_s6 + $0x10] sm:$0xff] }
 0x6f3   :  { %v2468_v55 = vpop.f32.mrf.mxu0 }
 0x6f4   :  { %v2517_v19 = vadd.f32 %v5781_v31, %v2497_v63  ;;  %v2587_v63 = vld [vmem:[%s6231_s7] sm:$0xff] }
 0x6f7   :  { %v2251_v24 = vpop.f32.mrf.mxu2 }
 0x6f8   :  { %v2281_v11 = vadd.f32 %v2251_v24, %v2064_v9 }
 0x6fa   :  { %v2498_v57 = vadd.f32 %v2468_v55, %v2281_v11 }
 0x6fb   :  { %v2471_v8 = vpop.f32.mrf.mxu0 }
 0x6fc   :  { %v2518_v61 = vadd.f32 %v5781_v31, %v2498_v57  ;;  %v4029_v57 = vld [vmem:[%s6230_s6 + $0x90] sm:$0xff] }
 0x6ff   :  { %v2254_v56 = vpop.f32.mrf.mxu2 }
 0x700   :  { %v2282_v28 = vadd.f32 %v2254_v56, %v2065_v22  ;;  %v4012_v22 = vld [vmem:[%s6230_s6 + $0x60] sm:$0xff] }
 0x702   :  { %v2499_v38 = vadd.f32 %v2471_v8, %v2282_v28  ;;  %v4014_v28 = vld [vmem:[%s6230_s6 + $0x70] sm:$0xff] }
 0x703   :  { %v2474_v47 = vpop.f32.mrf.mxu0 }
 0x704   :  { %v2519_v30 = vadd.f32 %v5781_v31, %v2499_v38  ;;  %v4088_v38 = vld [vmem:[%s6230_s6 + $0x108] sm:$0xff] }
 0x707   :  { %v2257_v58 = vpop.f32.mrf.mxu2 }
 0x708   :  { %v2283_v25 = vadd.f32 %v2257_v58, %v2066_v0  ;;  %v4045_v0 = vld [vmem:[%s6230_s6 + $0xb8] sm:$0xff] }
 0x70a   :  { %v2500_v56 = vadd.f32 %v2474_v47, %v2283_v25  ;;  %v3978_v47 = vld [vmem:[%s6230_s6 + $0x28] sm:$0xff]  ;;  %v4072_v25 = vld [vmem:[%s6230_s6 + $0xe0] sm:$0xff] }
 0x70b   :  { %v2477_v3 = vpop.f32.mrf.mxu0 }
 0x70c   :  { %v2520_v41 = vadd.f32 %v5781_v31, %v2500_v56 }
 0x70f   :  { %v2260_v14 = vpop.f32.mrf.mxu2 }
 0x710   :  { %v2284_v16 = vadd.f32 %v2260_v14, %v2067_v5  ;;  %v2544_v5 = vld [vmem:[%s6230_s6 + $0x18] sm:$0xff]  ;;  %v2588_v14 = vld [vmem:[%s6231_s7 + $0x8] sm:$0xf] }
 0x712   :  { %v2501_v18 = vadd.f32 %v2477_v3, %v2284_v16  ;;  %v3979_v3 = vld [vmem:[%s6230_s6 + $0x30] sm:$0xff] }
 0x713   :  { %v2480_v53 = vpop.f32.mrf.mxu0 }
 0x714   :  { %v2521_v49 = vadd.f32 %v5781_v31, %v2501_v18 }
 0x716   :  { %v2529_v46 = vmax.f32 %v2517_v19, %v2521_v49 }
 0x717   :  { %v2263_v2 = vpop.f32.mrf.mxu2 }
 0x718   :  { %v2533_v51 = vmax.f32 %v2525_v40, %v2529_v46  ;;  %v2285_v42 = vadd.f32 %v2263_v2, %v2068_v10  ;;  %v3998_v10 = vld [vmem:[%s6230_s6 + $0x48] sm:$0xff]  ;;  %v3999_v2 = vld [vmem:[%s6230_s6 + $0x50] sm:$0xff] }
 0x719   :  { %v4028_v46 = vld [vmem:[%s6230_s6 + $0x88] sm:$0xff] }
 0x71a   :  { %v2502_v34 = vadd.f32 %v2480_v53, %v2285_v42  ;;  %v4030_v42 = vld [vmem:[%s6230_s6 + $0x98] sm:$0xff] }
 0x71b   :  { %v2483_v12 = vpop.f32.mrf.mxu0 }
 0x71c   :  { %v2522_v20 = vadd.f32 %v5781_v31, %v2502_v34  ;;  %v4013_v34 = vld [vmem:[%s6230_s6 + $0x68] sm:$0xff] }
 0x71e   :  { %v2530_v15 = vmax.f32 %v2518_v61, %v2522_v20  ;;  %v4058_v61 = vld [vmem:[%s6230_s6 + $0xc8] sm:$0xff]  ;;  %v4059_v20 = vld [vmem:[%s6230_s6 + $0xd0] sm:$0xff] }
 0x71f   :  { %v2266_v40 = vpop.f32.mrf.mxu2 }
 0x720   :  { %v2534_v48 = vmax.f32 %v2526_v52, %v2530_v15  ;;  %v2286_v37 = vadd.f32 %v2266_v40, %v2069_v26  ;;  %v4042_v26 = vld [vmem:[%s6230_s6 + $0xa0] sm:$0xff]  ;;  %v4043_v40 = vld [vmem:[%s6230_s6 + $0xa8] sm:$0xff] }
 0x721   :  { %v4087_v15 = vld [vmem:[%s6230_s6 + $0x100] sm:$0xff] }
 0x722   :  { %v2503_v27 = vadd.f32 %v2483_v12, %v2286_v37  ;;  %v5861_v54 = vmax.f32 %v2534_v48, 0.0  ;;  %v4015_v12 = vld [vmem:[%s6230_s6 + $0x78] sm:$0xff]  ;;  %v4044_v48 = vld [vmem:[%s6230_s6 + $0xb0] sm:$0xff] }
 0x723   :  { %v2486_v24 = vpop.f32.mrf.mxu0  ;;  %v4089_v37 = vld [vmem:[%s6230_s6 + $0x110] sm:$0xff] }
 0x724   :  { %v2523_v55 = vadd.f32 %v5781_v31, %v2503_v27  ;;  %v4006_v27 = vld [vmem:[%s6231_s7 + $0x28] sm:$0xf] }
 0x726   :  { %v2531_v43 = vmax.f32 %v2519_v30, %v2523_v55  ;;  %v4005_v55 = vld [vmem:[%s6231_s7 + $0x20] sm:$0xff] }
 0x727   :  { %v2269_v17 = vpop.f32.mrf.mxu2 }
 0x728   :  { %v2535_v52 = vmax.f32 %v2527_v6, %v2531_v43  ;;  %v2287_v1 = vadd.f32 %v2269_v17, %v2070_v33  ;;  %v3986_v6 = vld [vmem:[%s6231_s7 + $0x18] sm:$0xf] }
 0x72a   :  { %v2504_v8 = vadd.f32 %v2486_v24, %v2287_v1  ;;  %v5856_v29 = vmax.f32 %v2535_v52, 0.0  ;;  %v4073_v24 = vld [vmem:[%s6230_s6 + $0xe8] sm:$0xff] }
 0x72c   :  { %v2524_v39 = vadd.f32 %v5781_v31, %v2504_v8  ;;  %v5866_v31 = vmax.f32 %v2533_v51, 0.0  ;;  %v4000_v51 = vld [vmem:[%s6230_s6 + $0x58] sm:$0xff]  ;;  %v4074_v8 = vld [vmem:[%s6230_s6 + $0xf0] sm:$0xff] }
 0x72e   :  { %v2532_v60 = vmax.f32 %v2520_v41, %v2524_v39 }
 0x730   :  { %v2536_v58 = vmax.f32 %v2528_v59, %v2532_v60  ;;  %v3985_v59 = vld [vmem:[%s6231_s7 + $0x10] sm:$0xff] }
 0x732   :  { %v5854_v4 = vmax.f32 %v2536_v58, 0.0  ;;  %v4075_v58 = vld [vmem:[%s6230_s6 + $0xf8] sm:$0xff] }
 0x734   :  { %2570 = vmatpush.msrb.mxu1 %v5854_v4  ;;  %2618 = vmatpush.msrb.mxu2 %v5854_v4 }
 0x735   :  { %2949 = vmatpush.msra.mxu3 %v5854_v4 }
 0x736   :  { %2571 = vmatpush.msrb.mxu1 %v5856_v29  ;;  %2619 = vmatpush.msrb.mxu2 %v5856_v29 }
 0x737   :  { %2950 = vmatpush.msra.mxu3 %v5856_v29 }
 0x738   :  { %2572 = vmatpush.msrb.mxu1 %v5861_v54  ;;  %2620 = vmatpush.msrb.mxu2 %v5861_v54 }
 0x739   :  { %2951 = vmatpush.msra.mxu3 %v5861_v54 }
 0x73a   :  { %2573 = vmatpush.msrb.mxu1 %v5866_v31  ;;  %2621 = vmatpush.msrb.mxu2 %v5866_v31 }
 0x73b   :  { %2952 = vmatpush.msra.mxu3 %v5866_v31  ;;  %3981 = vmatmul.msk.f32.vlgmr.msrb.gmra.mxu2 %vm2545_vm4, %v3977_v50 }
 0x73c   :  { %3987 = vmatpush.msk.msra.mxu1 %vm801_vm2, %v3986_v6  ;;  %4031 = vmatmul.msk.f32.vlgmr.msra.gmra.mxu3 %vm2545_vm4, %v4027_v32 }
 0x73d   :  { %3143 = vmatpush.msrb.mxu3 %v5854_v4  ;;  %3973 = vmatmul.msk.f32.vlgmr.msrb.gmra.mxu1 %vm2545_vm4, %v2541_v23  ;;  %v4035_v23 = vld [vmem:[%s6231_s7 + $0x40] sm:$0xff] }
 0x73e   :  { %2668 = vmatpush.msra.mxu1 %v3985_v59  ;;  %3992 = vmatpush.msk.msra.mxu2 %vm801_vm2, %v2588_v14  ;;  %v4066_v14 = vld [vmem:[%s6231_s7 + $0x68] sm:$0xf] }
 0x73f   :  { %3144 = vmatpush.msrb.mxu3 %v5856_v29 }
 0x740   :  { %2755 = vmatpush.msrb.mxu1 %v5854_v4  ;;  %2712 = vmatpush.msra.mxu2 %v2587_v63 }
 0x741   :  { %3145 = vmatpush.msrb.mxu3 %v5861_v54 }
 0x742   :  { %2756 = vmatpush.msrb.mxu1 %v5856_v29  ;;  %4007 = vmatpush.msk.msrb.mxu2 %vm801_vm2, %v4006_v27 }
 0x743   :  { %3146 = vmatpush.msrb.mxu3 %v5866_v31  ;;  %3982 = vmatmul.msk.f32.gmra.mxu2 %vm2545_vm4, %v3978_v47 }
 0x744   :  { %2757 = vmatpush.msrb.mxu1 %v5861_v54  ;;  %4032 = vmatmul.msk.f32.gmra.mxu3 %vm2545_vm4, %v4028_v46  ;;  %v4096_v46 = vld [vmem:[%s6231_s7 + $0x88] sm:$0xf] }
 0x745   :  { %3337 = vmatpush.msra.mxu3 %v5854_v4  ;;  %3974 = vmatmul.msk.f32.gmra.mxu1 %vm2545_vm4, %v2542_v7 }
 0x746   :  { %2758 = vmatpush.msrb.mxu1 %v5866_v31  ;;  %2805 = vmatpush.msrb.mxu2 %v4005_v55 }
 0x747   :  { %3338 = vmatpush.msra.mxu3 %v5856_v29 }
 0x749   :  { %3339 = vmatpush.msra.mxu3 %v5861_v54 }
 0x74b   :  { %3340 = vmatpush.msra.mxu3 %v5866_v31  ;;  %3983 = vmatmul.msk.f32.gmra.mxu2 %vm2545_vm4, %v3979_v3  ;;  %v4051_v3 = vld [vmem:[%s6231_s7 + $0x58] sm:$0xf] }
 0x74c   :  { %4033 = vmatmul.msk.f32.gmra.mxu3 %vm2545_vm4, %v4029_v57 }
 0x74d   :  { %3975 = vmatmul.msk.f32.gmra.mxu1 %vm2545_vm4, %v2543_v36 }
 0x753   :  { %3984 = vmatmul.msk.f32.gmra.mxu2 %vm2545_vm4, %v3980_v44 }
 0x754   :  { %4034 = vmatmul.msk.f32.gmra.mxu3 %vm2545_vm4, %v4030_v42 }
 0x755   :  { %3976 = vmatmul.msk.f32.gmra.mxu1 %vm2545_vm4, %v2544_v5  ;;  %v4050_v5 = vld [vmem:[%s6231_s7 + $0x50] sm:$0xff] }
 0x75c   :  { %4061 = vmatmul.msk.f32.vlgmr.msrb.gmra.mxu3 %vm2545_vm4, %v4057_v62 }
 0x764   :  { %4062 = vmatmul.msk.f32.gmra.mxu3 %vm2545_vm4, %v4058_v61 }
 0x76c   :  { %4063 = vmatmul.msk.f32.gmra.mxu3 %vm2545_vm4, %v4059_v20 }
 0x774   :  { %4064 = vmatmul.msk.f32.gmra.mxu3 %vm2545_vm4, %v4060_v35 }
 0x77c   :  { %4091 = vmatmul.msk.f32.vlgmr.msra.gmra.mxu3 %vm2545_vm4, %v4087_v15 }
 0x784   :  { %4092 = vmatmul.msk.f32.gmra.mxu3 %vm2545_vm4, %v4088_v38 }
 0x78c   :  { %4093 = vmatmul.msk.f32.gmra.mxu3 %vm2545_vm4, %v4089_v37 }
 0x794   :  { %4094 = vmatmul.msk.f32.gmra.mxu3 %vm2545_vm4, %v4090_v13 }
 0x7ba   :  { %v2575_v16 = vpop.f32.mrf.mxu1 }
 0x7bb   :  { %3993 = vmatmul.msk.f32.vlgmr.msra.gmra.mxu2 %vm752_vm3, %v2575_v16 }
 0x7be   :  { %v2623_v9 = vpop.f32.mrf.mxu2 }
 0x7bf   :  { %3988 = vmatmul.msk.f32.vlgmr.msra.gmra.mxu1 %vm752_vm3, %v2623_v9  ;;  %v2954_v6 = vpop.f32.mrf.mxu3  ;;  %v4065_v9 = vld [vmem:[%s6231_s7 + $0x60] sm:$0xff] }
 0x7c0   :  { %2852 = vmatpush.msra.mxu1 %v5854_v4 }
 0x7c2   :  { %2853 = vmatpush.msra.mxu1 %v5856_v29  ;;  %v2578_v45 = vpop.f32.mrf.mxu1 }
 0x7c3   :  { %3994 = vmatmul.msk.f32.gmra.mxu2 %vm752_vm3, %v2578_v45 }
 0x7c4   :  { %2854 = vmatpush.msra.mxu1 %v5861_v54 }
 0x7c6   :  { %2855 = vmatpush.msra.mxu1 %v5866_v31  ;;  %v2626_v18 = vpop.f32.mrf.mxu2 }
 0x7c7   :  { %3989 = vmatmul.msk.f32.gmra.mxu1 %vm752_vm3, %v2626_v18  ;;  %v2957_v59 = vpop.f32.mrf.mxu3 }
 0x7ca   :  { %v2581_v53 = vpop.f32.mrf.mxu1 }
 0x7cb   :  { %3995 = vmatmul.msk.f32.gmra.mxu2 %vm752_vm3, %v2581_v53 }
 0x7ce   :  { %v2629_v19 = vpop.f32.mrf.mxu2 }
 0x7cf   :  { %3990 = vmatmul.msk.f32.gmra.mxu1 %vm752_vm3, %v2629_v19  ;;  %v2960_v7 = vpop.f32.mrf.mxu3 }
 0x7d2   :  { %v2584_v11 = vpop.f32.mrf.mxu1 }
 0x7d3   :  { %3996 = vmatmul.msk.f32.gmra.mxu2 %vm752_vm3, %v2584_v11  ;;  %v4081_v11 = vld [vmem:[%s6231_s7 + $0x78] sm:$0xf] }
 0x7d6   :  { %v2632_v49 = vpop.f32.mrf.mxu2 }
 0x7d7   :  { %3991 = vmatmul.msk.f32.gmra.mxu1 %vm752_vm3, %v2632_v49  ;;  %v2963_v44 = vpop.f32.mrf.mxu3 }
 0x7df   :  { %4001 = vmatmul.msk.f32.vlgmr.msrb.gmra.mxu1 %vm2545_vm4, %v3997_v21  ;;  %v3148_v16 = vpop.f32.mrf.mxu3 }
 0x7e0   :  { %3046 = vmatpush.msrb.mxu1 %v5854_v4 }
 0x7e2   :  { %3047 = vmatpush.msrb.mxu1 %v5856_v29 }
 0x7e4   :  { %3048 = vmatpush.msrb.mxu1 %v5861_v54 }
 0x7e6   :  { %3049 = vmatpush.msrb.mxu1 %v5866_v31 }
 0x7e7   :  { %4002 = vmatmul.msk.f32.gmra.mxu1 %vm2545_vm4, %v3998_v10  ;;  %v3151_v18 = vpop.f32.mrf.mxu3  ;;  %v4080_v10 = vld [vmem:[%s6231_s7 + $0x70] sm:$0xff] }
 0x7ef   :  { %4003 = vmatmul.msk.f32.gmra.mxu1 %vm2545_vm4, %v3999_v2  ;;  %v3154_v19 = vpop.f32.mrf.mxu3 }
 0x7f7   :  { %4004 = vmatmul.msk.f32.gmra.mxu1 %vm2545_vm4, %v4000_v51  ;;  %v3157_v21 = vpop.f32.mrf.mxu3  ;;  %v4095_v51 = vld [vmem:[%s6231_s7 + $0x80] sm:$0xff] }
 0x7ff   :  { %4016 = vmatmul.msk.f32.vlgmr.msra.gmra.mxu1 %vm2545_vm4, %v4012_v22  ;;  %v3342_v57 = vpop.f32.mrf.mxu3 }
 0x800   :  { %3240 = vmatpush.msra.mxu1 %v5854_v4  ;;  %v4021_v4 = vld [vmem:[%s6231_s7 + $0x38] sm:$0xf] }
 0x801   :  { %4022 = vmatpush.msk.msra.mxu2 %vm801_vm2, %v4021_v4 }
 0x802   :  { %3241 = vmatpush.msra.mxu1 %v5856_v29 }
 0x804   :  { %3242 = vmatpush.msra.mxu1 %v5861_v54  ;;  %v4020_v54 = vld [vmem:[%s6231_s7 + $0x30] sm:$0xff] }
 0x805   :  { %2902 = vmatpush.msra.mxu2 %v4020_v54 }
 0x806   :  { %3243 = vmatpush.msra.mxu1 %v5866_v31  ;;  %v4036_v31 = vld [vmem:[%s6231_s7 + $0x48] sm:$0xf] }
 0x807   :  { %4017 = vmatmul.msk.f32.gmra.mxu1 %vm2545_vm4, %v4013_v34  ;;  %4037 = vmatpush.msk.msrb.mxu0 %vm801_vm2, %v4036_v31  ;;  %v3345_v22 = vpop.f32.mrf.mxu3 }
 0x809   :  { %2999 = vmatpush.msrb.mxu0 %v4035_v23 }
 0x80a   :  { %4038 = vmatmul.msk.f32.vlgmr.msrb.gmra.mxu0 %vm752_vm3, %v2954_v6 }
 0x80b   :  { %4067 = vmatpush.msk.msra.mxu0 %vm801_vm2, %v4066_v14 }
 0x80d   :  { %3193 = vmatpush.msra.mxu0 %v4065_v9 }
 0x80f   :  { %4018 = vmatmul.msk.f32.gmra.mxu1 %vm2545_vm4, %v4014_v28  ;;  %4097 = vmatpush.msk.msrb.mxu0 %vm801_vm2, %v4096_v46  ;;  %v3348_v34 = vpop.f32.mrf.mxu3 }
 0x811   :  { %3387 = vmatpush.msrb.mxu0 %v4095_v51  ;;  %v4104_v51 = vld [vmem:[%s6233_s9 + $0x28] sm:$0xff] }
 0x812   :  { %4039 = vmatmul.msk.f32.gmra.mxu0 %vm752_vm3, %v2957_v59 }
 0x817   :  { %4019 = vmatmul.msk.f32.gmra.mxu1 %vm2545_vm4, %v4015_v12  ;;  %v3351_v28 = vpop.f32.mrf.mxu3 }
 0x81a   :  { %4040 = vmatmul.msk.f32.gmra.mxu0 %vm752_vm3, %v2960_v7 }
 0x81f   :  { %4046 = vmatmul.msk.f32.vlgmr.msrb.gmra.mxu1 %vm2545_vm4, %v4042_v26 }
 0x822   :  { %4041 = vmatmul.msk.f32.gmra.mxu0 %vm752_vm3, %v2963_v44 }
 0x827   :  { %4047 = vmatmul.msk.f32.gmra.mxu1 %vm2545_vm4, %v4043_v40 }
 0x82a   :  { %4068 = vmatmul.msk.f32.vlgmr.msra.gmra.mxu0 %vm752_vm3, %v3148_v16  ;;  %v4103_v16 = vld [vmem:[%s6233_s9 + $0x20] sm:$0xff] }
 0x82f   :  { %4048 = vmatmul.msk.f32.gmra.mxu1 %vm2545_vm4, %v4044_v48 }
 0x832   :  { %4069 = vmatmul.msk.f32.gmra.mxu0 %vm752_vm3, %v3151_v18 }
 0x837   :  { %4049 = vmatmul.msk.f32.gmra.mxu1 %vm2545_vm4, %v4045_v0 }
 0x83a   :  { %4070 = vmatmul.msk.f32.gmra.mxu0 %vm752_vm3, %v3154_v19 }
 0x83c   :  { %v2670_v30 = vpop.f32.mrf.mxu1 }
 0x83e   :  { %v2714_v33 = vpop.f32.mrf.mxu2 }
 0x83f   :  { %v6058_v43 = vadd.f32 %v2714_v33, %v2670_v30  ;;  %4076 = vmatmul.msk.f32.vlgmr.msra.gmra.mxu1 %vm2545_vm4, %v4072_v25 }
 0x842   :  { %4071 = vmatmul.msk.f32.gmra.mxu0 %vm752_vm3, %v3157_v21 }
 0x844   :  { %v2673_v17 = vpop.f32.mrf.mxu1 }
 0x846   :  { %v2717_v56 = vpop.f32.mrf.mxu2 }
 0x847   :  { %4077 = vmatmul.msk.f32.gmra.mxu1 %vm2545_vm4, %v4073_v24  ;;  %v6065_v52 = vadd.f32 %v2717_v56, %v2673_v17 }
 0x84a   :  { %4098 = vmatmul.msk.f32.vlgmr.msrb.gmra.mxu0 %vm752_vm3, %v3342_v57 }
 0x84c   :  { %v2676_v1 = vpop.f32.mrf.mxu1 }
 0x84e   :  { %v2720_v41 = vpop.f32.mrf.mxu2 }
 0x84f   :  { %4078 = vmatmul.msk.f32.gmra.mxu1 %vm2545_vm4, %v4074_v8  ;;  %v6071_v39 = vadd.f32 %v2720_v41, %v2676_v1 }
 0x852   :  { %4099 = vmatmul.msk.f32.gmra.mxu0 %vm752_vm3, %v3345_v22 }
 0x854   :  { %v6073_v60 = vpop.f32.mrf.mxu1 }
 0x856   :  { %v2723_v26 = vpop.f32.mrf.mxu2 }
 0x857   :  { %4079 = vmatmul.msk.f32.gmra.mxu1 %vm2545_vm4, %v4075_v58  ;;  %v2724_v30 = vadd.f32 %v2723_v26, %v6073_v60  ;;  %v4109_v26 = vld [vmem:[%s6233_s9 + $0x48] sm:$0xff] }
 0x85a   :  { %4100 = vmatmul.msk.f32.gmra.mxu0 %vm752_vm3, %v3348_v34 }
 0x85c   :  { %v2760_v29 = vpop.f32.mrf.mxu1 }
 0x85d   :  { %4008 = vmatmul.msk.f32.vlgmr.msrb.gmra.mxu2 %vm752_vm3, %v2760_v29 }
 0x85e   :  { %4052 = vmatpush.msk.msrb.mxu2 %vm801_vm2, %v4051_v3  ;;  %v4120_v3 = vld [vmem:[%s6232_s8] ss:$0 sm:$0xff]  ;;  %s3602_s8 = sshll.u32 %s6236_s12, 4  ;;  %s3603_s8 = int_to_ptr.hbm [resolvable:$true] %s3602_s8 }
 0x860   :  { %3096 = vmatpush.msrb.mxu2 %v4050_v5 }
 0x862   :  { %4101 = vmatmul.msk.f32.gmra.mxu0 %vm752_vm3, %v3351_v28 }
 0x864   :  { %v2763_v50 = vpop.f32.mrf.mxu1 }
 0x865   :  { %4009 = vmatmul.msk.f32.gmra.mxu2 %vm752_vm3, %v2763_v50 }
 0x86c   :  { %v2766_v32 = vpop.f32.mrf.mxu1 }
 0x86d   :  { %4010 = vmatmul.msk.f32.gmra.mxu2 %vm752_vm3, %v2766_v32 }
 0x874   :  { %v2769_v47 = vpop.f32.mrf.mxu1 }
 0x875   :  { %4011 = vmatmul.msk.f32.gmra.mxu2 %vm752_vm3, %v2769_v47 }
 0x87c   :  { %v2857_v36 = vpop.f32.mrf.mxu1 }
 0x87d   :  { %4023 = vmatmul.msk.f32.vlgmr.msra.gmra.mxu2 %vm752_vm3, %v2857_v36 }
 0x87e   :  { %4082 = vmatpush.msk.msra.mxu2 %vm801_vm2, %v4081_v11 }
 0x880   :  { %3290 = vmatpush.msra.mxu2 %v4080_v10 }
 0x884   :  { %v2860_v63 = vpop.f32.mrf.mxu1 }
 0x885   :  { %4024 = vmatmul.msk.f32.gmra.mxu2 %vm752_vm3, %v2860_v63 }
 0x887   :  { %v3001_v37 = vpop.f32.mrf.mxu0 }
 0x88c   :  { %v2863_v45 = vpop.f32.mrf.mxu1 }
 0x88d   :  { %4025 = vmatmul.msk.f32.gmra.mxu2 %vm752_vm3, %v2863_v45 }
 0x88f   :  { %v3004_v27 = vpop.f32.mrf.mxu0 }
 0x894   :  { %v2866_v53 = vpop.f32.mrf.mxu1 }
 0x895   :  { %4026 = vmatmul.msk.f32.gmra.mxu2 %vm752_vm3, %v2866_v53 }
 0x897   :  { %v3007_v33 = vpop.f32.mrf.mxu0 }
 0x89c   :  { %v3051_v49 = vpop.f32.mrf.mxu1 }
 0x89d   :  { %4053 = vmatmul.msk.f32.vlgmr.msrb.gmra.mxu2 %vm752_vm3, %v3051_v49 }
 0x89f   :  { %v3010_v56 = vpop.f32.mrf.mxu0 }
 0x8a4   :  { %v3054_v2 = vpop.f32.mrf.mxu1 }
 0x8a5   :  { %4054 = vmatmul.msk.f32.gmra.mxu2 %vm752_vm3, %v3054_v2 }
 0x8a7   :  { %v3195_v8 = vpop.f32.mrf.mxu0 }
 0x8ac   :  { %v3057_v42 = vpop.f32.mrf.mxu1 }
 0x8ad   :  { %4055 = vmatmul.msk.f32.gmra.mxu2 %vm752_vm3, %v3057_v42 }
 0x8b4   :  { %v3060_v62 = vpop.f32.mrf.mxu1 }
 0x8b5   :  { %4056 = vmatmul.msk.f32.gmra.mxu2 %vm752_vm3, %v3060_v62 }
 0x8bc   :  { %v3245_v61 = vpop.f32.mrf.mxu1 }
 0x8bd   :  { %4083 = vmatmul.msk.f32.vlgmr.msra.gmra.mxu2 %vm752_vm3, %v3245_v61 }
 0x8c4   :  { %v3248_v20 = vpop.f32.mrf.mxu1 }
 0x8c5   :  { %4084 = vmatmul.msk.f32.gmra.mxu2 %vm752_vm3, %v3248_v20 }
 0x8cc   :  { %v3251_v12 = vpop.f32.mrf.mxu1 }
 0x8cd   :  { %4085 = vmatmul.msk.f32.gmra.mxu2 %vm752_vm3, %v3251_v12 }
 0x8d4   :  { %v3254_v35 = vpop.f32.mrf.mxu1 }
 0x8d5   :  { %4086 = vmatmul.msk.f32.gmra.mxu2 %vm752_vm3, %v3254_v35 }
 0x8e0   :  { %v2807_v15 = vpop.f32.mrf.mxu2 }
 0x8e1   :  { %v2819_v40 = vadd.f32 %v2807_v15, %v6058_v43  ;;  %v3198_v43 = vpop.f32.mrf.mxu0 }
 0x8e8   :  { %v2810_v38 = vpop.f32.mrf.mxu2 }
 0x8e9   :  { %v2820_v48 = vadd.f32 %v2810_v38, %v6065_v52  ;;  %v3201_v4 = vpop.f32.mrf.mxu0  ;;  %v4105_v38 = vld [vmem:[%s6233_s9 + $0x30] sm:$0xff] }
 0x8f0   :  { %v2813_v0 = vpop.f32.mrf.mxu2 }
 0x8f1   :  { %v2821_v13 = vadd.f32 %v2813_v0, %v6071_v39  ;;  %v3204_v54 = vpop.f32.mrf.mxu0 }
 0x8f8   :  { %v2816_v25 = vpop.f32.mrf.mxu2 }
 0x8f9   :  { %v2822_v55 = vadd.f32 %v2816_v25, %v2724_v30  ;;  %v3389_v6 = vpop.f32.mrf.mxu0 }
 0x900   :  { %v2904_v17 = vpop.f32.mrf.mxu2 }
 0x901   :  { %v2916_v31 = vadd.f32 %v2904_v17, %v2819_v40  ;;  %v3392_v5 = vpop.f32.mrf.mxu0  ;;  %v4110_v40 = vld [vmem:[%s6233_s9 + $0x50] sm:$0xff] }
 0x903   :  { %v3013_v50 = vadd.f32 %v3001_v37, %v2916_v31 }
 0x908   :  { %v2907_v24 = vpop.f32.mrf.mxu2 }
 0x909   :  { %v2917_v23 = vadd.f32 %v2907_v24, %v2820_v48  ;;  %v3395_v57 = vpop.f32.mrf.mxu0 }
 0x90b   :  { %v3014_v47 = vadd.f32 %v3004_v27, %v2917_v23 }
 0x910   :  { %v2910_v1 = vpop.f32.mrf.mxu2 }
 0x911   :  { %v2918_v14 = vadd.f32 %v2910_v1, %v2821_v13  ;;  %v3398_v27 = vpop.f32.mrf.mxu0  ;;  %v3421_v1 = vld [vmem:[%s6233_s9 + $0x10] sm:$0xff] }
 0x913   :  { %v3015_v53 = vadd.f32 %v3007_v33, %v2918_v14 }
 0x918   :  { %v2913_v41 = vpop.f32.mrf.mxu2 }
 0x919   :  { %v2919_v46 = vadd.f32 %v2913_v41, %v2822_v55  ;;  %v4111_v41 = vld [vmem:[%s6233_s9 + $0x58] sm:$0xff] }
 0x91b   :  { %v3016_v34 = vadd.f32 %v3010_v56, %v2919_v46 }
 0x920   :  { %v3098_v58 = vpop.f32.mrf.mxu2 }
 0x921   :  { %v3110_v60 = vadd.f32 %v3098_v58, %v3013_v50  ;;  %v3420_v50 = vld [vmem:[%s6233_s9 + $0x8] sm:$0xff] }
 0x923   :  { %v3207_v32 = vadd.f32 %v3195_v8, %v3110_v60  ;;  %v4108_v60 = vld [vmem:[%s6233_s9 + $0x40] sm:$0xff] }
 0x928   :  { %v3101_v52 = vpop.f32.mrf.mxu2 }
 0x929   :  { %v3111_v36 = vadd.f32 %v3101_v52, %v3014_v47 }
 0x92b   :  { %v3208_v9 = vadd.f32 %v3198_v43, %v3111_v36  ;;  %v4106_v43 = vld [vmem:[%s6233_s9 + $0x38] sm:$0xff]  ;;  %v3419_v36 = vld [vmem:[%s6233_s9] sm:$0xff] }
 0x930   :  { %v3104_v29 = vpop.f32.mrf.mxu2 }
 0x931   :  { %v3112_v49 = vadd.f32 %v3104_v29, %v3015_v53 }
 0x933   :  { %v3209_v42 = vadd.f32 %v3201_v4, %v3112_v49 }
 0x938   :  { %v3107_v39 = vpop.f32.mrf.mxu2 }
 0x939   :  { %v3113_v20 = vadd.f32 %v3107_v39, %v3016_v34 }
 0x93b   :  { %v3210_v48 = vadd.f32 %v3204_v54, %v3113_v20 }
 0x940   :  { %v3292_v59 = vpop.f32.mrf.mxu2 }
 0x941   :  { %v3304_v7 = vadd.f32 %v3292_v59, %v3207_v32 }
 0x943   :  { %v3401_v44 = vadd.f32 %v3389_v6, %v3304_v7  ;;  %v3422_v6 = vld [vmem:[%s6233_s9 + $0x18] sm:$0xff] }
 0x945   :  { %v3409_v63 = vadd.f32 %v4120_v3, %v3401_v44 }
 0x947   :  { %v6159_v45 = vmax.f32 %v3409_v63, 0.0 }
 0x948   :  { %v3295_v18 = vpop.f32.mrf.mxu2 }
 0x949   :  { %v3305_v19 = vadd.f32 %v3295_v18, %v3208_v9  ;;  %v3479_v11 = vmul.f32 %v4103_v16, %v6159_v45  ;;  %v3530_v59 = vmul.f32 %v4108_v60, %v6159_v45  ;;  %v3423_v44 = vmul.f32 %v3419_v36, %v6159_v45  ;;  %v3440_v45 = vld [vmem:[%s6235_s11] sm:$0x3] }
 0x94a   :  { %v4152_v16 = vmov 0  }
 0x94b   :  { %v3402_v21 = vadd.f32 %v3392_v5, %v3305_v19  ;;  %v3483_v10 = vsel %vm3427_vm5, %v3479_v11, 0.0  ;;  %v3428_v5 = vsel %vm3427_vm5, %v3423_v44, 0.0  ;;  %4116 = vset.pattern.permute.xlu1 %v4152_v16  ;;  %4115 = vset.pattern.permute.xlu0 %v4152_v16 }
 0x94c   :  { %3484 = vadd.xlane.f32.xlu0 %v3483_v10  ;;  %4117 = vset.pattern.permute.xlu2 %v4152_v16 }
 0x94d   :  { %v3410_v2 = vadd.f32 %v4120_v3, %v3402_v21 }
 0x94f   :  { %v3414_v22 = vmax.f32 %v3410_v2, 0.0 }
 0x950   :  { %v3298_v62 = vpop.f32.mrf.mxu2 }
 0x951   :  { %v3306_v61 = vadd.f32 %v3298_v62, %v3209_v42  ;;  %v3480_v28 = vmul.f32 %v4104_v51, %v3414_v22  ;;  %v3531_v0 = vmul.f32 %v4109_v26, %v3414_v22  ;;  %v3424_v23 = vmul.f32 %v3420_v50, %v3414_v22 }
 0x952   :  { %v3417_v22 = vlaneseq }
 0x953   :  { %v3403_v12 = vadd.f32 %v3395_v57, %v3306_v61  ;;  %v3486_v35 = vsel %vm3427_vm5, %v3480_v28, 0.0  ;;  %v3537_v17 = vsel %vm3427_vm5, %v3531_v0, 0.0  ;;  %v3431_v47 = vsel %vm3427_vm5, %v3424_v23, 0.0 }
 0x954   :  { %3487 = vadd.xlane.f32.xlu1 %v3486_v35  ;;  %v3418_v62 = vand.u32 127, %v3417_v22 }
 0x955   :  { %v3411_v15 = vadd.f32 %v4120_v3, %v3403_v12 }
 0x956   :  { %vm3515_vm6 = vcmp.eq.s32.totalorder %v3418_v62, 1  ;;  %vm3464_vm7 = vcmp.eq.s32.totalorder %v3418_v62, 0  ;;  %vm3566_vm8 = vcmp.eq.s32.totalorder %v3418_v62, 2 }
 0x957   :  { %v3415_v37 = vmax.f32 %v3411_v15, 0.0  ;;  %v4121_v15 = vld [vmem:[%s6234_s10] ss:$0 sm:$0xff] }
 0x958   :  { %v3301_v13 = vpop.f32.mrf.mxu2 }
 0x959   :  { %v3307_v30 = vadd.f32 %v3301_v13, %v3210_v48  ;;  %v3532_v25 = vmul.f32 %v4110_v40, %v3415_v37  ;;  %v3481_v55 = vmul.f32 %v4105_v38, %v3415_v37  ;;  %v3425_v4 = vmul.f32 %v3421_v1, %v3415_v37 }
 0x95b   :  { %v3404_v33 = vadd.f32 %v3398_v27, %v3307_v30  ;;  %v3540_v24 = vsel %vm3427_vm5, %v3532_v25, 0.0  ;;  %v3489_v56 = vsel %vm3427_vm5, %v3481_v55, 0.0  ;;  %v3434_v54 = vsel %vm3427_vm5, %v3425_v4, 0.0 }
 0x95c   :  { %3538 = vadd.xlane.f32.xlu1 %v3537_v17  ;;  %3541 = vadd.xlane.f32.xlu2 %v3540_v24 }
 0x95d   :  { %v3412_v8 = vadd.f32 %v4120_v3, %v3404_v33  ;;  %3490 = vadd.xlane.f32.xlu0 %v3489_v56  ;;  %v3534_v3 = vsel %vm3427_vm5, %v3530_v59, 0.0 }
 0x95f   :  { %v3416_v58 = vmax.f32 %v3412_v8, 0.0 }
 0x961   :  { %v3533_v52 = vmul.f32 %v4111_v41, %v3416_v58  ;;  %v3482_v29 = vmul.f32 %v4106_v43, %v3416_v58  ;;  %v3426_v32 = vmul.f32 %v3422_v6, %v3416_v58 }
 0x963   :  { %v3543_v31 = vsel %vm3427_vm5, %v3533_v52, 0.0  ;;  %v3492_v39 = vsel %vm3427_vm5, %v3482_v29, 0.0  ;;  %v3437_v7 = vsel %vm3427_vm5, %v3426_v32, 0.0 }
 0x964   :  { %3435 = vadd.xlane.f32.xlu2 %v3434_v54  ;;  %3544 = vadd.xlane.f32.xlu1 %v3543_v31 }
 0x965   :  { %3493 = vadd.xlane.f32.xlu0 %v3492_v39 }
 0x96c   :  { %3432 = vadd.xlane.f32.xlu1 %v3431_v47  ;;  %3438 = vadd.xlane.f32.xlu2 %v3437_v7 }
 0x96d   :  { %3535 = vadd.xlane.f32.xlu0 %v3534_v3 }
 0x974   :  { %3429 = vadd.xlane.f32.xlu2 %v3428_v5 }
 0x9bf   :  { %v3485_v63 = vpop.xlane.xlu0 %3484 }
 0x9c7   :  { %v3488_v14 = vpop.xlane.xlu1 %3487 }
 0x9cf   :  { %v3539_v9 = vpop.xlane.xlu1 %3538  ;;  %v3542_v18 = vpop.xlane.xlu2 %3541 }
 0x9d0   :  { %v3491_v53 = vpop.xlane.xlu0 %3490 }
 0x9d7   :  { %v3436_v19 = vpop.xlane.xlu2 %3435  ;;  %v3545_v11 = vpop.xlane.xlu1 %3544 }
 0x9d8   :  { %v3494_v49 = vpop.xlane.xlu0 %3493  ;;  %3558 = vmatpush.msrb.mxu3 %v3545_v11 }
 0x9d9   :  { %3507 = vmatpush.msrb.mxu2 %v3494_v49 }
 0x9da   :  { %3559 = vmatpush.msrb.mxu3 %v3542_v18 }
 0x9db   :  { %3508 = vmatpush.msrb.mxu2 %v3491_v53 }
 0x9dc   :  { %3560 = vmatpush.msrb.mxu3 %v3539_v9 }
 0x9dd   :  { %3509 = vmatpush.msrb.mxu2 %v3488_v14 }
 0x9df   :  { %3510 = vmatpush.msrb.mxu2 %v3485_v63  ;;  %v3439_v21 = vpop.xlane.xlu2 %3438  ;;  %v3433_v46 = vpop.xlane.xlu1 %3432 }
 0x9e0   :  { %v3536_v10 = vpop.xlane.xlu0 %3535  ;;  %3456 = vmatpush.msrb.mxu1 %v3439_v21  ;;  %4107 = vmatmul.msk.f32.vlgmr.msrb.gmra.mxu2 %vm2545_vm4, %v3440_v45 }
 0x9e1   :  { %3561 = vmatpush.msrb.mxu3 %v3536_v10 }
 0x9e2   :  { %3457 = vmatpush.msrb.mxu1 %v3436_v19  ;;  %4112 = vmatmul.msk.f32.vlgmr.msrb.gmra.mxu3 %vm2545_vm4, %v3440_v45 }
 0x9e4   :  { %3458 = vmatpush.msrb.mxu1 %v3433_v46 }
 0x9e7   :  { %v3430_v2 = vpop.xlane.xlu2 %3429 }
 0x9e8   :  { %3459 = vmatpush.msrb.mxu1 %v3430_v2 }
 0x9e9   :  { %4102 = vmatmul.msk.f32.vlgmr.msrb.gmra.mxu1 %vm2545_vm4, %v3440_v45 }
 0xa63   :  { %v3512_v57 = vpop.f32.mrf.mxu2 }
 0xa64   :  { %3520 = vperm.xlu1 %4116, %v3512_v57  }
 0xa65   :  { %v3563_v51 = vpop.f32.mrf.mxu3 }
 0xa66   :  { %v3461_v42 = vpop.f32.mrf.mxu1  ;;  %3571 = vperm.xlu2 %4117, %v3563_v51  }
 0xa67   :  { %3469 = vperm.xlu0 %4115, %v3461_v42  }
 0xac0   :  { %v3572_v61 = vpop.permute.xlu2 %3571 }
 0xac1   :  { %v3574_v35 = vsel %vm3566_vm8, %v3572_v61, 0.0 }
 0xad6   :  { %v3521_v34 = vpop.permute.xlu1 %3520 }
 0xad7   :  { %v3523_v28 = vsel %vm3515_vm6, %v3521_v34, 0.0 }
 0xad9   :  { %v3470_v20 = vpop.permute.xlu0 %3469 }
 0xada   :  { %v3472_v12 = vsel %vm3464_vm7, %v3470_v20, 0.0 }
 0xadb   :  { %v3524_v26 = vadd.f32 %v3523_v28, %v3472_v12 }
 0xadd   :  { %v3575_v40 = vadd.f32 %v3574_v35, %v3524_v26 }
 0xadf   :  { %v3580_v38 = vadd.f32 %v4121_v15, %v3575_v40 }
 0xae1   :  { %v3582_v48 = vsel %vm3581_vm9, %v3580_v38, -inf }
 0xae2   :  { %3583 = vmax.xlane.f32.xlu2 %v3582_v48 }
 0xb55   :  { %v3584_v37 = vpop.xlane.xlu2 %3583 }
 0xb56   :  { %v3585_v0 = vsub.f32 %v3580_v38, %v3584_v37 }
 0xb58   :  { %v3586_v13 = vmul.f32 1.442695, %v3585_v0 }
 0xb5a   :  { %4122 = vpow2.f32 %v3586_v13 }
 0xb60   :  { %v4123_v27 = vpop.eup %4122 }
 0xb61   :  { %v3588_v30 = vsel %vm3581_vm9, %v4123_v27, 0.0 }
 0xb62   :  { %3589 = vadd.xlane.f32.xlu1 %v3588_v30 }
 0xbd5   :  { %v3590_v25 = vpop.xlane.xlu1 %3589 }
 0xbd6   :  { %4124 = vlog2.f32 %v3590_v25 }
 0xbdc   :  { %v4125_v55 = vpop.eup %4124 }
 0xbdd   :  { %v3592_v33 = vmul.f32 0.6931472, %v4125_v55 }
 0xbdf   :  { %v3593_v17 = vsub.f32 %v3585_v0, %v3592_v33 }
 0xbe1   :  { %3594 = vst.msk [vmem:[#allocation2] sm:$0x3] %vm3581_vm9, %v3593_v17 }
 0xbe2   :  { %3605 = dma.vmem_to_hbm [thread:$0]  %s3601_s24, 32, %s3603_s8, [#allocation3]  }
 0xbe3   :  { %4150 = dma.done.wait [#allocation3], 32  }
 0xbe4   :  { %4151 = vsyncadd [#allocation3], 4294967264 }
 0xbe5   :  { %3610 = vsyncpa [#allocation3], 1 }

</bundles_post_ra>
